<compile_context>
chip_gen: v7x
topology: tpu7x:2x2x1
jax: 0.10.0
libtpu: 0.0.40
codegen_flags: <defaults>
</compile_context>

<pallas_src>
import math
import numpy as np
import jax
import jax.numpy as jnp
from jax.experimental import pallas as pl
from jax.experimental.pallas import tpu as pltpu


def gaussian_1d(window_size: int, sigma: float = 1.5) -> np.ndarray:
    """Deterministic Gaussian window, identical to the PyTorch `gaussian`."""
    xs = np.arange(window_size, dtype=np.float64)
    g = np.exp(-((xs - window_size // 2) ** 2) / (2.0 * sigma ** 2))
    g = g / g.sum()
    return g.astype(np.float32)


def _round_up(x, m):
    return ((x + m - 1) // m) * m


def _tap_schedule(g):
    """[(weight, offsets)], pairing taps with identical weights (Gaussian symmetry)."""
    ws = len(g)
    taps = []
    lo, hi = 0, ws - 1
    while lo < hi:
        if float(g[lo]) == float(g[hi]):
            taps.append((float(g[lo]), (lo, hi)))
        else:
            taps.append((float(g[lo]), (lo,)))
            taps.append((float(g[hi]), (hi,)))
        lo += 1
        hi -= 1
    if lo == hi:
        taps.append((float(g[lo]), (lo,)))
    return taps


def _tpu_vmem_and_cores():
    """Generation-aware VMEM capacity and TensorCore count (safe fallbacks)."""
    vmem_cap = 64 * 1024 * 1024          # conservative fallback (v7x-sized)
    cores = 1
    try:
        info = pltpu.get_tpu_info()
        vmem_cap = int(getattr(info, "vmem_capacity_bytes", vmem_cap))
        for name in ("num_cores", "core_count", "num_tensorcores"):
            v = getattr(info, name, None)
            if v:
                cores = int(v)
                break
    except Exception:
        pass
    if cores == 1:
        try:
            d = jax.devices()[0]
            for name in ("num_cores", "core_count"):
                v = getattr(d, name, None)
                if v:
                    cores = int(v)
                    break
        except Exception:
            pass
    return vmem_cap, max(1, cores)


def _choose_layout(P, H, W, ws, in_itemsize):
    """Pick plane packing (Cl on lanes, Cs on sublanes, G grid steps)."""
    Ho, Wo = H - ws + 1, W - ws + 1

    # Fold planes onto the lane axis when W under-fills the 128-lane vreg
    # (needs W | 128 and an odd window for the centered roll formulation).
    if ws % 2 == 1 and W < 128 and 128 % W == 0:
        Cl = math.gcd(P, 128 // W)
    else:
        Cl = 1
    LW = Cl * W
    use_roll = (ws % 2 == 1) and (LW % 128 == 0)
    Pr = P // Cl

    vmem_cap, cores = _tpu_vmem_and_cores()
    # ~0.6 * capacity: ≈38 MiB on v7x (64 MiB/TC), ≈76 MiB on v5e/v6e (128 MiB).
    vmem_limit = int(min(vmem_cap * 0.6, 100 * 1024 * 1024))
    block_budget = int(vmem_limit * 0.7)

    sub_in = 8 * max(1, 4 // max(1, in_itemsize))      # sublane tile of input dtype
    LWp = _round_up(LW, 128)
    out_lanes = LW if use_roll else Wo
    out_lanes_p = _round_up(out_lanes, 128)

    def block_bytes(Cs):
        # Padded-tile accounting (review item): lanes to 128, sublanes to 8/16.
        cs_in = _round_up(Cs, sub_in)
        cs_f32 = _round_up(Cs, 8)
        inputs = 2 * 2 * H * cs_in * LWp * in_itemsize            # double-buffered
        temps = 4 * (6 * H * cs_f32 * LWp + 14 * Ho * cs_f32 * LWp)
        outs = 2 * cs_f32 * out_lanes_p * 4
        return inputs + temps + outs

    divisors = [d for d in range(1, Pr + 1) if Pr % d == 0]
    feasible = [d for d in divisors if block_bytes(d) <= block_budget]
    if not feasible:
        # TODO(synk): halo-tiled H-band path when a single plane group exceeds VMEM.
        feasible = [1]
    if cores >= 2:
        # Multi-TC (v7x-style): keep the grid divisible by the core count.
        pref = [d for d in feasible if (Pr // d) % cores == 0 and (Pr // d) >= cores]
        Cs = max(pref) if pref else max(feasible)
    else:
        # Single TC (v5e/v6e): fewest, largest blocks; G == 1 is fine.
        Cs = max(feasible)
    G = Pr // Cs
    return dict(Cl=Cl, Cs=Cs, G=G, LW=LW, use_roll=use_roll,
                out_lanes=out_lanes, vmem_limit=vmem_limit)


def _make_ssim_kernel(g1d, H, W, ws, Cs, Cl, LW, use_roll):
    """Kernel body; window weights and layout are trace-time constants."""
    Ho, Wo = H - ws + 1, W - ws + 1
    half = ws // 2
    taps = _tap_schedule(g1d)
    g = [float(v) for v in g1d]

    def kernel(consts_ref, a_ref, b_ref, out_ref):
        c1 = consts_ref[0]                       # SMEM scalars
        c2 = consts_ref[1]
        x1 = a_ref[0].astype(jnp.float32)        # (H, Cs, LW)
        x2 = b_ref[0].astype(jnp.float32)

        def row_pass(f):                         # (H, Cs, LW) -> (Ho, Cs, LW)
            # Slides along the untiled leading H axis: slices are free
            # (no (8,128) tile crossing), symmetric taps are paired.
            acc = None
            for w8, offs in taps:
                s = f[offs[0]:offs[0] + Ho]
                for o in offs[1:]:
                    s = s + f[o:o + Ho]
                term = w8 * s
                acc = term if acc is None else acc + term
            return acc

        if use_roll:
            def col_pass(t):                     # (Ho, Cs, LW) -> (Ho, Cs, LW)
                # Centered symmetric form: invariant to roll direction and
                # needs only half+1 multiplies.  Valid band-local lanes are
                # [half, half + Wo); wrapped lanes only hit masked positions.
                acc = g[half] * t
                for k in range(1, half + 1):
                    pair = pltpu.roll(t, k, axis=2) + pltpu.roll(t, LW - k, axis=2)
                    acc = acc + g[half + k] * pair
                return acc
        else:
            def col_pass(t):                     # (Ho, Cs, W) -> (Ho, Cs, Wo)
                # Fallback for shapes that cannot be lane-packed; correctness
                # identical, relies on slice relayouts (known-good lowering).
                acc = None
                for w8, offs in taps:
                    s = t[:, :, offs[0]:offs[0] + Wo]
                    for o in offs[1:]:
                        s = s + t[:, :, o:o + Wo]
                    term = w8 * s
                    acc = term if acc is None else acc + term
                return acc

        def blur(f):
            return col_pass(row_pass(f))

        mu1 = blur(x1)
        mu2 = blur(x2)
        s11 = blur(x1 * x1)
        s22 = blur(x2 * x2)
        s12 = blur(x1 * x2)

        mu1_sq = mu1 * mu1
        mu2_sq = mu2 * mu2
        mu1_mu2 = mu1 * mu2
        sigma1_sq = s11 - mu1_sq
        sigma2_sq = s22 - mu2_sq
        sigma12 = s12 - mu1_mu2

        v1 = 2.0 * sigma12 + c2
        v2 = sigma1_sq + sigma2_sq + c2
        ssim_map = (2.0 * mu1_mu2 + c1) * v1 / ((mu1_sq + mu2_sq + c1) * v2)

        if use_roll:
            lane = jax.lax.broadcasted_iota(jnp.int32, ssim_map.shape, 2)
            # When Cl > 1, W divides 128 hence is a power of two.
            band = (lane & (W - 1)) if Cl > 1 else lane
            valid = jnp.logical_and(band >= half, band < half + Wo)
            ssim_map = jnp.where(valid, ssim_map, 0.0)

        # Per-plane partial sums only; the wrapper finishes the mean.
        # TODO(synk): chunked/pairwise summation for multi-megapixel planes.
        out_ref[0] = jnp.sum(ssim_map, axis=0)   # (Cs, out_lanes)

    return kernel


def ssim_pallas(img1, img2, window_size: int = 11, size_average: bool = True,
                val_range=None):
    """Matches SSIM(window_size, size_average, val_range).forward(img1, img2)."""
    N, C, H, W = img1.shape
    ws = min(window_size, H, W)          # matches `real_size` in the PyTorch code
    Ho, Wo = H - ws + 1, W - ws + 1
    P = N * C

    # Data-dependent dynamic range L -> C1, C2 (exact PyTorch semantics).
    if val_range is None:
        # TODO(synk): extra HBM read of img1 before the kernel; callers that
        # know their dynamic range should pass val_range instead.
        max_val = jnp.where(jnp.max(img1) > 128, 255.0, 1.0)
        min_val = jnp.where(jnp.min(img1) < -0.5, -1.0, 0.0)
        L = max_val - min_val
    else:
        L = jnp.float32(val_range)
    C1 = (0.01 * L) ** 2
    C2 = (0.03 * L) ** 2
    consts = jnp.stack([C1, C2]).astype(jnp.float32)      # (2,) -> SMEM

    cfg = _choose_layout(P, H, W, ws, np.dtype(img1.dtype).itemsize)
    Cl, Cs, G, LW = cfg["Cl"], cfg["Cs"], cfg["G"], cfg["LW"]
    use_roll, out_lanes = cfg["use_roll"], cfg["out_lanes"]

    # Wrapper-side layout plumbing: (N,C,H,W) -> (G, H, Cs, Cl*W) so the row
    # pass runs along the untiled H axis and the column pass along a packed
    # lane axis.  Plane p = (g*Cs + cs)*Cl + cl.
    def to_layout(x):
        x = x.reshape(G, Cs, Cl, H, W)
        x = jnp.transpose(x, (0, 3, 1, 2, 4))
        return x.reshape(G, H, Cs, Cl * W)

    a = to_layout(img1)
    b = to_layout(img2)

    kernel = _make_ssim_kernel(gaussian_1d(ws), H, W, ws, Cs, Cl, LW, use_roll)

    sums = pl.pallas_call(
        kernel,
        out_shape=jax.ShapeDtypeStruct((G, Cs, out_lanes), jnp.float32),
        grid=(G,),
        in_specs=[
            pl.BlockSpec(memory_space=pltpu.MemorySpace.SMEM),        # C1, C2
            pl.BlockSpec((1, H, Cs, LW), lambda i: (i, 0, 0, 0)),
            pl.BlockSpec((1, H, Cs, LW), lambda i: (i, 0, 0, 0)),
        ],
        out_specs=pl.BlockSpec((1, Cs, out_lanes), lambda i: (i, 0, 0)),
        compiler_params=pltpu.CompilerParams(
            dimension_semantics=("parallel",),
            vmem_limit_bytes=cfg["vmem_limit"]),
    )(consts, a, b)

    plane_sums = sums.reshape(G, Cs, Cl, -1).sum(axis=-1).reshape(P)
    plane_means = plane_sums / float(Ho * Wo)
    if size_average:
        return jnp.mean(plane_means)
    # Mean over (C, Ho, Wo) per batch element; exact because every plane has
    # the same Ho*Wo valid-output count.
    return jnp.mean(plane_means.reshape(N, C), axis=1)


# ------------------------- pure-JAX reference -------------------------
def ssim_reference(img1, img2, window_size: int = 11):
    N, C, H, W = img1.shape
    g = gaussian_1d(window_size)
    win2d = np.outer(g, g).astype(np.float32)
    window = jnp.asarray(
        np.broadcast_to(win2d, (C, 1, window_size, window_size)).copy())

    def conv(x):
        return jax.lax.conv_general_dilated(
            x, window, window_strides=(1, 1), padding="VALID",
            feature_group_count=C,
            dimension_numbers=("NCHW", "OIHW", "NCHW"))

    max_val = jnp.where(jnp.max(img1) > 128, 255.0, 1.0)
    min_val = jnp.where(jnp.min(img1) < -0.5, -1.0, 0.0)
    L = max_val - min_val
    C1 = (0.01 * L) ** 2
    C2 = (0.03 * L) ** 2

    mu1, mu2 = conv(img1), conv(img2)
    mu1_sq, mu2_sq, mu1_mu2 = mu1 ** 2, mu2 ** 2, mu1 * mu2
    sigma1_sq = conv(img1 * img1) - mu1_sq
    sigma2_sq = conv(img2 * img2) - mu2_sq
    sigma12 = conv(img1 * img2) - mu1_mu2
    v1 = 2.0 * sigma12 + C2
    v2 = sigma1_sq + sigma2_sq + C2
    ssim_map = (2 * mu1_mu2 + C1) * v1 / ((mu1_sq + mu2_sq + C1) * v2)
    return jnp.mean(ssim_map)


if __name__ == "__main__":
    key = jax.random.PRNGKey(0)
    k1, k2 = jax.random.split(key)
    # Small shapes consistent with the module: batch=2, channels=4, 16x16 spatial.
    img1 = jax.random.uniform(k1, (2, 4, 16, 16), dtype=jnp.float32)
    img2 = jax.random.uniform(k2, (2, 4, 16, 16), dtype=jnp.float32)

    out = jax.jit(ssim_pallas)(img1, img2)
    out = jax.block_until_ready(out)

    ref = ssim_reference(img1, img2)
    assert out.shape == () and out.dtype == jnp.float32
    assert jnp.allclose(out, ref, atol=1e-5, rtol=1e-5), (out, ref)
    print("KERNEL_OK")
</pallas_src>

<mosaic_0001>
module attributes {stable_mosaic.version = 11 : i64} {
  func.func @kernel(%arg0: i32, %arg1: memref<2xf32, #tpu.memory_space<smem>>, %arg2: memref<1x16x1x128xf32, #tpu.memory_space<vmem>>, %arg3: memref<1x16x1x128xf32, #tpu.memory_space<vmem>>, %arg4: memref<1x1x128xf32, #tpu.memory_space<vmem>>) attributes {dimension_semantics = [#tpu.dimension_semantics<parallel>], iteration_bounds = array<i64: 1>, scalar_prefetch = 0 : i64, scratch_operands = 0 : i64, tpu.core_type = #tpu.core_type<tc>, window_params = [{transform_indices = @transform_0, window_bounds = array<i64: 2>}, {transform_indices = @transform_1, window_bounds = array<i64: 1, 16, 1, 128>}, {transform_indices = @transform_2, window_bounds = array<i64: 1, 16, 1, 128>}, {transform_indices = @transform_3, window_bounds = array<i64: 1, 1, 128>}]} {
    %c0 = arith.constant 0 : index
    %0 = memref.load %arg1[%c0] : memref<2xf32, #tpu.memory_space<smem>>
    %c1 = arith.constant 1 : index
    %1 = memref.load %arg1[%c1] : memref<2xf32, #tpu.memory_space<smem>>
    %c0_0 = arith.constant 0 : index
    %c0_1 = arith.constant 0 : index
    %c0_2 = arith.constant 0 : index
    %c0_3 = arith.constant 0 : index
    %2 = vector.load %arg2[%c0_0, %c0_1, %c0_2, %c0_3] : memref<1x16x1x128xf32, #tpu.memory_space<vmem>>, vector<1x16x1x128xf32>
    %3 = vector.shape_cast %2 : vector<1x16x1x128xf32> to vector<16x1x128xf32>
    %c0_4 = arith.constant 0 : index
    %c0_5 = arith.constant 0 : index
    %c0_6 = arith.constant 0 : index
    %c0_7 = arith.constant 0 : index
    %4 = vector.load %arg3[%c0_4, %c0_5, %c0_6, %c0_7] : memref<1x16x1x128xf32, #tpu.memory_space<vmem>>, vector<1x16x1x128xf32>
    %5 = vector.shape_cast %4 : vector<1x16x1x128xf32> to vector<16x1x128xf32>
    %6 = vector.extract_strided_slice %3 {offsets = [0, 0, 0], sizes = [6, 1, 128], strides = [1, 1, 1]} : vector<16x1x128xf32> to vector<6x1x128xf32>
    %7 = vector.extract_strided_slice %3 {offsets = [10, 0, 0], sizes = [6, 1, 128], strides = [1, 1, 1]} : vector<16x1x128xf32> to vector<6x1x128xf32>
    %8 = arith.addf %6, %7 : vector<6x1x128xf32>
    %cst = arith.constant 0.00102838012 : f32
    %9 = vector.broadcast %cst : f32 to vector<6x1x128xf32>
    %10 = arith.mulf %9, %8 : vector<6x1x128xf32>
    %11 = vector.extract_strided_slice %3 {offsets = [1, 0, 0], sizes = [6, 1, 128], strides = [1, 1, 1]} : vector<16x1x128xf32> to vector<6x1x128xf32>
    %12 = vector.extract_strided_slice %3 {offsets = [9, 0, 0], sizes = [6, 1, 128], strides = [1, 1, 1]} : vector<16x1x128xf32> to vector<6x1x128xf32>
    %13 = arith.addf %11, %12 : vector<6x1x128xf32>
    %cst_8 = arith.constant 0.00759875821 : f32
    %14 = vector.broadcast %cst_8 : f32 to vector<6x1x128xf32>
    %15 = arith.mulf %14, %13 : vector<6x1x128xf32>
    %16 = arith.addf %10, %15 : vector<6x1x128xf32>
    %17 = vector.extract_strided_slice %3 {offsets = [2, 0, 0], sizes = [6, 1, 128], strides = [1, 1, 1]} : vector<16x1x128xf32> to vector<6x1x128xf32>
    %18 = vector.extract_strided_slice %3 {offsets = [8, 0, 0], sizes = [6, 1, 128], strides = [1, 1, 1]} : vector<16x1x128xf32> to vector<6x1x128xf32>
    %19 = arith.addf %17, %18 : vector<6x1x128xf32>
    %cst_9 = arith.constant 0.0360007733 : f32
    %20 = vector.broadcast %cst_9 : f32 to vector<6x1x128xf32>
    %21 = arith.mulf %20, %19 : vector<6x1x128xf32>
    %22 = arith.addf %16, %21 : vector<6x1x128xf32>
    %23 = vector.extract_strided_slice %3 {offsets = [3, 0, 0], sizes = [6, 1, 128], strides = [1, 1, 1]} : vector<16x1x128xf32> to vector<6x1x128xf32>
    %24 = vector.extract_strided_slice %3 {offsets = [7, 0, 0], sizes = [6, 1, 128], strides = [1, 1, 1]} : vector<16x1x128xf32> to vector<6x1x128xf32>
    %25 = arith.addf %23, %24 : vector<6x1x128xf32>
    %cst_10 = arith.constant 0.109360687 : f32
    %26 = vector.broadcast %cst_10 : f32 to vector<6x1x128xf32>
    %27 = arith.mulf %26, %25 : vector<6x1x128xf32>
    %28 = arith.addf %22, %27 : vector<6x1x128xf32>
    %29 = vector.extract_strided_slice %3 {offsets = [4, 0, 0], sizes = [6, 1, 128], strides = [1, 1, 1]} : vector<16x1x128xf32> to vector<6x1x128xf32>
    %30 = vector.extract_strided_slice %3 {offsets = [6, 0, 0], sizes = [6, 1, 128], strides = [1, 1, 1]} : vector<16x1x128xf32> to vector<6x1x128xf32>
    %31 = arith.addf %29, %30 : vector<6x1x128xf32>
    %cst_11 = arith.constant 0.213005543 : f32
    %32 = vector.broadcast %cst_11 : f32 to vector<6x1x128xf32>
    %33 = arith.mulf %32, %31 : vector<6x1x128xf32>
    %34 = arith.addf %28, %33 : vector<6x1x128xf32>
    %35 = vector.extract_strided_slice %3 {offsets = [5, 0, 0], sizes = [6, 1, 128], strides = [1, 1, 1]} : vector<16x1x128xf32> to vector<6x1x128xf32>
    %cst_12 = arith.constant 0.266011715 : f32
    %36 = vector.broadcast %cst_12 : f32 to vector<6x1x128xf32>
    %37 = arith.mulf %36, %35 : vector<6x1x128xf32>
    %38 = arith.addf %34, %37 : vector<6x1x128xf32>
    %cst_13 = arith.constant 0.266011715 : f32
    %39 = vector.broadcast %cst_13 : f32 to vector<6x1x128xf32>
    %40 = arith.mulf %39, %38 : vector<6x1x128xf32>
    %c1_i32 = arith.constant 1 : i32
    %41 = tpu.dynamic_rotate %38 by %c1_i32 dim 2 : vector<6x1x128xf32>, i32 -> vector<6x1x128xf32>
    %c127_i32 = arith.constant 127 : i32
    %42 = tpu.dynamic_rotate %38 by %c127_i32 dim 2 : vector<6x1x128xf32>, i32 -> vector<6x1x128xf32>
    %43 = arith.addf %41, %42 : vector<6x1x128xf32>
    %cst_14 = arith.constant 0.213005543 : f32
    %44 = vector.broadcast %cst_14 : f32 to vector<6x1x128xf32>
    %45 = arith.mulf %44, %43 : vector<6x1x128xf32>
    %46 = arith.addf %40, %45 : vector<6x1x128xf32>
    %c2_i32 = arith.constant 2 : i32
    %47 = tpu.dynamic_rotate %38 by %c2_i32 dim 2 : vector<6x1x128xf32>, i32 -> vector<6x1x128xf32>
    %c126_i32 = arith.constant 126 : i32
    %48 = tpu.dynamic_rotate %38 by %c126_i32 dim 2 : vector<6x1x128xf32>, i32 -> vector<6x1x128xf32>
    %49 = arith.addf %47, %48 : vector<6x1x128xf32>
    %cst_15 = arith.constant 0.109360687 : f32
    %50 = vector.broadcast %cst_15 : f32 to vector<6x1x128xf32>
    %51 = arith.mulf %50, %49 : vector<6x1x128xf32>
    %52 = arith.addf %46, %51 : vector<6x1x128xf32>
    %c3_i32 = arith.constant 3 : i32
    %53 = tpu.dynamic_rotate %38 by %c3_i32 dim 2 : vector<6x1x128xf32>, i32 -> vector<6x1x128xf32>
    %c125_i32 = arith.constant 125 : i32
    %54 = tpu.dynamic_rotate %38 by %c125_i32 dim 2 : vector<6x1x128xf32>, i32 -> vector<6x1x128xf32>
    %55 = arith.addf %53, %54 : vector<6x1x128xf32>
    %cst_16 = arith.constant 0.0360007733 : f32
    %56 = vector.broadcast %cst_16 : f32 to vector<6x1x128xf32>
    %57 = arith.mulf %56, %55 : vector<6x1x128xf32>
    %58 = arith.addf %52, %57 : vector<6x1x128xf32>
    %c4_i32 = arith.constant 4 : i32
    %59 = tpu.dynamic_rotate %38 by %c4_i32 dim 2 : vector<6x1x128xf32>, i32 -> vector<6x1x128xf32>
    %c124_i32 = arith.constant 124 : i32
    %60 = tpu.dynamic_rotate %38 by %c124_i32 dim 2 : vector<6x1x128xf32>, i32 -> vector<6x1x128xf32>
    %61 = arith.addf %59, %60 : vector<6x1x128xf32>
    %cst_17 = arith.constant 0.00759875821 : f32
    %62 = vector.broadcast %cst_17 : f32 to vector<6x1x128xf32>
    %63 = arith.mulf %62, %61 : vector<6x1x128xf32>
    %64 = arith.addf %58, %63 : vector<6x1x128xf32>
    %c5_i32 = arith.constant 5 : i32
    %65 = tpu.dynamic_rotate %38 by %c5_i32 dim 2 : vector<6x1x128xf32>, i32 -> vector<6x1x128xf32>
    %c123_i32 = arith.constant 123 : i32
    %66 = tpu.dynamic_rotate %38 by %c123_i32 dim 2 : vector<6x1x128xf32>, i32 -> vector<6x1x128xf32>
    %67 = arith.addf %65, %66 : vector<6x1x128xf32>
    %cst_18 = arith.constant 0.00102838012 : f32
    %68 = vector.broadcast %cst_18 : f32 to vector<6x1x128xf32>
    %69 = arith.mulf %68, %67 : vector<6x1x128xf32>
    %70 = arith.addf %64, %69 : vector<6x1x128xf32>
    %71 = vector.extract_strided_slice %5 {offsets = [0, 0, 0], sizes = [6, 1, 128], strides = [1, 1, 1]} : vector<16x1x128xf32> to vector<6x1x128xf32>
    %72 = vector.extract_strided_slice %5 {offsets = [10, 0, 0], sizes = [6, 1, 128], strides = [1, 1, 1]} : vector<16x1x128xf32> to vector<6x1x128xf32>
    %73 = arith.addf %71, %72 : vector<6x1x128xf32>
    %cst_19 = arith.constant 0.00102838012 : f32
    %74 = vector.broadcast %cst_19 : f32 to vector<6x1x128xf32>
    %75 = arith.mulf %74, %73 : vector<6x1x128xf32>
    %76 = vector.extract_strided_slice %5 {offsets = [1, 0, 0], sizes = [6, 1, 128], strides = [1, 1, 1]} : vector<16x1x128xf32> to vector<6x1x128xf32>
    %77 = vector.extract_strided_slice %5 {offsets = [9, 0, 0], sizes = [6, 1, 128], strides = [1, 1, 1]} : vector<16x1x128xf32> to vector<6x1x128xf32>
    %78 = arith.addf %76, %77 : vector<6x1x128xf32>
    %cst_20 = arith.constant 0.00759875821 : f32
    %79 = vector.broadcast %cst_20 : f32 to vector<6x1x128xf32>
    %80 = arith.mulf %79, %78 : vector<6x1x128xf32>
    %81 = arith.addf %75, %80 : vector<6x1x128xf32>
    %82 = vector.extract_strided_slice %5 {offsets = [2, 0, 0], sizes = [6, 1, 128], strides = [1, 1, 1]} : vector<16x1x128xf32> to vector<6x1x128xf32>
    %83 = vector.extract_strided_slice %5 {offsets = [8, 0, 0], sizes = [6, 1, 128], strides = [1, 1, 1]} : vector<16x1x128xf32> to vector<6x1x128xf32>
    %84 = arith.addf %82, %83 : vector<6x1x128xf32>
    %cst_21 = arith.constant 0.0360007733 : f32
    %85 = vector.broadcast %cst_21 : f32 to vector<6x1x128xf32>
    %86 = arith.mulf %85, %84 : vector<6x1x128xf32>
    %87 = arith.addf %81, %86 : vector<6x1x128xf32>
    %88 = vector.extract_strided_slice %5 {offsets = [3, 0, 0], sizes = [6, 1, 128], strides = [1, 1, 1]} : vector<16x1x128xf32> to vector<6x1x128xf32>
    %89 = vector.extract_strided_slice %5 {offsets = [7, 0, 0], sizes = [6, 1, 128], strides = [1, 1, 1]} : vector<16x1x128xf32> to vector<6x1x128xf32>
    %90 = arith.addf %88, %89 : vector<6x1x128xf32>
    %cst_22 = arith.constant 0.109360687 : f32
    %91 = vector.broadcast %cst_22 : f32 to vector<6x1x128xf32>
    %92 = arith.mulf %91, %90 : vector<6x1x128xf32>
    %93 = arith.addf %87, %92 : vector<6x1x128xf32>
    %94 = vector.extract_strided_slice %5 {offsets = [4, 0, 0], sizes = [6, 1, 128], strides = [1, 1, 1]} : vector<16x1x128xf32> to vector<6x1x128xf32>
    %95 = vector.extract_strided_slice %5 {offsets = [6, 0, 0], sizes = [6, 1, 128], strides = [1, 1, 1]} : vector<16x1x128xf32> to vector<6x1x128xf32>
    %96 = arith.addf %94, %95 : vector<6x1x128xf32>
    %cst_23 = arith.constant 0.213005543 : f32
    %97 = vector.broadcast %cst_23 : f32 to vector<6x1x128xf32>
    %98 = arith.mulf %97, %96 : vector<6x1x128xf32>
    %99 = arith.addf %93, %98 : vector<6x1x128xf32>
    %100 = vector.extract_strided_slice %5 {offsets = [5, 0, 0], sizes = [6, 1, 128], strides = [1, 1, 1]} : vector<16x1x128xf32> to vector<6x1x128xf32>
    %cst_24 = arith.constant 0.266011715 : f32
    %101 = vector.broadcast %cst_24 : f32 to vector<6x1x128xf32>
    %102 = arith.mulf %101, %100 : vector<6x1x128xf32>
    %103 = arith.addf %99, %102 : vector<6x1x128xf32>
    %cst_25 = arith.constant 0.266011715 : f32
    %104 = vector.broadcast %cst_25 : f32 to vector<6x1x128xf32>
    %105 = arith.mulf %104, %103 : vector<6x1x128xf32>
    %c1_i32_26 = arith.constant 1 : i32
    %106 = tpu.dynamic_rotate %103 by %c1_i32_26 dim 2 : vector<6x1x128xf32>, i32 -> vector<6x1x128xf32>
    %c127_i32_27 = arith.constant 127 : i32
    %107 = tpu.dynamic_rotate %103 by %c127_i32_27 dim 2 : vector<6x1x128xf32>, i32 -> vector<6x1x128xf32>
    %108 = arith.addf %106, %107 : vector<6x1x128xf32>
    %cst_28 = arith.constant 0.213005543 : f32
    %109 = vector.broadcast %cst_28 : f32 to vector<6x1x128xf32>
    %110 = arith.mulf %109, %108 : vector<6x1x128xf32>
    %111 = arith.addf %105, %110 : vector<6x1x128xf32>
    %c2_i32_29 = arith.constant 2 : i32
    %112 = tpu.dynamic_rotate %103 by %c2_i32_29 dim 2 : vector<6x1x128xf32>, i32 -> vector<6x1x128xf32>
    %c126_i32_30 = arith.constant 126 : i32
    %113 = tpu.dynamic_rotate %103 by %c126_i32_30 dim 2 : vector<6x1x128xf32>, i32 -> vector<6x1x128xf32>
    %114 = arith.addf %112, %113 : vector<6x1x128xf32>
    %cst_31 = arith.constant 0.109360687 : f32
    %115 = vector.broadcast %cst_31 : f32 to vector<6x1x128xf32>
    %116 = arith.mulf %115, %114 : vector<6x1x128xf32>
    %117 = arith.addf %111, %116 : vector<6x1x128xf32>
    %c3_i32_32 = arith.constant 3 : i32
    %118 = tpu.dynamic_rotate %103 by %c3_i32_32 dim 2 : vector<6x1x128xf32>, i32 -> vector<6x1x128xf32>
    %c125_i32_33 = arith.constant 125 : i32
    %119 = tpu.dynamic_rotate %103 by %c125_i32_33 dim 2 : vector<6x1x128xf32>, i32 -> vector<6x1x128xf32>
    %120 = arith.addf %118, %119 : vector<6x1x128xf32>
    %cst_34 = arith.constant 0.0360007733 : f32
    %121 = vector.broadcast %cst_34 : f32 to vector<6x1x128xf32>
    %122 = arith.mulf %121, %120 : vector<6x1x128xf32>
    %123 = arith.addf %117, %122 : vector<6x1x128xf32>
    %c4_i32_35 = arith.constant 4 : i32
    %124 = tpu.dynamic_rotate %103 by %c4_i32_35 dim 2 : vector<6x1x128xf32>, i32 -> vector<6x1x128xf32>
    %c124_i32_36 = arith.constant 124 : i32
    %125 = tpu.dynamic_rotate %103 by %c124_i32_36 dim 2 : vector<6x1x128xf32>, i32 -> vector<6x1x128xf32>
    %126 = arith.addf %124, %125 : vector<6x1x128xf32>
    %cst_37 = arith.constant 0.00759875821 : f32
    %127 = vector.broadcast %cst_37 : f32 to vector<6x1x128xf32>
    %128 = arith.mulf %127, %126 : vector<6x1x128xf32>
    %129 = arith.addf %123, %128 : vector<6x1x128xf32>
    %c5_i32_38 = arith.constant 5 : i32
    %130 = tpu.dynamic_rotate %103 by %c5_i32_38 dim 2 : vector<6x1x128xf32>, i32 -> vector<6x1x128xf32>
    %c123_i32_39 = arith.constant 123 : i32
    %131 = tpu.dynamic_rotate %103 by %c123_i32_39 dim 2 : vector<6x1x128xf32>, i32 -> vector<6x1x128xf32>
    %132 = arith.addf %130, %131 : vector<6x1x128xf32>
    %cst_40 = arith.constant 0.00102838012 : f32
    %133 = vector.broadcast %cst_40 : f32 to vector<6x1x128xf32>
    %134 = arith.mulf %133, %132 : vector<6x1x128xf32>
    %135 = arith.addf %129, %134 : vector<6x1x128xf32>
    %136 = arith.mulf %3, %3 : vector<16x1x128xf32>
    %137 = vector.extract_strided_slice %136 {offsets = [0, 0, 0], sizes = [6, 1, 128], strides = [1, 1, 1]} : vector<16x1x128xf32> to vector<6x1x128xf32>
    %138 = vector.extract_strided_slice %136 {offsets = [10, 0, 0], sizes = [6, 1, 128], strides = [1, 1, 1]} : vector<16x1x128xf32> to vector<6x1x128xf32>
    %139 = arith.addf %137, %138 : vector<6x1x128xf32>
    %cst_41 = arith.constant 0.00102838012 : f32
    %140 = vector.broadcast %cst_41 : f32 to vector<6x1x128xf32>
    %141 = arith.mulf %140, %139 : vector<6x1x128xf32>
    %142 = vector.extract_strided_slice %136 {offsets = [1, 0, 0], sizes = [6, 1, 128], strides = [1, 1, 1]} : vector<16x1x128xf32> to vector<6x1x128xf32>
    %143 = vector.extract_strided_slice %136 {offsets = [9, 0, 0], sizes = [6, 1, 128], strides = [1, 1, 1]} : vector<16x1x128xf32> to vector<6x1x128xf32>
    %144 = arith.addf %142, %143 : vector<6x1x128xf32>
    %cst_42 = arith.constant 0.00759875821 : f32
    %145 = vector.broadcast %cst_42 : f32 to vector<6x1x128xf32>
    %146 = arith.mulf %145, %144 : vector<6x1x128xf32>
    %147 = arith.addf %141, %146 : vector<6x1x128xf32>
    %148 = vector.extract_strided_slice %136 {offsets = [2, 0, 0], sizes = [6, 1, 128], strides = [1, 1, 1]} : vector<16x1x128xf32> to vector<6x1x128xf32>
    %149 = vector.extract_strided_slice %136 {offsets = [8, 0, 0], sizes = [6, 1, 128], strides = [1, 1, 1]} : vector<16x1x128xf32> to vector<6x1x128xf32>
    %150 = arith.addf %148, %149 : vector<6x1x128xf32>
    %cst_43 = arith.constant 0.0360007733 : f32
    %151 = vector.broadcast %cst_43 : f32 to vector<6x1x128xf32>
    %152 = arith.mulf %151, %150 : vector<6x1x128xf32>
    %153 = arith.addf %147, %152 : vector<6x1x128xf32>
    %154 = vector.extract_strided_slice %136 {offsets = [3, 0, 0], sizes = [6, 1, 128], strides = [1, 1, 1]} : vector<16x1x128xf32> to vector<6x1x128xf32>
    %155 = vector.extract_strided_slice %136 {offsets = [7, 0, 0], sizes = [6, 1, 128], strides = [1, 1, 1]} : vector<16x1x128xf32> to vector<6x1x128xf32>
    %156 = arith.addf %154, %155 : vector<6x1x128xf32>
    %cst_44 = arith.constant 0.109360687 : f32
    %157 = vector.broadcast %cst_44 : f32 to vector<6x1x128xf32>
    %158 = arith.mulf %157, %156 : vector<6x1x128xf32>
    %159 = arith.addf %153, %158 : vector<6x1x128xf32>
    %160 = vector.extract_strided_slice %136 {offsets = [4, 0, 0], sizes = [6, 1, 128], strides = [1, 1, 1]} : vector<16x1x128xf32> to vector<6x1x128xf32>
    %161 = vector.extract_strided_slice %136 {offsets = [6, 0, 0], sizes = [6, 1, 128], strides = [1, 1, 1]} : vector<16x1x128xf32> to vector<6x1x128xf32>
    %162 = arith.addf %160, %161 : vector<6x1x128xf32>
    %cst_45 = arith.constant 0.213005543 : f32
    %163 = vector.broadcast %cst_45 : f32 to vector<6x1x128xf32>
    %164 = arith.mulf %163, %162 : vector<6x1x128xf32>
    %165 = arith.addf %159, %164 : vector<6x1x128xf32>
    %166 = vector.extract_strided_slice %136 {offsets = [5, 0, 0], sizes = [6, 1, 128], strides = [1, 1, 1]} : vector<16x1x128xf32> to vector<6x1x128xf32>
    %cst_46 = arith.constant 0.266011715 : f32
    %167 = vector.broadcast %cst_46 : f32 to vector<6x1x128xf32>
    %168 = arith.mulf %167, %166 : vector<6x1x128xf32>
    %169 = arith.addf %165, %168 : vector<6x1x128xf32>
    %cst_47 = arith.constant 0.266011715 : f32
    %170 = vector.broadcast %cst_47 : f32 to vector<6x1x128xf32>
    %171 = arith.mulf %170, %169 : vector<6x1x128xf32>
    %c1_i32_48 = arith.constant 1 : i32
    %172 = tpu.dynamic_rotate %169 by %c1_i32_48 dim 2 : vector<6x1x128xf32>, i32 -> vector<6x1x128xf32>
    %c127_i32_49 = arith.constant 127 : i32
    %173 = tpu.dynamic_rotate %169 by %c127_i32_49 dim 2 : vector<6x1x128xf32>, i32 -> vector<6x1x128xf32>
    %174 = arith.addf %172, %173 : vector<6x1x128xf32>
    %cst_50 = arith.constant 0.213005543 : f32
    %175 = vector.broadcast %cst_50 : f32 to vector<6x1x128xf32>
    %176 = arith.mulf %175, %174 : vector<6x1x128xf32>
    %177 = arith.addf %171, %176 : vector<6x1x128xf32>
    %c2_i32_51 = arith.constant 2 : i32
    %178 = tpu.dynamic_rotate %169 by %c2_i32_51 dim 2 : vector<6x1x128xf32>, i32 -> vector<6x1x128xf32>
    %c126_i32_52 = arith.constant 126 : i32
    %179 = tpu.dynamic_rotate %169 by %c126_i32_52 dim 2 : vector<6x1x128xf32>, i32 -> vector<6x1x128xf32>
    %180 = arith.addf %178, %179 : vector<6x1x128xf32>
    %cst_53 = arith.constant 0.109360687 : f32
    %181 = vector.broadcast %cst_53 : f32 to vector<6x1x128xf32>
    %182 = arith.mulf %181, %180 : vector<6x1x128xf32>
    %183 = arith.addf %177, %182 : vector<6x1x128xf32>
    %c3_i32_54 = arith.constant 3 : i32
    %184 = tpu.dynamic_rotate %169 by %c3_i32_54 dim 2 : vector<6x1x128xf32>, i32 -> vector<6x1x128xf32>
    %c125_i32_55 = arith.constant 125 : i32
    %185 = tpu.dynamic_rotate %169 by %c125_i32_55 dim 2 : vector<6x1x128xf32>, i32 -> vector<6x1x128xf32>
    %186 = arith.addf %184, %185 : vector<6x1x128xf32>
    %cst_56 = arith.constant 0.0360007733 : f32
    %187 = vector.broadcast %cst_56 : f32 to vector<6x1x128xf32>
    %188 = arith.mulf %187, %186 : vector<6x1x128xf32>
    %189 = arith.addf %183, %188 : vector<6x1x128xf32>
    %c4_i32_57 = arith.constant 4 : i32
    %190 = tpu.dynamic_rotate %169 by %c4_i32_57 dim 2 : vector<6x1x128xf32>, i32 -> vector<6x1x128xf32>
    %c124_i32_58 = arith.constant 124 : i32
    %191 = tpu.dynamic_rotate %169 by %c124_i32_58 dim 2 : vector<6x1x128xf32>, i32 -> vector<6x1x128xf32>
    %192 = arith.addf %190, %191 : vector<6x1x128xf32>
    %cst_59 = arith.constant 0.00759875821 : f32
    %193 = vector.broadcast %cst_59 : f32 to vector<6x1x128xf32>
    %194 = arith.mulf %193, %192 : vector<6x1x128xf32>
    %195 = arith.addf %189, %194 : vector<6x1x128xf32>
    %c5_i32_60 = arith.constant 5 : i32
    %196 = tpu.dynamic_rotate %169 by %c5_i32_60 dim 2 : vector<6x1x128xf32>, i32 -> vector<6x1x128xf32>
    %c123_i32_61 = arith.constant 123 : i32
    %197 = tpu.dynamic_rotate %169 by %c123_i32_61 dim 2 : vector<6x1x128xf32>, i32 -> vector<6x1x128xf32>
    %198 = arith.addf %196, %197 : vector<6x1x128xf32>
    %cst_62 = arith.constant 0.00102838012 : f32
    %199 = vector.broadcast %cst_62 : f32 to vector<6x1x128xf32>
    %200 = arith.mulf %199, %198 : vector<6x1x128xf32>
    %201 = arith.addf %195, %200 : vector<6x1x128xf32>
    %202 = arith.mulf %5, %5 : vector<16x1x128xf32>
    %203 = vector.extract_strided_slice %202 {offsets = [0, 0, 0], sizes = [6, 1, 128], strides = [1, 1, 1]} : vector<16x1x128xf32> to vector<6x1x128xf32>
    %204 = vector.extract_strided_slice %202 {offsets = [10, 0, 0], sizes = [6, 1, 128], strides = [1, 1, 1]} : vector<16x1x128xf32> to vector<6x1x128xf32>
    %205 = arith.addf %203, %204 : vector<6x1x128xf32>
    %cst_63 = arith.constant 0.00102838012 : f32
    %206 = vector.broadcast %cst_63 : f32 to vector<6x1x128xf32>
    %207 = arith.mulf %206, %205 : vector<6x1x128xf32>
    %208 = vector.extract_strided_slice %202 {offsets = [1, 0, 0], sizes = [6, 1, 128], strides = [1, 1, 1]} : vector<16x1x128xf32> to vector<6x1x128xf32>
    %209 = vector.extract_strided_slice %202 {offsets = [9, 0, 0], sizes = [6, 1, 128], strides = [1, 1, 1]} : vector<16x1x128xf32> to vector<6x1x128xf32>
    %210 = arith.addf %208, %209 : vector<6x1x128xf32>
    %cst_64 = arith.constant 0.00759875821 : f32
    %211 = vector.broadcast %cst_64 : f32 to vector<6x1x128xf32>
    %212 = arith.mulf %211, %210 : vector<6x1x128xf32>
    %213 = arith.addf %207, %212 : vector<6x1x128xf32>
    %214 = vector.extract_strided_slice %202 {offsets = [2, 0, 0], sizes = [6, 1, 128], strides = [1, 1, 1]} : vector<16x1x128xf32> to vector<6x1x128xf32>
    %215 = vector.extract_strided_slice %202 {offsets = [8, 0, 0], sizes = [6, 1, 128], strides = [1, 1, 1]} : vector<16x1x128xf32> to vector<6x1x128xf32>
    %216 = arith.addf %214, %215 : vector<6x1x128xf32>
    %cst_65 = arith.constant 0.0360007733 : f32
    %217 = vector.broadcast %cst_65 : f32 to vector<6x1x128xf32>
    %218 = arith.mulf %217, %216 : vector<6x1x128xf32>
    %219 = arith.addf %213, %218 : vector<6x1x128xf32>
    %220 = vector.extract_strided_slice %202 {offsets = [3, 0, 0], sizes = [6, 1, 128], strides = [1, 1, 1]} : vector<16x1x128xf32> to vector<6x1x128xf32>
    %221 = vector.extract_strided_slice %202 {offsets = [7, 0, 0], sizes = [6, 1, 128], strides = [1, 1, 1]} : vector<16x1x128xf32> to vector<6x1x128xf32>
    %222 = arith.addf %220, %221 : vector<6x1x128xf32>
    %cst_66 = arith.constant 0.109360687 : f32
    %223 = vector.broadcast %cst_66 : f32 to vector<6x1x128xf32>
    %224 = arith.mulf %223, %222 : vector<6x1x128xf32>
    %225 = arith.addf %219, %224 : vector<6x1x128xf32>
    %226 = vector.extract_strided_slice %202 {offsets = [4, 0, 0], sizes = [6, 1, 128], strides = [1, 1, 1]} : vector<16x1x128xf32> to vector<6x1x128xf32>
    %227 = vector.extract_strided_slice %202 {offsets = [6, 0, 0], sizes = [6, 1, 128], strides = [1, 1, 1]} : vector<16x1x128xf32> to vector<6x1x128xf32>
    %228 = arith.addf %226, %227 : vector<6x1x128xf32>
    %cst_67 = arith.constant 0.213005543 : f32
    %229 = vector.broadcast %cst_67 : f32 to vector<6x1x128xf32>
    %230 = arith.mulf %229, %228 : vector<6x1x128xf32>
    %231 = arith.addf %225, %230 : vector<6x1x128xf32>
    %232 = vector.extract_strided_slice %202 {offsets = [5, 0, 0], sizes = [6, 1, 128], strides = [1, 1, 1]} : vector<16x1x128xf32> to vector<6x1x128xf32>
    %cst_68 = arith.constant 0.266011715 : f32
    %233 = vector.broadcast %cst_68 : f32 to vector<6x1x128xf32>
    %234 = arith.mulf %233, %232 : vector<6x1x128xf32>
    %235 = arith.addf %231, %234 : vector<6x1x128xf32>
    %cst_69 = arith.constant 0.266011715 : f32
    %236 = vector.broadcast %cst_69 : f32 to vector<6x1x128xf32>
    %237 = arith.mulf %236, %235 : vector<6x1x128xf32>
    %c1_i32_70 = arith.constant 1 : i32
    %238 = tpu.dynamic_rotate %235 by %c1_i32_70 dim 2 : vector<6x1x128xf32>, i32 -> vector<6x1x128xf32>
    %c127_i32_71 = arith.constant 127 : i32
    %239 = tpu.dynamic_rotate %235 by %c127_i32_71 dim 2 : vector<6x1x128xf32>, i32 -> vector<6x1x128xf32>
    %240 = arith.addf %238, %239 : vector<6x1x128xf32>
    %cst_72 = arith.constant 0.213005543 : f32
    %241 = vector.broadcast %cst_72 : f32 to vector<6x1x128xf32>
    %242 = arith.mulf %241, %240 : vector<6x1x128xf32>
    %243 = arith.addf %237, %242 : vector<6x1x128xf32>
    %c2_i32_73 = arith.constant 2 : i32
    %244 = tpu.dynamic_rotate %235 by %c2_i32_73 dim 2 : vector<6x1x128xf32>, i32 -> vector<6x1x128xf32>
    %c126_i32_74 = arith.constant 126 : i32
    %245 = tpu.dynamic_rotate %235 by %c126_i32_74 dim 2 : vector<6x1x128xf32>, i32 -> vector<6x1x128xf32>
    %246 = arith.addf %244, %245 : vector<6x1x128xf32>
    %cst_75 = arith.constant 0.109360687 : f32
    %247 = vector.broadcast %cst_75 : f32 to vector<6x1x128xf32>
    %248 = arith.mulf %247, %246 : vector<6x1x128xf32>
    %249 = arith.addf %243, %248 : vector<6x1x128xf32>
    %c3_i32_76 = arith.constant 3 : i32
    %250 = tpu.dynamic_rotate %235 by %c3_i32_76 dim 2 : vector<6x1x128xf32>, i32 -> vector<6x1x128xf32>
    %c125_i32_77 = arith.constant 125 : i32
    %251 = tpu.dynamic_rotate %235 by %c125_i32_77 dim 2 : vector<6x1x128xf32>, i32 -> vector<6x1x128xf32>
    %252 = arith.addf %250, %251 : vector<6x1x128xf32>
    %cst_78 = arith.constant 0.0360007733 : f32
    %253 = vector.broadcast %cst_78 : f32 to vector<6x1x128xf32>
    %254 = arith.mulf %253, %252 : vector<6x1x128xf32>
    %255 = arith.addf %249, %254 : vector<6x1x128xf32>
    %c4_i32_79 = arith.constant 4 : i32
    %256 = tpu.dynamic_rotate %235 by %c4_i32_79 dim 2 : vector<6x1x128xf32>, i32 -> vector<6x1x128xf32>
    %c124_i32_80 = arith.constant 124 : i32
    %257 = tpu.dynamic_rotate %235 by %c124_i32_80 dim 2 : vector<6x1x128xf32>, i32 -> vector<6x1x128xf32>
    %258 = arith.addf %256, %257 : vector<6x1x128xf32>
    %cst_81 = arith.constant 0.00759875821 : f32
    %259 = vector.broadcast %cst_81 : f32 to vector<6x1x128xf32>
    %260 = arith.mulf %259, %258 : vector<6x1x128xf32>
    %261 = arith.addf %255, %260 : vector<6x1x128xf32>
    %c5_i32_82 = arith.constant 5 : i32
    %262 = tpu.dynamic_rotate %235 by %c5_i32_82 dim 2 : vector<6x1x128xf32>, i32 -> vector<6x1x128xf32>
    %c123_i32_83 = arith.constant 123 : i32
    %263 = tpu.dynamic_rotate %235 by %c123_i32_83 dim 2 : vector<6x1x128xf32>, i32 -> vector<6x1x128xf32>
    %264 = arith.addf %262, %263 : vector<6x1x128xf32>
    %cst_84 = arith.constant 0.00102838012 : f32
    %265 = vector.broadcast %cst_84 : f32 to vector<6x1x128xf32>
    %266 = arith.mulf %265, %264 : vector<6x1x128xf32>
    %267 = arith.addf %261, %266 : vector<6x1x128xf32>
    %268 = arith.mulf %3, %5 : vector<16x1x128xf32>
    %269 = vector.extract_strided_slice %268 {offsets = [0, 0, 0], sizes = [6, 1, 128], strides = [1, 1, 1]} : vector<16x1x128xf32> to vector<6x1x128xf32>
    %270 = vector.extract_strided_slice %268 {offsets = [10, 0, 0], sizes = [6, 1, 128], strides = [1, 1, 1]} : vector<16x1x128xf32> to vector<6x1x128xf32>
    %271 = arith.addf %269, %270 : vector<6x1x128xf32>
    %cst_85 = arith.constant 0.00102838012 : f32
    %272 = vector.broadcast %cst_85 : f32 to vector<6x1x128xf32>
    %273 = arith.mulf %272, %271 : vector<6x1x128xf32>
    %274 = vector.extract_strided_slice %268 {offsets = [1, 0, 0], sizes = [6, 1, 128], strides = [1, 1, 1]} : vector<16x1x128xf32> to vector<6x1x128xf32>
    %275 = vector.extract_strided_slice %268 {offsets = [9, 0, 0], sizes = [6, 1, 128], strides = [1, 1, 1]} : vector<16x1x128xf32> to vector<6x1x128xf32>
    %276 = arith.addf %274, %275 : vector<6x1x128xf32>
    %cst_86 = arith.constant 0.00759875821 : f32
    %277 = vector.broadcast %cst_86 : f32 to vector<6x1x128xf32>
    %278 = arith.mulf %277, %276 : vector<6x1x128xf32>
    %279 = arith.addf %273, %278 : vector<6x1x128xf32>
    %280 = vector.extract_strided_slice %268 {offsets = [2, 0, 0], sizes = [6, 1, 128], strides = [1, 1, 1]} : vector<16x1x128xf32> to vector<6x1x128xf32>
    %281 = vector.extract_strided_slice %268 {offsets = [8, 0, 0], sizes = [6, 1, 128], strides = [1, 1, 1]} : vector<16x1x128xf32> to vector<6x1x128xf32>
    %282 = arith.addf %280, %281 : vector<6x1x128xf32>
    %cst_87 = arith.constant 0.0360007733 : f32
    %283 = vector.broadcast %cst_87 : f32 to vector<6x1x128xf32>
    %284 = arith.mulf %283, %282 : vector<6x1x128xf32>
    %285 = arith.addf %279, %284 : vector<6x1x128xf32>
    %286 = vector.extract_strided_slice %268 {offsets = [3, 0, 0], sizes = [6, 1, 128], strides = [1, 1, 1]} : vector<16x1x128xf32> to vector<6x1x128xf32>
    %287 = vector.extract_strided_slice %268 {offsets = [7, 0, 0], sizes = [6, 1, 128], strides = [1, 1, 1]} : vector<16x1x128xf32> to vector<6x1x128xf32>
    %288 = arith.addf %286, %287 : vector<6x1x128xf32>
    %cst_88 = arith.constant 0.109360687 : f32
    %289 = vector.broadcast %cst_88 : f32 to vector<6x1x128xf32>
    %290 = arith.mulf %289, %288 : vector<6x1x128xf32>
    %291 = arith.addf %285, %290 : vector<6x1x128xf32>
    %292 = vector.extract_strided_slice %268 {offsets = [4, 0, 0], sizes = [6, 1, 128], strides = [1, 1, 1]} : vector<16x1x128xf32> to vector<6x1x128xf32>
    %293 = vector.extract_strided_slice %268 {offsets = [6, 0, 0], sizes = [6, 1, 128], strides = [1, 1, 1]} : vector<16x1x128xf32> to vector<6x1x128xf32>
    %294 = arith.addf %292, %293 : vector<6x1x128xf32>
    %cst_89 = arith.constant 0.213005543 : f32
    %295 = vector.broadcast %cst_89 : f32 to vector<6x1x128xf32>
    %296 = arith.mulf %295, %294 : vector<6x1x128xf32>
    %297 = arith.addf %291, %296 : vector<6x1x128xf32>
    %298 = vector.extract_strided_slice %268 {offsets = [5, 0, 0], sizes = [6, 1, 128], strides = [1, 1, 1]} : vector<16x1x128xf32> to vector<6x1x128xf32>
    %cst_90 = arith.constant 0.266011715 : f32
    %299 = vector.broadcast %cst_90 : f32 to vector<6x1x128xf32>
    %300 = arith.mulf %299, %298 : vector<6x1x128xf32>
    %301 = arith.addf %297, %300 : vector<6x1x128xf32>
    %cst_91 = arith.constant 0.266011715 : f32
    %302 = vector.broadcast %cst_91 : f32 to vector<6x1x128xf32>
    %303 = arith.mulf %302, %301 : vector<6x1x128xf32>
    %c1_i32_92 = arith.constant 1 : i32
    %304 = tpu.dynamic_rotate %301 by %c1_i32_92 dim 2 : vector<6x1x128xf32>, i32 -> vector<6x1x128xf32>
    %c127_i32_93 = arith.constant 127 : i32
    %305 = tpu.dynamic_rotate %301 by %c127_i32_93 dim 2 : vector<6x1x128xf32>, i32 -> vector<6x1x128xf32>
    %306 = arith.addf %304, %305 : vector<6x1x128xf32>
    %cst_94 = arith.constant 0.213005543 : f32
    %307 = vector.broadcast %cst_94 : f32 to vector<6x1x128xf32>
    %308 = arith.mulf %307, %306 : vector<6x1x128xf32>
    %309 = arith.addf %303, %308 : vector<6x1x128xf32>
    %c2_i32_95 = arith.constant 2 : i32
    %310 = tpu.dynamic_rotate %301 by %c2_i32_95 dim 2 : vector<6x1x128xf32>, i32 -> vector<6x1x128xf32>
    %c126_i32_96 = arith.constant 126 : i32
    %311 = tpu.dynamic_rotate %301 by %c126_i32_96 dim 2 : vector<6x1x128xf32>, i32 -> vector<6x1x128xf32>
    %312 = arith.addf %310, %311 : vector<6x1x128xf32>
    %cst_97 = arith.constant 0.109360687 : f32
    %313 = vector.broadcast %cst_97 : f32 to vector<6x1x128xf32>
    %314 = arith.mulf %313, %312 : vector<6x1x128xf32>
    %315 = arith.addf %309, %314 : vector<6x1x128xf32>
    %c3_i32_98 = arith.constant 3 : i32
    %316 = tpu.dynamic_rotate %301 by %c3_i32_98 dim 2 : vector<6x1x128xf32>, i32 -> vector<6x1x128xf32>
    %c125_i32_99 = arith.constant 125 : i32
    %317 = tpu.dynamic_rotate %301 by %c125_i32_99 dim 2 : vector<6x1x128xf32>, i32 -> vector<6x1x128xf32>
    %318 = arith.addf %316, %317 : vector<6x1x128xf32>
    %cst_100 = arith.constant 0.0360007733 : f32
    %319 = vector.broadcast %cst_100 : f32 to vector<6x1x128xf32>
    %320 = arith.mulf %319, %318 : vector<6x1x128xf32>
    %321 = arith.addf %315, %320 : vector<6x1x128xf32>
    %c4_i32_101 = arith.constant 4 : i32
    %322 = tpu.dynamic_rotate %301 by %c4_i32_101 dim 2 : vector<6x1x128xf32>, i32 -> vector<6x1x128xf32>
    %c124_i32_102 = arith.constant 124 : i32
    %323 = tpu.dynamic_rotate %301 by %c124_i32_102 dim 2 : vector<6x1x128xf32>, i32 -> vector<6x1x128xf32>
    %324 = arith.addf %322, %323 : vector<6x1x128xf32>
    %cst_103 = arith.constant 0.00759875821 : f32
    %325 = vector.broadcast %cst_103 : f32 to vector<6x1x128xf32>
    %326 = arith.mulf %325, %324 : vector<6x1x128xf32>
    %327 = arith.addf %321, %326 : vector<6x1x128xf32>
    %c5_i32_104 = arith.constant 5 : i32
    %328 = tpu.dynamic_rotate %301 by %c5_i32_104 dim 2 : vector<6x1x128xf32>, i32 -> vector<6x1x128xf32>
    %c123_i32_105 = arith.constant 123 : i32
    %329 = tpu.dynamic_rotate %301 by %c123_i32_105 dim 2 : vector<6x1x128xf32>, i32 -> vector<6x1x128xf32>
    %330 = arith.addf %328, %329 : vector<6x1x128xf32>
    %cst_106 = arith.constant 0.00102838012 : f32
    %331 = vector.broadcast %cst_106 : f32 to vector<6x1x128xf32>
    %332 = arith.mulf %331, %330 : vector<6x1x128xf32>
    %333 = arith.addf %327, %332 : vector<6x1x128xf32>
    %334 = arith.mulf %70, %70 : vector<6x1x128xf32>
    %335 = arith.mulf %135, %135 : vector<6x1x128xf32>
    %336 = arith.mulf %70, %135 : vector<6x1x128xf32>
    %337 = arith.subf %201, %334 : vector<6x1x128xf32>
    %338 = arith.subf %267, %335 : vector<6x1x128xf32>
    %339 = arith.subf %333, %336 : vector<6x1x128xf32>
    %cst_107 = arith.constant 2.000000e+00 : f32
    %340 = vector.broadcast %cst_107 : f32 to vector<6x1x128xf32>
    %341 = arith.mulf %340, %339 : vector<6x1x128xf32>
    %342 = vector.broadcast %1 : f32 to vector<6x1x128xf32>
    %343 = arith.addf %341, %342 : vector<6x1x128xf32>
    %344 = arith.addf %337, %338 : vector<6x1x128xf32>
    %345 = vector.broadcast %1 : f32 to vector<6x1x128xf32>
    %346 = arith.addf %344, %345 : vector<6x1x128xf32>
    %cst_108 = arith.constant 2.000000e+00 : f32
    %347 = vector.broadcast %cst_108 : f32 to vector<6x1x128xf32>
    %348 = arith.mulf %347, %336 : vector<6x1x128xf32>
    %349 = vector.broadcast %0 : f32 to vector<6x1x128xf32>
    %350 = arith.addf %348, %349 : vector<6x1x128xf32>
    %351 = arith.mulf %350, %343 : vector<6x1x128xf32>
    %352 = arith.addf %334, %335 : vector<6x1x128xf32>
    %353 = vector.broadcast %0 : f32 to vector<6x1x128xf32>
    %354 = arith.addf %352, %353 : vector<6x1x128xf32>
    %355 = arith.mulf %354, %346 : vector<6x1x128xf32>
    %356 = arith.divf %351, %355 : vector<6x1x128xf32>
    %357 = tpu.iota {dimensions = array<i32: 2>} : vector<6x1x128xi32>
    %c15_i32 = arith.constant 15 : i32
    %358 = vector.broadcast %c15_i32 : i32 to vector<6x1x128xi32>
    %359 = arith.andi %357, %358 : vector<6x1x128xi32>
    %c5_i32_109 = arith.constant 5 : i32
    %360 = vector.broadcast %c5_i32_109 : i32 to vector<6x1x128xi32>
    %361 = arith.cmpi sge, %359, %360 : vector<6x1x128xi32>
    %c11_i32 = arith.constant 11 : i32
    %362 = vector.broadcast %c11_i32 : i32 to vector<6x1x128xi32>
    %363 = arith.cmpi slt, %359, %362 : vector<6x1x128xi32>
    %364 = arith.andi %361, %363 : vector<6x1x128xi1>
    %cst_110 = arith.constant 0.000000e+00 : f32
    %365 = vector.broadcast %cst_110 : f32 to vector<6x1x128xf32>
    %366 = arith.select %364, %356, %365 : vector<6x1x128xi1>, vector<6x1x128xf32>
    %cst_111 = arith.constant dense<0.000000e+00> : vector<1x128xf32>
    %367 = vector.multi_reduction <add>, %366, %cst_111 [0] : vector<6x1x128xf32> to vector<1x128xf32>
    %c0_112 = arith.constant 0 : index
    %c0_113 = arith.constant 0 : index
    %c0_114 = arith.constant 0 : index
    %368 = vector.load %arg4[%c0_112, %c0_113, %c0_114] : memref<1x1x128xf32, #tpu.memory_space<vmem>>, vector<1x1x128xf32>
    %369 = vector.shape_cast %368 : vector<1x1x128xf32> to vector<1x128xf32>
    %370 = vector.shape_cast %367 : vector<1x128xf32> to vector<1x1x128xf32>
    tpu.vector_store %arg4[%c0_112, %c0_113, %c0_114], %370 {strides = array<i32>} : memref<1x1x128xf32, #tpu.memory_space<vmem>>, vector<1x1x128xf32>,
    return
  }
  func.func @transform_0(%arg0: i32) -> i32 {
    %c0_i32 = arith.constant 0 : i32
    %c0_i32_0 = arith.constant 0 : i32
    return %c0_i32 : i32
  }
  func.func @transform_1(%arg0: i32) -> (i32, i32, i32, i32) {
    %c0_i32 = arith.constant 0 : i32
    %c0_i32_0 = arith.constant 0 : i32
    %c0_i32_1 = arith.constant 0 : i32
    %c0_i32_2 = arith.constant 0 : i32
    return %arg0, %c0_i32, %c0_i32_0, %c0_i32_1 : i32, i32, i32, i32
  }
  func.func @transform_2(%arg0: i32) -> (i32, i32, i32, i32) {
    %c0_i32 = arith.constant 0 : i32
    %c0_i32_0 = arith.constant 0 : i32
    %c0_i32_1 = arith.constant 0 : i32
    %c0_i32_2 = arith.constant 0 : i32
    return %arg0, %c0_i32, %c0_i32_0, %c0_i32_1 : i32, i32, i32, i32
  }
  func.func @transform_3(%arg0: i32) -> (i32, i32, i32) {
    %c0_i32 = arith.constant 0 : i32
    %c0_i32_0 = arith.constant 0 : i32
    %c0_i32_1 = arith.constant 0 : i32
    return %arg0, %c0_i32, %c0_i32_0 : i32, i32, i32
  }
}

</mosaic_0001>

<bundles_post_ra>
// kernel: ssim_pallas.1
= control target key start
LH: loop header
LB: loop body
LE: loop exit
PB: predicated region body
PF: predicated region fallthrough
CT: control target
= control target key end

     0   :  { %8 = vsyncpa [#allocation3], 0  ;;  %s4162_s0 = inlined_call_operand.vmem [shape: f32[2], index: 0, kind: input, shape index: {}]   ;;  %s4163_s1 = inlined_call_operand.vmem [shape: f32[1,16,1,128], index: 1, kind: input, shape index: {}]   ;;  %s4164_s2 = inlined_call_operand.vmem [shape: f32[1,16,1,128], index: 2, kind: input, shape index: {}]   ;;  %s4165_s3 = inlined_call_operand.vmem [shape: f32[1,1,128], index: 3, kind: output, shape index: {}]  }
   0x1   :  { %s15_s14 = sshll.u32 %s4162_s0, 4  ;;  %s16_s14 = int_to_ptr.vmem [resolvable:$true] %s15_s14 }
   0x2   :  { %s1865_s15 = scalar_lea.vmem %s16_s14, 16  ;;  %p1870_p1 = scmp.lt.s32.totalorder %s16_s14, %s16_s14 }
   0x3   :  { %p1866_p0 = scmp.ne.s32.totalorder %s16_s14, %s1865_s15  ;;  %p1871_p2 = scmp.lt.s32.totalorder %s1865_s15, %s1865_s15 }
   0x5   :  { %p1872_p3 = por %p1871_p2, %p1870_p1 }
   0x7   :  { %p1873_p4 = pnand %p1872_p3, %p1866_p0 }
   0x9   :  { %1876 = shalt.err (!%p1873_p4)
}
   0xa   :  { %s1879_s16 = smov [#allocation2]  }
   0xb   :  { %18 = dma.vmem_to_smem %s16_s14, 16, %s1879_s16, [#allocation3]  }
   0xc   :  { %1877 = dma.done.wait [#allocation3], 16  }
   0xd   :  { %1878 = vsyncadd [#allocation3], 4294967280 }
   0xe   :  { %26 = sfence }
   0xf   :  { %v1916_v0 = vld [vmem:[%s4163_s1 + $0x2] sm:$0x1]  ;;  %v1921_v1 = vld [vmem:[%s4163_s1 + $0x3] sm:$0x1]  ;;  %v1926_v2 = vld [vmem:[%s4163_s1 + $0x4] sm:$0x1] }
  0x10   :  { %v1931_v3 = vld [vmem:[%s4163_s1 + $0x5] sm:$0x1]  ;;  %v1936_v4 = vld [vmem:[%s4163_s1 + $0x6] sm:$0x1]  ;;  %v1941_v5 = vld [vmem:[%s4163_s1 + $0x7] sm:$0x1] }
  0x11   :  { %v1946_v6 = vld [vmem:[%s4163_s1 + $0x8] sm:$0x1]  ;;  %v1951_v7 = vld [vmem:[%s4163_s1 + $0x9] sm:$0x1]  ;;  %v1956_v8 = vld [vmem:[%s4163_s1 + $0xa] sm:$0x1]  ;;  %v109_v9 = vadd.f32 %v1941_v5, %v1921_v1  ;;  %v127_v10 = vadd.f32 %v1936_v4, %v1926_v2  ;;  %v128_v16 = vadd.f32 %v1941_v5, %v1931_v3 }
  0x12   :  { %v1965_v11 = vld [vmem:[%s4163_s1 + $0xb] sm:$0x1]  ;;  %v1970_v12 = vld [vmem:[%s4163_s1 + $0xc] sm:$0x1]  ;;  %v93_v13 = vadd.f32 %v1956_v8, %v1926_v2  ;;  %v111_v14 = vadd.f32 %v1951_v7, %v1931_v3  ;;  %v129_v15 = vadd.f32 %v1946_v6, %v1936_v4  ;;  %v147_v19 = vmul.f32 0.26601171, %v1941_v5 }
  0x13   :  { %v63_v17 = vadd.f32 %v1970_v12, %v1916_v0  ;;  %v75_v18 = vadd.f32 %v1965_v11, %v1921_v1  ;;  %v1988_v20 = vld [vmem:[%s4163_s1] sm:$0x1]  ;;  %v1993_v21 = vld [vmem:[%s4163_s1 + $0x1] sm:$0x1]  ;;  %v91_v22 = vadd.f32 %v1946_v6, %v1916_v0  ;;  %v76_v26 = vadd.f32 %v1970_v12, %v1926_v2  ;;  %v2008_v38 = vld [vmem:[%s4163_s1 + $0xd] sm:$0x1] }
  0x14   :  { %v99_v23 = vmul.f32 0.036000773, %v93_v13  ;;  %v117_v24 = vmul.f32 0.10936069, %v111_v14  ;;  %v61_v25 = vadd.f32 %v1956_v8, %v1988_v20  ;;  %v135_v29 = vmul.f32 0.21300554, %v129_v15 }
  0x15   :  { %v69_v27 = vmul.f32 0.0010283801, %v63_v17  ;;  %v81_v28 = vmul.f32 0.007598758, %v75_v18  ;;  %v73_v30 = vadd.f32 %v1951_v7, %v1993_v21  ;;  %v97_v32 = vmul.f32 0.036000773, %v91_v22 }
  0x16   :  { %v67_v31 = vmul.f32 0.0010283801, %v61_v25  ;;  %v115_v33 = vmul.f32 0.10936069, %v109_v9  ;;  %v94_v34 = vadd.f32 %v1965_v11, %v1931_v3  ;;  %v133_v37 = vmul.f32 0.21300554, %v127_v10 }
  0x17   :  { %v87_v35 = vadd.f32 %v81_v28, %v69_v27  ;;  %v79_v36 = vmul.f32 0.007598758, %v73_v30  ;;  %v112_v39 = vadd.f32 %v1956_v8, %v1936_v4  ;;  %v145_v40 = vmul.f32 0.26601171, %v1931_v3  ;;  %v2029_v56 = vld [vmem:[%s4163_s1 + $0xe] sm:$0x1] }
  0x18   :  { %v64_v41 = vadd.f32 %v2008_v38, %v1921_v1  ;;  %v82_v42 = vmul.f32 0.007598758, %v76_v26  ;;  %v130_v43 = vadd.f32 %v1951_v7, %v1941_v5  ;;  %v100_v46 = vmul.f32 0.036000773, %v94_v34  ;;  %v2034_v57 = vld [vmem:[%s4163_s1 + $0xf] sm:$0x1] }
  0x19   :  { %v105_v44 = vadd.f32 %v99_v23, %v87_v35  ;;  %v85_v45 = vadd.f32 %v79_v36, %v67_v31  ;;  %v118_v47 = vmul.f32 0.10936069, %v112_v39  ;;  %v148_v49 = vmul.f32 0.26601171, %v1946_v6  ;;  %s1880_s20 = smov 1   ;;  %s1881_s21 = smov 127  }
  0x1a   :  { %v70_v48 = vmul.f32 0.0010283801, %v64_v41  ;;  %v62_v50 = vadd.f32 %v1965_v11, %v1993_v21  ;;  %v74_v51 = vadd.f32 %v1956_v8, %v1916_v0  ;;  %v92_v54 = vadd.f32 %v1951_v7, %v1921_v1  ;;  %s1882_s22 = smov 2   ;;  %s1883_s23 = smov 126  }
  0x1b   :  { %v123_v52 = vadd.f32 %v117_v24, %v105_v44  ;;  %v103_v53 = vadd.f32 %v97_v32, %v85_v45  ;;  %v110_v55 = vadd.f32 %v1946_v6, %v1926_v2  ;;  %v136_v59 = vmul.f32 0.21300554, %v130_v43  ;;  %s1884_s24 = smov 3   ;;  %s1885_s25 = smov 125  }
  0x1c   :  { %v88_v58 = vadd.f32 %v82_v42, %v70_v48  ;;  %v68_v60 = vmul.f32 0.0010283801, %v62_v50  ;;  %v80_v61 = vmul.f32 0.007598758, %v74_v51  ;;  %v98_v9 = vmul.f32 0.036000773, %v92_v54 }
  0x1d   :  { %v141_v62 = vadd.f32 %v135_v29, %v123_v52  ;;  %v121_v63 = vadd.f32 %v115_v33, %v103_v53  ;;  %v134_v10 = vmul.f32 0.21300554, %v128_v16  ;;  %v116_v15 = vmul.f32 0.10936069, %v110_v55  ;;  %s1886_s26 = smov 4   ;;  %s1887_s27 = smov 124  }
  0x1e   :  { %v106_v13 = vadd.f32 %v100_v46, %v88_v58  ;;  %v86_v14 = vadd.f32 %v80_v61, %v68_v60  ;;  %v66_v17 = vadd.f32 %v2034_v57, %v1931_v3  ;;  %v78_v23 = vadd.f32 %v2029_v56, %v1936_v4  ;;  %s1888_s5 = smov 5   ;;  %s1889_s14 = smov 123  }
  0x1f   :  { %v2038_v18 = vadd.f32 %v147_v19, %v141_v62  ;;  %v139_v22 = vadd.f32 %v133_v37, %v121_v63  ;;  %v96_v24 = vadd.f32 %v2008_v38, %v1941_v5  ;;  %v114_v16 = vadd.f32 %v1970_v12, %v1946_v6 }
  0x20   :  { %v124_v25 = vadd.f32 %v118_v47, %v106_v13  ;;  %v104_v26 = vadd.f32 %v98_v9, %v86_v14  ;;  %v72_v27 = vmul.f32 0.0010283801, %v66_v17  ;;  %v84_v19 = vmul.f32 0.007598758, %v78_v23  ;;  %v2160_v9 = vld [vmem:[%s4164_s2 + $0x1] sm:$0x1] }
  0x21   :  { %167 = vrot.lane.b32.xlu1 %v2038_v18, %s1880_s20  ;;  %v2048_v28 = vadd.f32 %v145_v40, %v139_v22  ;;  %v102_v29 = vmul.f32 0.036000773, %v96_v24  ;;  %v132_v30 = vadd.f32 %v1965_v11, %v1951_v7  ;;  %v146_v33 = vmul.f32 0.26601171, %v1936_v4  ;;  %v2170_v13 = vld [vmem:[%s4164_s2 + $0xa] sm:$0x1] }
  0x22   :  { %v142_v31 = vadd.f32 %v136_v59, %v124_v25  ;;  %v122_v32 = vadd.f32 %v116_v15, %v104_v26  ;;  %v120_v34 = vmul.f32 0.10936069, %v114_v16  ;;  %v90_v35 = vadd.f32 %v84_v19, %v72_v27  ;;  %v2175_v14 = vld [vmem:[%s4164_s2 + $0xb] sm:$0x1]  ;;  %v2184_v15 = vld [vmem:[%s4164_s2 + $0x3] sm:$0x1] }
  0x23   :  { %163 = vrot.lane.b32.xlu0 %v2048_v28, %s1880_s20  ;;  %v138_v36 = vmul.f32 0.21300554, %v132_v30  ;;  %v65_v37 = vadd.f32 %v2029_v56, %v1926_v2  ;;  %v77_v39 = vadd.f32 %v2008_v38, %v1931_v3  ;;  %v95_v42 = vadd.f32 %v1970_v12, %v1936_v4  ;;  %v2193_v23 = vld [vmem:[%s4164_s2 + $0x9] sm:$0x1]  ;;  %v2198_v24 = vld [vmem:[%s4164_s2] sm:$0x1] }
  0x24   :  { %v2059_v40 = vadd.f32 %v148_v49, %v142_v31  ;;  %v140_v41 = vadd.f32 %v134_v10, %v122_v32  ;;  %v113_v43 = vadd.f32 %v1965_v11, %v1941_v5  ;;  %v108_v44 = vadd.f32 %v102_v29, %v90_v35  ;;  %v2165_v10 = vld [vmem:[%s4164_s2 + $0x2] sm:$0x1]  ;;  %v2203_v25 = vld [vmem:[%s4164_s2 + $0x4] sm:$0x1]  ;;  %v2208_v26 = vld [vmem:[%s4164_s2 + $0xc] sm:$0x1] }
  0x25   :  { %v71_v45 = vmul.f32 0.0010283801, %v65_v37  ;;  %v83_v46 = vmul.f32 0.007598758, %v77_v39  ;;  %v131_v47 = vadd.f32 %v1956_v8, %v1946_v6  ;;  %v101_v49 = vmul.f32 0.036000773, %v95_v42 }
  0x26   :  { %169 = vrot.lane.b32.xlu1 %v2059_v40, %s1880_s20  ;;  %v2069_v48 = vadd.f32 %v146_v33, %v140_v41  ;;  %v126_v50 = vadd.f32 %v120_v34, %v108_v44  ;;  %v150_v51 = vmul.f32 0.26601171, %v1956_v8  ;;  %v119_v53 = vmul.f32 0.10936069, %v113_v43  ;;  %4189 = vst [vmem:[#allocation7_spill] sm:$0xff] %v2203_v25 }
  0x27   :  { %v89_v52 = vadd.f32 %v83_v46, %v71_v45  ;;  %v137_v58 = vmul.f32 0.21300554, %v131_v47  ;;  %v149_v61 = vmul.f32 0.26601171, %v1951_v7  ;;  %v374_v17 = vadd.f32 %v2175_v14, %v2160_v9  ;;  %v2213_v27 = vld [vmem:[%s4164_s2 + $0xd] sm:$0x1] }
  0x28   :  { %4187 = vst [vmem:[#allocation5_spill] sm:$0xff] %v2069_v48  ;;  %165 = vrot.lane.b32.xlu0 %v2069_v48, %s1880_s20  ;;  %v144_v54 = vadd.f32 %v138_v36, %v126_v50  ;;  %v386_v22 = vadd.f32 %v2170_v13, %v2165_v10  ;;  %4190 = vst [vmem:[#allocation8_spill] sm:$0xff] %v2213_v27  ;;  %v404_v16 = vadd.f32 %v2193_v23, %v2184_v15  ;;  %v2228_v32 = vld [vmem:[%s4164_s2 + $0x8] sm:$0x1]  ;;  %v2237_v35 = vld [vmem:[%s4164_s2 + $0x5] sm:$0x1] }
  0x29   :  { %v107_v55 = vadd.f32 %v101_v49, %v89_v52  ;;  %v380_v19 = vmul.f32 0.0010283801, %v374_v17  ;;  %v373_v30 = vadd.f32 %v2170_v13, %v2198_v24  ;;  %v385_v31 = vadd.f32 %v2193_v23, %v2160_v9  ;;  %v2246_v36 = vld [vmem:[%s4164_s2 + $0x7] sm:$0x1]  ;;  %v2253_v41 = vld [vmem:[%s4164_s2 + $0xe] sm:$0x1] }
  0x2a   :  { %v2074_v59 = vadd.f32 %v150_v51, %v144_v54  ;;  %v392_v29 = vmul.f32 0.007598758, %v386_v22  ;;  %v376_v33 = vadd.f32 %v2213_v27, %v2184_v15  ;;  %v388_v34 = vadd.f32 %v2208_v26, %v2203_v25  ;;  %4191 = vst [vmem:[#allocation9_spill] sm:$0xff] %v2253_v41  ;;  %v2260_v46 = vld [vmem:[%s4164_s2 + $0xf] sm:$0x1] }
  0x2b   :  { %v125_v60 = vadd.f32 %v119_v53, %v107_v55  ;;  %v410_v37 = vmul.f32 0.036000773, %v404_v16  ;;  %v422_v39 = vadd.f32 %v2228_v32, %v2203_v25  ;;  %v379_v43 = vmul.f32 0.0010283801, %v373_v30  ;;  %4192 = vst [vmem:[#allocation10_spill] sm:$0xff] %v2260_v46 }
  0x2c   :  { %173 = vrot.lane.b32.xlu1 %v2074_v59, %s1880_s20  ;;  %v398_v42 = vadd.f32 %v392_v29, %v380_v19  ;;  %v391_v44 = vmul.f32 0.007598758, %v385_v31  ;;  %v403_v45 = vadd.f32 %v2228_v32, %v2165_v10  ;;  %v440_v47 = vadd.f32 %v2246_v36, %v2237_v35  ;;  %v2269_v52 = vld [vmem:[%s4164_s2 + $0x6] sm:$0x1] }
  0x2d   :  { %v143_v62 = vadd.f32 %v137_v58, %v125_v60  ;;  %v382_v49 = vmul.f32 0.0010283801, %v376_v33  ;;  %v394_v50 = vmul.f32 0.007598758, %v388_v34  ;;  %v406_v51 = vadd.f32 %v2175_v14, %v2237_v35 }
  0x2e   :  { %v375_v53 = vadd.f32 %v2208_v26, %v2165_v10  ;;  %v387_v54 = vadd.f32 %v2175_v14, %v2184_v15  ;;  %v428_v55 = vmul.f32 0.10936069, %v422_v39  ;;  %v378_v58 = vadd.f32 %v2260_v46, %v2237_v35 }
  0x2f   :  { %v2079_v63 = vadd.f32 %v149_v61, %v143_v62  ;;  %v390_v60 = vadd.f32 %v2253_v41, %v2269_v52  ;;  %v416_v61 = vadd.f32 %v410_v37, %v398_v42  ;;  %v397_v62 = vadd.f32 %v391_v44, %v379_v43 }
  0x30   :  { %177 = vrot.lane.b32.xlu1 %v2069_v48, %s1881_s21  ;;  %v409_v17 = vmul.f32 0.036000773, %v403_v45  ;;  %v421_v22 = vadd.f32 %v2246_v36, %v2184_v15  ;;  %v446_v16 = vmul.f32 0.21300554, %v440_v47  ;;  %v400_v19 = vadd.f32 %v394_v50, %v382_v49 }
  0x31   :  { %4188 = vst [vmem:[#allocation6_spill] sm:$0xff] %v2079_v63  ;;  %171 = vrot.lane.b32.xlu0 %v2079_v63, %s1880_s20  ;;  %v412_v29 = vmul.f32 0.036000773, %v406_v51  ;;  %v424_v30 = vadd.f32 %v2170_v13, %v2269_v52  ;;  %v381_v31 = vmul.f32 0.0010283801, %v375_v53  ;;  %v405_v34 = vadd.f32 %v2170_v13, %v2203_v25 }
  0x32   :  { %v393_v33 = vmul.f32 0.007598758, %v387_v54  ;;  %v408_v39 = vadd.f32 %v2213_v27, %v2246_v36  ;;  %v384_v37 = vmul.f32 0.0010283801, %v378_v58  ;;  %v396_v42 = vmul.f32 0.007598758, %v390_v60 }
  0x33   :  { %v377_v43 = vadd.f32 %v2253_v41, %v2203_v25  ;;  %v389_v44 = vadd.f32 %v2213_v27, %v2237_v35  ;;  %v434_v45 = vadd.f32 %v428_v55, %v416_v61  ;;  %v415_v47 = vadd.f32 %v409_v17, %v397_v62 }
  0x34   :  { %181 = vrot.lane.b32.xlu1 %v2059_v40, %s1881_s21  ;;  %v427_v49 = vmul.f32 0.10936069, %v421_v22  ;;  %v439_v50 = vadd.f32 %v2269_v52, %v2203_v25  ;;  %v418_v51 = vadd.f32 %v412_v29, %v400_v19  ;;  %v430_v53 = vmul.f32 0.10936069, %v424_v30 }
  0x35   :  { %175 = vrot.lane.b32.xlu0 %v2048_v28, %s1881_s21  ;;  %v442_v54 = vadd.f32 %v2193_v23, %v2246_v36  ;;  %v423_v58 = vadd.f32 %v2193_v23, %v2237_v35  ;;  %v399_v60 = vadd.f32 %v393_v33, %v381_v31  ;;  %v411_v46 = vmul.f32 0.036000773, %v405_v34 }
  0x36   :  { %v414_v41 = vmul.f32 0.036000773, %v408_v39  ;;  %v426_v27 = vadd.f32 %v2208_v26, %v2228_v32  ;;  %v402_v55 = vadd.f32 %v396_v42, %v384_v37  ;;  %v383_v61 = vmul.f32 0.0010283801, %v377_v43 }
  0x37   :  { %v395_v62 = vmul.f32 0.007598758, %v389_v44  ;;  %v407_v17 = vadd.f32 %v2208_v26, %v2269_v52  ;;  %v452_v22 = vadd.f32 %v446_v16, %v434_v45  ;;  %v458_v19 = vmul.f32 0.26601171, %v2269_v52 }
  0x38   :  { %185 = vrot.lane.b32.xlu1 %v2074_v59, %s1881_s21  ;;  %v445_v29 = vmul.f32 0.21300554, %v439_v50  ;;  %v433_v31 = vadd.f32 %v427_v49, %v415_v47  ;;  %v448_v33 = vmul.f32 0.21300554, %v442_v54  ;;  %v429_v34 = vmul.f32 0.10936069, %v423_v58 }
  0x39   :  { %179 = vrot.lane.b32.xlu0 %v2038_v18, %s1881_s21  ;;  %v441_v39 = vadd.f32 %v2228_v32, %v2269_v52  ;;  %v436_v25 = vadd.f32 %v430_v53, %v418_v51  ;;  %v432_v37 = vmul.f32 0.10936069, %v426_v27  ;;  %v444_v42 = vadd.f32 %v2175_v14, %v2193_v23 }
  0x3a   :  { %v420_v16 = vadd.f32 %v414_v41, %v402_v55  ;;  %v401_v43 = vadd.f32 %v395_v62, %v383_v61  ;;  %v413_v44 = vmul.f32 0.036000773, %v407_v17  ;;  %v425_v45 = vadd.f32 %v2175_v14, %v2246_v36 }
  0x3b   :  { %v2328_v49 = vadd.f32 %v458_v19, %v452_v22  ;;  %v451_v27 = vadd.f32 %v445_v29, %v433_v31  ;;  %v460_v50 = vmul.f32 0.26601171, %v2228_v32  ;;  %v454_v51 = vadd.f32 %v448_v33, %v436_v25 }
  0x3c   :  { %207 = vrot.lane.b32.xlu1 %v2069_v48, %s1882_s22  ;;  %v447_v54 = vmul.f32 0.21300554, %v441_v39  ;;  %v450_v58 = vmul.f32 0.21300554, %v444_v42  ;;  %v419_v55 = vadd.f32 %v413_v44, %v401_v43  ;;  %v431_v61 = vmul.f32 0.10936069, %v425_v45 }
  0x3d   :  { %183 = vrot.lane.b32.xlu0 %v2079_v63, %s1881_s21  ;;  %4195 = vst [vmem:[#allocation13_spill] sm:$0xff] %v2328_v49  ;;  %v443_v62 = vadd.f32 %v2170_v13, %v2228_v32  ;;  %v2342_v25 = vadd.f32 %v460_v50, %v454_v51  ;;  %v462_v22 = vmul.f32 0.26601171, %v2170_v13  ;;  %v461_v43 = vmul.f32 0.26601171, %v2193_v23 }
  0x3e   :  { %v437_v33 = vadd.f32 %v431_v61, %v419_v55  ;;  %vm1791_vm3 = vcmask 1040384  }
  0x40   :  { %211 = vrot.lane.b32.xlu1 %v2059_v40, %s1882_s22 }
  0x41   :  { %205 = vrot.lane.b32.xlu0 %v2048_v28, %s1882_s22 }
  0x44   :  { %215 = vrot.lane.b32.xlu1 %v2074_v59, %s1882_s22 }
  0x45   :  { %209 = vrot.lane.b32.xlu0 %v2038_v18, %s1882_s22 }
  0x48   :  { %219 = vrot.lane.b32.xlu1 %v2069_v48, %s1883_s23 }
  0x49   :  { %213 = vrot.lane.b32.xlu0 %v2079_v63, %s1882_s22 }
  0x4c   :  { %223 = vrot.lane.b32.xlu1 %v2059_v40, %s1883_s23 }
  0x4d   :  { %217 = vrot.lane.b32.xlu0 %v2048_v28, %s1883_s23 }
  0x50   :  { %227 = vrot.lane.b32.xlu1 %v2074_v59, %s1883_s23 }
  0x51   :  { %221 = vrot.lane.b32.xlu0 %v2038_v18, %s1883_s23 }
  0x54   :  { %249 = vrot.lane.b32.xlu1 %v2069_v48, %s1884_s24 }
  0x55   :  { %225 = vrot.lane.b32.xlu0 %v2079_v63, %s1883_s23 }
  0x58   :  { %253 = vrot.lane.b32.xlu1 %v2059_v40, %s1884_s24 }
  0x59   :  { %247 = vrot.lane.b32.xlu0 %v2048_v28, %s1884_s24 }
  0x5c   :  { %257 = vrot.lane.b32.xlu1 %v2074_v59, %s1884_s24 }
  0x5d   :  { %251 = vrot.lane.b32.xlu0 %v2038_v18, %s1884_s24 }
  0x60   :  { %261 = vrot.lane.b32.xlu1 %v2069_v48, %s1885_s25 }
  0x61   :  { %255 = vrot.lane.b32.xlu0 %v2079_v63, %s1884_s24 }
  0x64   :  { %265 = vrot.lane.b32.xlu1 %v2059_v40, %s1885_s25 }
  0x65   :  { %259 = vrot.lane.b32.xlu0 %v2048_v28, %s1885_s25 }
  0x68   :  { %269 = vrot.lane.b32.xlu1 %v2074_v59, %s1885_s25 }
  0x69   :  { %263 = vrot.lane.b32.xlu0 %v2038_v18, %s1885_s25 }
  0x6c   :  { %291 = vrot.lane.b32.xlu1 %v2069_v48, %s1886_s26 }
  0x6d   :  { %267 = vrot.lane.b32.xlu0 %v2079_v63, %s1885_s25 }
  0x70   :  { %295 = vrot.lane.b32.xlu1 %v2059_v40, %s1886_s26 }
  0x71   :  { %289 = vrot.lane.b32.xlu0 %v2048_v28, %s1886_s26 }
  0x74   :  { %299 = vrot.lane.b32.xlu1 %v2074_v59, %s1886_s26 }
  0x75   :  { %293 = vrot.lane.b32.xlu0 %v2038_v18, %s1886_s26 }
  0x78   :  { %303 = vrot.lane.b32.xlu1 %v2069_v48, %s1887_s27 }
  0x79   :  { %297 = vrot.lane.b32.xlu0 %v2079_v63, %s1886_s26 }
  0x7c   :  { %307 = vrot.lane.b32.xlu1 %v2059_v40, %s1887_s27 }
  0x7d   :  { %301 = vrot.lane.b32.xlu0 %v2048_v28, %s1887_s27 }
  0x80   :  { %311 = vrot.lane.b32.xlu1 %v2074_v59, %s1887_s27 }
  0x81   :  { %305 = vrot.lane.b32.xlu0 %v2038_v18, %s1887_s27 }
  0x84   :  { %333 = vrot.lane.b32.xlu1 %v2069_v48, %s1888_s5 }
  0x85   :  { %309 = vrot.lane.b32.xlu0 %v2079_v63, %s1887_s27 }
  0x88   :  { %337 = vrot.lane.b32.xlu1 %v2059_v40, %s1888_s5 }
  0x89   :  { %331 = vrot.lane.b32.xlu0 %v2048_v28, %s1888_s5 }
  0x8c   :  { %341 = vrot.lane.b32.xlu1 %v2074_v59, %s1888_s5 }
  0x8d   :  { %335 = vrot.lane.b32.xlu0 %v2038_v18, %s1888_s5 }
  0x90   :  { %345 = vrot.lane.b32.xlu1 %v2069_v48, %s1889_s14  ;;  %v417_v48 = vadd.f32 %v411_v46, %v399_v60  ;;  %v457_v46 = vmul.f32 0.26601171, %v2237_v35  ;;  %v438_v60 = vadd.f32 %v432_v37, %v420_v16 }
  0x91   :  { %339 = vrot.lane.b32.xlu0 %v2079_v63, %s1888_s5 }
  0x92   :  { %v435_v53 = vadd.f32 %v429_v34, %v417_v48  ;;  %v2340_v17 = vadd.f32 %v457_v46, %v451_v27  ;;  %v459_v48 = vmul.f32 0.26601171, %v2246_v36  ;;  %v456_v31 = vadd.f32 %v450_v58, %v438_v60 }
  0x93   :  { %v2314_v30 = vpop.permute.xlu1 %167  ;;  %v449_v34 = vmul.f32 0.21300554, %v443_v62 }
  0x94   :  { %4193 = vst [vmem:[#allocation11_spill] sm:$0xff] %v2314_v30  ;;  %349 = vrot.lane.b32.xlu1 %v2059_v40, %s1889_s14  ;;  %v453_v29 = vadd.f32 %v447_v54, %v435_v53  ;;  %v2360_v42 = vadd.f32 %v462_v22, %v456_v31 }
  0x95   :  { %343 = vrot.lane.b32.xlu0 %v2048_v28, %s1889_s14  ;;  %v2326_v47 = vpop.permute.xlu0 %163  ;;  %v455_v16 = vadd.f32 %v449_v34, %v437_v33 }
  0x96   :  { %4194 = vst [vmem:[#allocation12_spill] sm:$0xff] %v2326_v47  ;;  %v2358_v37 = vadd.f32 %v459_v48, %v453_v29 }
  0x97   :  { %v2371_v27 = vadd.f32 %v461_v43, %v455_v16 }
  0x98   :  { %353 = vrot.lane.b32.xlu1 %v2074_v59, %s1889_s14  ;;  %v2336_v41 = vpop.permute.xlu1 %169 }
  0x99   :  { %347 = vrot.lane.b32.xlu0 %v2038_v18, %s1889_s14  ;;  %4196 = vst [vmem:[#allocation14_spill] sm:$0xff] %v2336_v41  ;;  %4199 = vst [vmem:[#allocation17_spill] sm:$0xff] %v2371_v27 }
  0x9a   :  { %v2348_v19 = vpop.permute.xlu0 %165 }
  0x9c   :  { %477 = vrot.lane.b32.xlu1 %v2328_v49, %s1880_s20 }
  0x9d   :  { %351 = vrot.lane.b32.xlu0 %v2079_v63, %s1889_s14 }
  0x9e   :  { %v2352_v39 = vpop.permute.xlu1 %173 }
  0x9f   :  { %4197 = vst [vmem:[#allocation15_spill] sm:$0xff] %v2352_v39 }
  0xa0   :  { %481 = vrot.lane.b32.xlu1 %v2342_v25, %s1880_s20 }
  0xa1   :  { %475 = vrot.lane.b32.xlu0 %v2340_v17, %s1880_s20 }
  0xa2   :  { %v2365_v45 = vpop.permute.xlu1 %177 }
  0xa3   :  { %v2363_v44 = vpop.permute.xlu0 %171 }
  0xa4   :  { %4198 = vst [vmem:[#allocation16_spill] sm:$0xff] %v2363_v44  ;;  %485 = vrot.lane.b32.xlu1 %v2360_v42, %s1880_s20 }
  0xa5   :  { %479 = vrot.lane.b32.xlu0 %v2358_v37, %s1880_s20 }
  0xa6   :  { %v2375_v50 = vpop.permute.xlu1 %181 }
  0xa7   :  { %v2373_v46 = vpop.permute.xlu0 %175  ;;  %4201 = vst [vmem:[#allocation19_spill] sm:$0xff] %v2375_v50 }
  0xa8   :  { %4200 = vst [vmem:[#allocation18_spill] sm:$0xff] %v2373_v46  ;;  %489 = vrot.lane.b32.xlu1 %v2328_v49, %s1881_s21 }
  0xa9   :  { %483 = vrot.lane.b32.xlu0 %v2371_v27, %s1880_s20 }
  0xaa   :  { %v2383_v53 = vpop.permute.xlu1 %185 }
  0xab   :  { %v2381_v51 = vpop.permute.xlu0 %179  ;;  %4203 = vst [vmem:[#allocation21_spill] sm:$0xff] %v2383_v53 }
  0xac   :  { %4202 = vst [vmem:[#allocation20_spill] sm:$0xff] %v2381_v51  ;;  %493 = vrot.lane.b32.xlu1 %v2342_v25, %s1881_s21 }
  0xad   :  { %487 = vrot.lane.b32.xlu0 %v2340_v17, %s1881_s21 }
  0xae   :  { %v2391_v58 = vpop.permute.xlu1 %207 }
  0xaf   :  { %v2389_v54 = vpop.permute.xlu0 %183  ;;  %4205 = vst [vmem:[#allocation23_spill] sm:$0xff] %v2391_v58 }
  0xb0   :  { %4204 = vst [vmem:[#allocation22_spill] sm:$0xff] %v2389_v54  ;;  %497 = vrot.lane.b32.xlu1 %v2360_v42, %s1881_s21 }
  0xb1   :  { %491 = vrot.lane.b32.xlu0 %v2358_v37, %s1881_s21 }
  0xb2   :  { %v2399_v55 = vpop.permute.xlu1 %211 }
  0xb3   :  { %v2397_v60 = vpop.permute.xlu0 %205  ;;  %4207 = vst [vmem:[#allocation25_spill] sm:$0xff] %v2399_v55 }
  0xb4   :  { %4206 = vst [vmem:[#allocation24_spill] sm:$0xff] %v2397_v60  ;;  %519 = vrot.lane.b32.xlu1 %v2328_v49, %s1882_s22 }
  0xb5   :  { %495 = vrot.lane.b32.xlu0 %v2371_v27, %s1881_s21 }
  0xb6   :  { %v2407_v62 = vpop.permute.xlu1 %215 }
  0xb7   :  { %v2405_v61 = vpop.permute.xlu0 %209  ;;  %4209 = vst [vmem:[#allocation27_spill] sm:$0xff] %v2407_v62 }
  0xb8   :  { %4208 = vst [vmem:[#allocation26_spill] sm:$0xff] %v2405_v61  ;;  %523 = vrot.lane.b32.xlu1 %v2342_v25, %s1882_s22  ;;  %v2543_v61 = vmul.f32 %v1951_v7, %v1951_v7 }
  0xb9   :  { %517 = vrot.lane.b32.xlu0 %v2340_v17, %s1882_s22 }
  0xba   :  { %v2415_v22 = vpop.permute.xlu1 %219 }
  0xbb   :  { %v2413_v48 = vpop.permute.xlu0 %213  ;;  %4211 = vst [vmem:[#allocation29_spill] sm:$0xff] %v2415_v22 }
  0xbc   :  { %4210 = vst [vmem:[#allocation28_spill] sm:$0xff] %v2413_v48  ;;  %527 = vrot.lane.b32.xlu1 %v2360_v42, %s1882_s22 }
  0xbd   :  { %521 = vrot.lane.b32.xlu0 %v2358_v37, %s1882_s22 }
  0xbe   :  { %v2423_v31 = vpop.permute.xlu1 %223 }
  0xbf   :  { %v2421_v29 = vpop.permute.xlu0 %217  ;;  %4213 = vst [vmem:[#allocation31_spill] sm:$0xff] %v2423_v31  ;;  %v2563_v31 = vmul.f32 %v1970_v12, %v1970_v12 }
  0xc0   :  { %4212 = vst [vmem:[#allocation30_spill] sm:$0xff] %v2421_v29  ;;  %531 = vrot.lane.b32.xlu1 %v2328_v49, %s1883_s23 }
  0xc1   :  { %525 = vrot.lane.b32.xlu0 %v2371_v27, %s1882_s22 }
  0xc2   :  { %v2431_v34 = vpop.permute.xlu1 %227 }
  0xc3   :  { %v2429_v33 = vpop.permute.xlu0 %221  ;;  %4215 = vst [vmem:[#allocation33_spill] sm:$0xff] %v2431_v34 }
  0xc4   :  { %4214 = vst [vmem:[#allocation32_spill] sm:$0xff] %v2429_v33  ;;  %535 = vrot.lane.b32.xlu1 %v2342_v25, %s1883_s23 }
  0xc5   :  { %529 = vrot.lane.b32.xlu0 %v2340_v17, %s1883_s23 }
  0xc6   :  { %v2439_v43 = vpop.permute.xlu1 %249 }
  0xc7   :  { %v2437_v16 = vpop.permute.xlu0 %225  ;;  %4217 = vst [vmem:[#allocation35_spill] sm:$0xff] %v2439_v43 }
  0xc8   :  { %4216 = vst [vmem:[#allocation34_spill] sm:$0xff] %v2437_v16  ;;  %539 = vrot.lane.b32.xlu1 %v2360_v42, %s1883_s23 }
  0xc9   :  { %533 = vrot.lane.b32.xlu0 %v2358_v37, %s1883_s23 }
  0xca   :  { %v2447_v62 = vpop.permute.xlu1 %253 }
  0xcb   :  { %v2445_v48 = vpop.permute.xlu0 %247  ;;  %4219 = vst [vmem:[#allocation37_spill] sm:$0xff] %v2447_v62 }
  0xcc   :  { %4218 = vst [vmem:[#allocation36_spill] sm:$0xff] %v2445_v48  ;;  %561 = vrot.lane.b32.xlu1 %v2328_v49, %s1884_s24 }
  0xcd   :  { %537 = vrot.lane.b32.xlu0 %v2371_v27, %s1883_s23 }
  0xce   :  { %v2455_v16 = vpop.permute.xlu1 %257 }
  0xcf   :  { %v2453_v34 = vpop.permute.xlu0 %251  ;;  %4221 = vst [vmem:[#allocation39_spill] sm:$0xff] %v2455_v16 }
  0xd0   :  { %4220 = vst [vmem:[#allocation38_spill] sm:$0xff] %v2453_v34  ;;  %565 = vrot.lane.b32.xlu1 %v2342_v25, %s1884_s24 }
  0xd1   :  { %559 = vrot.lane.b32.xlu0 %v2340_v17, %s1884_s24 }
  0xd2   :  { %v2463_v48 = vpop.permute.xlu1 %261 }
  0xd3   :  { %v2461_v43 = vpop.permute.xlu0 %255  ;;  %4223 = vst [vmem:[#allocation41_spill] sm:$0xff] %v2463_v48 }
  0xd4   :  { %4222 = vst [vmem:[#allocation40_spill] sm:$0xff] %v2461_v43  ;;  %569 = vrot.lane.b32.xlu1 %v2360_v42, %s1884_s24 }
  0xd5   :  { %563 = vrot.lane.b32.xlu0 %v2358_v37, %s1884_s24 }
  0xd6   :  { %v2471_v34 = vpop.permute.xlu1 %265 }
  0xd7   :  { %v2469_v62 = vpop.permute.xlu0 %259  ;;  %4225 = vst [vmem:[#allocation43_spill] sm:$0xff] %v2471_v34 }
  0xd8   :  { %4224 = vst [vmem:[#allocation42_spill] sm:$0xff] %v2469_v62  ;;  %573 = vrot.lane.b32.xlu1 %v2328_v49, %s1885_s25 }
  0xd9   :  { %567 = vrot.lane.b32.xlu0 %v2371_v27, %s1884_s24 }
  0xda   :  { %v2479_v43 = vpop.permute.xlu1 %269 }
  0xdb   :  { %v2477_v16 = vpop.permute.xlu0 %263  ;;  %4227 = vst [vmem:[#allocation45_spill] sm:$0xff] %v2479_v43 }
  0xdc   :  { %4226 = vst [vmem:[#allocation44_spill] sm:$0xff] %v2477_v16  ;;  %577 = vrot.lane.b32.xlu1 %v2342_v25, %s1885_s25 }
  0xdd   :  { %571 = vrot.lane.b32.xlu0 %v2340_v17, %s1885_s25 }
  0xde   :  { %v2487_v62 = vpop.permute.xlu1 %291 }
  0xdf   :  { %v2485_v48 = vpop.permute.xlu0 %267  ;;  %4229 = vst [vmem:[#allocation47_spill] sm:$0xff] %v2487_v62 }
  0xe0   :  { %4228 = vst [vmem:[#allocation46_spill] sm:$0xff] %v2485_v48  ;;  %581 = vrot.lane.b32.xlu1 %v2360_v42, %s1885_s25 }
  0xe1   :  { %575 = vrot.lane.b32.xlu0 %v2358_v37, %s1885_s25 }
  0xe2   :  { %v2495_v16 = vpop.permute.xlu1 %295 }
  0xe3   :  { %v2493_v34 = vpop.permute.xlu0 %289  ;;  %4231 = vst [vmem:[#allocation49_spill] sm:$0xff] %v2495_v16 }
  0xe4   :  { %4230 = vst [vmem:[#allocation48_spill] sm:$0xff] %v2493_v34  ;;  %603 = vrot.lane.b32.xlu1 %v2328_v49, %s1886_s26 }
  0xe5   :  { %579 = vrot.lane.b32.xlu0 %v2371_v27, %s1885_s25 }
  0xe6   :  { %v2503_v48 = vpop.permute.xlu1 %299 }
  0xe7   :  { %v2501_v43 = vpop.permute.xlu0 %293  ;;  %4233 = vst [vmem:[#allocation51_spill] sm:$0xff] %v2503_v48  ;;  %v687_v48 = vmul.f32 %v1916_v0, %v1916_v0  ;;  %v685_v0 = vmul.f32 %v1988_v20, %v1988_v20  ;;  %v698_v20 = vmul.f32 %v2008_v38, %v2008_v38 }
  0xe8   :  { %4232 = vst [vmem:[#allocation50_spill] sm:$0xff] %v2501_v43  ;;  %607 = vrot.lane.b32.xlu1 %v2342_v25, %s1886_s26 }
  0xe9   :  { %601 = vrot.lane.b32.xlu0 %v2340_v17, %s1886_s26  ;;  %v703_v39 = vadd.f32 %v2563_v31, %v687_v48 }
  0xea   :  { %v2511_v34 = vpop.permute.xlu1 %303 }
  0xeb   :  { %v2509_v62 = vpop.permute.xlu0 %297  ;;  %4235 = vst [vmem:[#allocation53_spill] sm:$0xff] %v2511_v34  ;;  %v2531_v34 = vmul.f32 %v1956_v8, %v1956_v8  ;;  %v688_v8 = vmul.f32 %v1921_v1, %v1921_v1 }
  0xec   :  { %4234 = vst [vmem:[#allocation52_spill] sm:$0xff] %v2509_v62  ;;  %611 = vrot.lane.b32.xlu1 %v2360_v42, %s1886_s26  ;;  %v686_v62 = vmul.f32 %v1993_v21, %v1993_v21 }
  0xed   :  { %605 = vrot.lane.b32.xlu0 %v2358_v37, %s1886_s26  ;;  %v714_v21 = vadd.f32 %v2531_v34, %v687_v48  ;;  %v732_v55 = vadd.f32 %v2543_v61, %v688_v8  ;;  %v704_v60 = vadd.f32 %v698_v20, %v688_v8 }
  0xee   :  { %v2519_v43 = vpop.permute.xlu1 %307  ;;  %v713_v1 = vadd.f32 %v2543_v61, %v686_v62 }
  0xef   :  { %v2517_v16 = vpop.permute.xlu0 %301  ;;  %4237 = vst [vmem:[#allocation55_spill] sm:$0xff] %v2519_v43  ;;  %v720_v12 = vmul.f32 0.007598758, %v714_v21  ;;  %v2598_v21 = vmul.f32 %v1941_v5, %v1941_v5  ;;  %v710_v53 = vmul.f32 0.0010283801, %v704_v60 }
  0xf0   :  { %4236 = vst [vmem:[#allocation54_spill] sm:$0xff] %v2517_v16  ;;  %615 = vrot.lane.b32.xlu1 %v2328_v49, %s1887_s27  ;;  %v2535_v16 = vmul.f32 %v1965_v11, %v1965_v11  ;;  %v719_v58 = vmul.f32 0.007598758, %v713_v1 }
  0xf1   :  { %609 = vrot.lane.b32.xlu0 %v2371_v27, %s1886_s26  ;;  %v770_v47 = vadd.f32 %v2543_v61, %v2598_v21 }
  0xf2   :  { %v2539_v33 = vpop.permute.xlu1 %311  ;;  %v702_v11 = vadd.f32 %v2535_v16, %v686_v62  ;;  %v2584_v62 = vmul.f32 %v1931_v3, %v1931_v3  ;;  %v700_v3 = vmul.f32 %v2034_v57, %v2034_v57  ;;  %v715_v5 = vadd.f32 %v2535_v16, %v688_v8 }
  0xf3   :  { %v2537_v43 = vpop.permute.xlu0 %305  ;;  %4239 = vst [vmem:[#allocation57_spill] sm:$0xff] %v2539_v33 }
  0xf4   :  { %4238 = vst [vmem:[#allocation56_spill] sm:$0xff] %v2537_v43  ;;  %619 = vrot.lane.b32.xlu1 %v2342_v25, %s1887_s27  ;;  %v689_v43 = vmul.f32 %v1926_v2, %v1926_v2  ;;  %v701_v2 = vadd.f32 %v2531_v34, %v685_v0  ;;  %v734_v57 = vadd.f32 %v2535_v16, %v2584_v62 }
  0xf5   :  { %613 = vrot.lane.b32.xlu0 %v2340_v17, %s1887_s27 }
  0xf6   :  { %v2557_v7 = vpop.permute.xlu1 %333  ;;  %v716_v22 = vadd.f32 %v2563_v31, %v689_v43  ;;  %v740_v41 = vmul.f32 0.036000773, %v734_v57 }
  0xf7   :  { %v2555_v33 = vpop.permute.xlu0 %309  ;;  %4241 = vst [vmem:[#allocation59_spill] sm:$0xff] %v2557_v7  ;;  %v708_v7 = vmul.f32 0.0010283801, %v702_v11  ;;  %v699_v11 = vmul.f32 %v2029_v56, %v2029_v56 }
  0xf8   :  { %4240 = vst [vmem:[#allocation58_spill] sm:$0xff] %v2555_v33  ;;  %623 = vrot.lane.b32.xlu1 %v2360_v42, %s1887_s27  ;;  %v2574_v33 = vmul.f32 %v1946_v6, %v1946_v6  ;;  %v707_v6 = vmul.f32 0.0010283801, %v701_v2  ;;  %v691_v2 = vmul.f32 %v1936_v4, %v1936_v4  ;;  %v722_v56 = vmul.f32 0.007598758, %v716_v22 }
  0xf9   :  { %617 = vrot.lane.b32.xlu0 %v2358_v37, %s1887_s27  ;;  %v726_v1 = vadd.f32 %v720_v12, %v708_v7  ;;  %v706_v12 = vadd.f32 %v700_v3, %v2584_v62  ;;  %v733_v3 = vadd.f32 %v2531_v34, %v689_v43 }
  0xfa   :  { %v2580_v38 = vpop.permute.xlu1 %337  ;;  %v731_v0 = vadd.f32 %v2574_v33, %v687_v48  ;;  %v718_v4 = vadd.f32 %v699_v11, %v691_v2  ;;  %v749_v48 = vadd.f32 %v2598_v21, %v688_v8  ;;  %v767_v30 = vadd.f32 %v691_v2, %v689_v43 }
  0xfb   :  { %v2578_v29 = vpop.permute.xlu0 %331  ;;  %4243 = vst [vmem:[#allocation61_spill] sm:$0xff] %v2580_v38  ;;  %v738_v38 = vmul.f32 0.036000773, %v732_v55  ;;  %v725_v55 = vadd.f32 %v719_v58, %v707_v6  ;;  %v728_v50 = vadd.f32 %v722_v56, %v710_v53  ;;  %v752_v58 = vadd.f32 %v2531_v34, %v691_v2 }
  0xfc   :  { %4242 = vst [vmem:[#allocation60_spill] sm:$0xff] %v2578_v29  ;;  %645 = vrot.lane.b32.xlu1 %v2328_v49, %s1888_s5  ;;  %v750_v29 = vadd.f32 %v2574_v33, %v689_v43  ;;  %v737_v7 = vmul.f32 0.036000773, %v731_v0  ;;  %v709_v6 = vmul.f32 0.0010283801, %v703_v39  ;;  %v717_v53 = vadd.f32 %v698_v20, %v2584_v62 }
  0xfd   :  { %621 = vrot.lane.b32.xlu0 %v2371_v27, %s1887_s27  ;;  %v744_v60 = vadd.f32 %v738_v38, %v726_v1  ;;  %v721_v0 = vmul.f32 0.007598758, %v715_v5  ;;  %v712_v8 = vmul.f32 0.0010283801, %v706_v12  ;;  %v724_v38 = vmul.f32 0.007598758, %v718_v4 }
  0xfe   :  { %v2603_v44 = vpop.permute.xlu1 %341  ;;  %v756_v22 = vmul.f32 0.10936069, %v750_v29  ;;  %v736_v29 = vadd.f32 %v698_v20, %v2598_v21  ;;  %v705_v1 = vadd.f32 %v699_v11, %v689_v43  ;;  %v755_v39 = vmul.f32 0.10936069, %v749_v48 }
  0xff   :  { %v2601_v54 = vpop.permute.xlu0 %335  ;;  %4245 = vst [vmem:[#allocation63_spill] sm:$0xff] %v2603_v44  ;;  %v768_v44 = vadd.f32 %v2598_v21, %v2584_v62  ;;  %v746_v63 = vadd.f32 %v740_v41, %v728_v50  ;;  %v758_v46 = vmul.f32 0.10936069, %v752_v58  ;;  %v751_v12 = vadd.f32 %v2543_v61, %v2584_v62 }
 0x100   :  { %4244 = vst [vmem:[#allocation62_spill] sm:$0xff] %v2601_v54  ;;  %649 = vrot.lane.b32.xlu1 %v2342_v25, %s1888_s5  ;;  %v762_v56 = vadd.f32 %v756_v22, %v744_v60  ;;  %v727_v4 = vadd.f32 %v721_v0, %v709_v6  ;;  %v739_v43 = vmul.f32 0.036000773, %v733_v3  ;;  %v742_v11 = vmul.f32 0.036000773, %v736_v29 }
 0x101   :  { %643 = vrot.lane.b32.xlu0 %v2340_v17, %s1888_s5  ;;  %v774_v57 = vmul.f32 0.21300554, %v768_v44  ;;  %v754_v44 = vadd.f32 %v2563_v31, %v2574_v33  ;;  %v730_v41 = vadd.f32 %v724_v38, %v712_v8  ;;  %v711_v50 = vmul.f32 0.0010283801, %v705_v1 }
 0x102   :  { %v2621_v51 = vpop.permute.xlu1 %345  ;;  %v723_v20 = vmul.f32 0.007598758, %v717_v53  ;;  %v773_v22 = vmul.f32 0.21300554, %v767_v30  ;;  %v776_v0 = vmul.f32 0.21300554, %v770_v47  ;;  %v769_v29 = vadd.f32 %v2574_v33, %v691_v2 }
 0x103   :  { %v2619_v54 = vpop.permute.xlu0 %339  ;;  %4247 = vst [vmem:[#allocation65_spill] sm:$0xff] %v2621_v51  ;;  %v780_v6 = vadd.f32 %v774_v57, %v762_v56  ;;  %v757_v3 = vmul.f32 0.10936069, %v751_v12  ;;  %v772_v8 = vadd.f32 %v2535_v16, %v2543_v61  ;;  %v748_v30 = vadd.f32 %v742_v11, %v730_v41 }
 0x104   :  { %4246 = vst [vmem:[#allocation64_spill] sm:$0xff] %v2619_v54  ;;  %653 = vrot.lane.b32.xlu1 %v2360_v42, %s1888_s5  ;;  %v743_v54 = vadd.f32 %v737_v7, %v725_v55  ;;  %v735_v55 = vadd.f32 %v2563_v31, %v691_v2  ;;  %v786_v7 = vmul.f32 0.26601171, %v691_v2  ;;  %v753_v47 = vadd.f32 %v2535_v16, %v2598_v21 }
 0x105   :  { %647 = vrot.lane.b32.xlu0 %v2358_v37, %s1888_s5  ;;  %v785_v1 = vmul.f32 0.26601171, %v2584_v62  ;;  %v788_v53 = vmul.f32 0.26601171, %v2574_v33  ;;  %v778_v12 = vmul.f32 0.21300554, %v772_v8  ;;  %v771_v11 = vadd.f32 %v2531_v34, %v2574_v33 }
 0x106   :  { %v2633_v51 = vpop.permute.xlu1 %349  ;;  %v761_v60 = vadd.f32 %v755_v39, %v743_v54  ;;  %v729_v54 = vadd.f32 %v723_v20, %v711_v50  ;;  %v741_v31 = vmul.f32 0.036000773, %v735_v55  ;;  %v775_v39 = vmul.f32 0.21300554, %v769_v29 }
 0x107   :  { %v2631_v5 = vpop.permute.xlu0 %343  ;;  %4249 = vst [vmem:[#allocation67_spill] sm:$0xff] %v2633_v51  ;;  %v764_v51 = vadd.f32 %v758_v46, %v746_v63  ;;  %v2663_v46 = vadd.f32 %v786_v7, %v780_v6  ;;  %v787_v41 = vmul.f32 0.26601171, %v2598_v21  ;;  %v790_v50 = vmul.f32 0.26601171, %v2531_v34 }
 0x108   :  { %4248 = vst [vmem:[#allocation66_spill] sm:$0xff] %v2631_v5  ;;  %657 = vrot.lane.b32.xlu1 %v2328_v49, %s1889_s14  ;;  %v745_v5 = vadd.f32 %v739_v43, %v727_v4  ;;  %v760_v49 = vmul.f32 0.10936069, %v754_v44  ;;  %v779_v2 = vadd.f32 %v773_v22, %v761_v60  ;;  %v747_v4 = vadd.f32 %v741_v31, %v729_v54 }
 0x109   :  { %651 = vrot.lane.b32.xlu0 %v2371_v27, %s1888_s5  ;;  %4254 = vst [vmem:[#allocation72_spill] sm:$0xff] %v2663_v46  ;;  %v782_v56 = vadd.f32 %v776_v0, %v764_v51  ;;  %v759_v43 = vmul.f32 0.10936069, %v753_v47  ;;  %v777_v55 = vmul.f32 0.21300554, %v771_v11 }
 0x10a   :  { %v2648_v58 = vpop.permute.xlu1 %353  ;;  %v763_v57 = vadd.f32 %v757_v3, %v745_v5  ;;  %v766_v16 = vadd.f32 %v760_v49, %v748_v30  ;;  %v2677_v51 = vadd.f32 %v785_v1, %v779_v2  ;;  %v789_v6 = vmul.f32 0.26601171, %v2543_v61 }
 0x10b   :  { %v2646_v48 = vpop.permute.xlu0 %347  ;;  %4251 = vst [vmem:[#allocation69_spill] sm:$0xff] %v2648_v58  ;;  %v2679_v5 = vadd.f32 %v788_v53, %v782_v56  ;;  %v765_v20 = vadd.f32 %v759_v43, %v747_v4 }
 0x10c   :  { %4250 = vst [vmem:[#allocation68_spill] sm:$0xff] %v2646_v48  ;;  %661 = vrot.lane.b32.xlu1 %v2342_v25, %s1889_s14  ;;  %4257 = vst [vmem:[#allocation75_spill] sm:$0xff] %v2677_v51  ;;  %v781_v49 = vadd.f32 %v775_v39, %v763_v57  ;;  %v784_v33 = vadd.f32 %v778_v12, %v766_v16 }
 0x10d   :  { %655 = vrot.lane.b32.xlu0 %v2340_v17, %s1889_s14  ;;  %4258 = vst [vmem:[#allocation76_spill] sm:$0xff] %v2679_v5  ;;  %v783_v22 = vadd.f32 %v777_v55, %v765_v20 }
 0x10e   :  { %v2661_v63 = vpop.permute.xlu1 %477  ;;  %v2695_v34 = vadd.f32 %v787_v41, %v781_v49  ;;  %v2697_v21 = vadd.f32 %v790_v50, %v784_v33 }
 0x10f   :  { %v2659_v38 = vpop.permute.xlu0 %351  ;;  %4253 = vst [vmem:[#allocation71_spill] sm:$0xff] %v2661_v63  ;;  %v2708_v29 = vadd.f32 %v789_v6, %v783_v22 }
 0x110   :  { %4252 = vst [vmem:[#allocation70_spill] sm:$0xff] %v2659_v38  ;;  %665 = vrot.lane.b32.xlu1 %v2360_v42, %s1889_s14  ;;  %4261 = vst [vmem:[#allocation79_spill] sm:$0xff] %v2695_v34 }
 0x111   :  { %659 = vrot.lane.b32.xlu0 %v2358_v37, %s1889_s14  ;;  %4262 = vst [vmem:[#allocation80_spill] sm:$0xff] %v2697_v21  ;;  %4265 = vst [vmem:[#allocation83_spill] sm:$0xff] %v2708_v29 }
 0x112   :  { %v2675_v62 = vpop.permute.xlu1 %481 }
 0x113   :  { %v2673_v44 = vpop.permute.xlu0 %475  ;;  %4256 = vst [vmem:[#allocation74_spill] sm:$0xff] %v2675_v62 }
 0x114   :  { %4255 = vst [vmem:[#allocation73_spill] sm:$0xff] %v2673_v44  ;;  %805 = vrot.lane.b32.xlu1 %v2663_v46, %s1880_s20 }
 0x115   :  { %663 = vrot.lane.b32.xlu0 %v2371_v27, %s1889_s14 }
 0x116   :  { %v2689_v60 = vpop.permute.xlu1 %485 }
 0x117   :  { %v2687_v7 = vpop.permute.xlu0 %479  ;;  %4260 = vst [vmem:[#allocation78_spill] sm:$0xff] %v2689_v60 }
 0x118   :  { %4259 = vst [vmem:[#allocation77_spill] sm:$0xff] %v2687_v7  ;;  %809 = vrot.lane.b32.xlu1 %v2679_v5, %s1880_s20 }
 0x119   :  { %803 = vrot.lane.b32.xlu0 %v2677_v51, %s1880_s20 }
 0x11a   :  { %v2702_v3 = vpop.permute.xlu1 %489 }
 0x11b   :  { %v2700_v0 = vpop.permute.xlu0 %483  ;;  %4264 = vst [vmem:[#allocation82_spill] sm:$0xff] %v2702_v3 }
 0x11c   :  { %4263 = vst [vmem:[#allocation81_spill] sm:$0xff] %v2700_v0  ;;  %813 = vrot.lane.b32.xlu1 %v2697_v21, %s1880_s20 }
 0x11d   :  { %807 = vrot.lane.b32.xlu0 %v2695_v34, %s1880_s20 }
 0x11e   :  { %v2712_v30 = vpop.permute.xlu1 %493 }
 0x11f   :  { %v2710_v8 = vpop.permute.xlu0 %487  ;;  %4267 = vst [vmem:[#allocation85_spill] sm:$0xff] %v2712_v30 }
 0x120   :  { %4266 = vst [vmem:[#allocation84_spill] sm:$0xff] %v2710_v8  ;;  %817 = vrot.lane.b32.xlu1 %v2663_v46, %s1881_s21 }
 0x121   :  { %811 = vrot.lane.b32.xlu0 %v2708_v29, %s1880_s20 }
 0x122   :  { %v2720_v54 = vpop.permute.xlu1 %497 }
 0x123   :  { %v2718_v61 = vpop.permute.xlu0 %491  ;;  %4269 = vst [vmem:[#allocation87_spill] sm:$0xff] %v2720_v54 }
 0x124   :  { %4268 = vst [vmem:[#allocation86_spill] sm:$0xff] %v2718_v61  ;;  %821 = vrot.lane.b32.xlu1 %v2679_v5, %s1881_s21 }
 0x125   :  { %815 = vrot.lane.b32.xlu0 %v2677_v51, %s1881_s21 }
 0x126   :  { %v2728_v47 = vpop.permute.xlu1 %519 }
 0x127   :  { %v2726_v31 = vpop.permute.xlu0 %495  ;;  %4271 = vst [vmem:[#allocation89_spill] sm:$0xff] %v2728_v47 }
 0x128   :  { %4270 = vst [vmem:[#allocation88_spill] sm:$0xff] %v2726_v31  ;;  %825 = vrot.lane.b32.xlu1 %v2697_v21, %s1881_s21 }
 0x129   :  { %819 = vrot.lane.b32.xlu0 %v2695_v34, %s1881_s21 }
 0x12a   :  { %v2736_v1 = vpop.permute.xlu1 %523 }
 0x12b   :  { %v2734_v2 = vpop.permute.xlu0 %517  ;;  %4273 = vst [vmem:[#allocation91_spill] sm:$0xff] %v2736_v1 }
 0x12c   :  { %4272 = vst [vmem:[#allocation90_spill] sm:$0xff] %v2734_v2  ;;  %847 = vrot.lane.b32.xlu1 %v2663_v46, %s1882_s22  ;;  %v1019_v2 = vmul.f32 %v2269_v52, %v2269_v52 }
 0x12d   :  { %823 = vrot.lane.b32.xlu0 %v2708_v29, %s1881_s21 }
 0x12e   :  { %v2744_v56 = vpop.permute.xlu1 %527 }
 0x12f   :  { %v2742_v53 = vpop.permute.xlu0 %521  ;;  %4275 = vst [vmem:[#allocation93_spill] sm:$0xff] %v2744_v56  ;;  %v2903_v56 = vmul.f32 %v2208_v26, %v2208_v26 }
 0x130   :  { %4274 = vst [vmem:[#allocation92_spill] sm:$0xff] %v2742_v53  ;;  %851 = vrot.lane.b32.xlu1 %v2679_v5, %s1882_s22 }
 0x131   :  { %845 = vrot.lane.b32.xlu0 %v2677_v51, %s1882_s22 }
 0x132   :  { %v2752_v39 = vpop.permute.xlu1 %531 }
 0x133   :  { %v2750_v57 = vpop.permute.xlu0 %525  ;;  %4277 = vst [vmem:[#allocation95_spill] sm:$0xff] %v2752_v39 }
 0x134   :  { %4276 = vst [vmem:[#allocation94_spill] sm:$0xff] %v2750_v57  ;;  %855 = vrot.lane.b32.xlu1 %v2697_v21, %s1882_s22 }
 0x135   :  { %849 = vrot.lane.b32.xlu0 %v2695_v34, %s1882_s22 }
 0x136   :  { %v2760_v16 = vpop.permute.xlu1 %535 }
 0x137   :  { %v2758_v12 = vpop.permute.xlu0 %529  ;;  %4279 = vst [vmem:[#allocation97_spill] sm:$0xff] %v2760_v16 }
 0x138   :  { %4278 = vst [vmem:[#allocation96_spill] sm:$0xff] %v2758_v12  ;;  %859 = vrot.lane.b32.xlu1 %v2663_v46, %s1883_s23 }
 0x139   :  { %853 = vrot.lane.b32.xlu0 %v2708_v29, %s1882_s22 }
 0x13a   :  { %v2768_v43 = vpop.permute.xlu1 %539 }
 0x13b   :  { %v2766_v4 = vpop.permute.xlu0 %533  ;;  %4281 = vst [vmem:[#allocation99_spill] sm:$0xff] %v2768_v43 }
 0x13c   :  { %4280 = vst [vmem:[#allocation98_spill] sm:$0xff] %v2766_v4  ;;  %863 = vrot.lane.b32.xlu1 %v2679_v5, %s1883_s23 }
 0x13d   :  { %857 = vrot.lane.b32.xlu0 %v2677_v51, %s1883_s23 }
 0x13e   :  { %v2776_v41 = vpop.permute.xlu1 %561 }
 0x13f   :  { %v2774_v11 = vpop.permute.xlu0 %537  ;;  %4283 = vst [vmem:[#allocation101_spill] sm:$0xff] %v2776_v41 }
 0x140   :  { %4282 = vst [vmem:[#allocation100_spill] sm:$0xff] %v2774_v11  ;;  %867 = vrot.lane.b32.xlu1 %v2697_v21, %s1883_s23 }
 0x141   :  { %861 = vrot.lane.b32.xlu0 %v2695_v34, %s1883_s23 }
 0x142   :  { %v2784_v49 = vpop.permute.xlu1 %565 }
 0x143   :  { %v2782_v50 = vpop.permute.xlu0 %559  ;;  %4285 = vst [vmem:[#allocation103_spill] sm:$0xff] %v2784_v49 }
 0x144   :  { %4284 = vst [vmem:[#allocation102_spill] sm:$0xff] %v2782_v50  ;;  %889 = vrot.lane.b32.xlu1 %v2663_v46, %s1884_s24  ;;  %v1015_v50 = vmul.f32 %v2165_v10, %v2165_v10  ;;  %v1016_v10 = vmul.f32 %v2184_v15, %v2184_v15 }
 0x145   :  { %865 = vrot.lane.b32.xlu0 %v2708_v29, %s1883_s23 }
 0x146   :  { %v2792_v20 = vpop.permute.xlu1 %569 }
 0x147   :  { %v2790_v33 = vpop.permute.xlu0 %563  ;;  %4287 = vst [vmem:[#allocation105_spill] sm:$0xff] %v2792_v20 }
 0x148   :  { %4286 = vst [vmem:[#allocation104_spill] sm:$0xff] %v2790_v33  ;;  %893 = vrot.lane.b32.xlu1 %v2679_v5, %s1884_s24 }
 0x149   :  { %887 = vrot.lane.b32.xlu0 %v2677_v51, %s1884_s24 }
 0x14a   :  { %v2800_v22 = vpop.permute.xlu1 %573 }
 0x14b   :  { %v2798_v55 = vpop.permute.xlu0 %567  ;;  %4289 = vst [vmem:[#allocation107_spill] sm:$0xff] %v2800_v22  ;;  %v4308_v22 = vld [vmem:[#allocation7_spill] sm:$0xff] }
 0x14c   :  { %4288 = vst [vmem:[#allocation106_spill] sm:$0xff] %v2798_v55  ;;  %897 = vrot.lane.b32.xlu1 %v2697_v21, %s1884_s24  ;;  %v2898_v41 = vmul.f32 %v4308_v22, %v4308_v22 }
 0x14d   :  { %891 = vrot.lane.b32.xlu0 %v2695_v34, %s1884_s24 }
 0x14e   :  { %v2808_v33 = vpop.permute.xlu1 %577 }
 0x14f   :  { %v2806_v6 = vpop.permute.xlu0 %571  ;;  %4291 = vst [vmem:[#allocation109_spill] sm:$0xff] %v2808_v33 }
 0x150   :  { %4290 = vst [vmem:[#allocation108_spill] sm:$0xff] %v2806_v6  ;;  %901 = vrot.lane.b32.xlu1 %v2663_v46, %s1885_s25 }
 0x151   :  { %895 = vrot.lane.b32.xlu0 %v2708_v29, %s1884_s24 }
 0x152   :  { %v2816_v55 = vpop.permute.xlu1 %581 }
 0x153   :  { %v2814_v20 = vpop.permute.xlu0 %575  ;;  %4293 = vst [vmem:[#allocation111_spill] sm:$0xff] %v2816_v55 }
 0x154   :  { %4292 = vst [vmem:[#allocation110_spill] sm:$0xff] %v2814_v20  ;;  %905 = vrot.lane.b32.xlu1 %v2679_v5, %s1885_s25 }
 0x155   :  { %899 = vrot.lane.b32.xlu0 %v2677_v51, %s1885_s25 }
 0x156   :  { %v2824_v6 = vpop.permute.xlu1 %603 }
 0x157   :  { %v2822_v49 = vpop.permute.xlu0 %579  ;;  %4295 = vst [vmem:[#allocation113_spill] sm:$0xff] %v2824_v6 }
 0x158   :  { %4294 = vst [vmem:[#allocation112_spill] sm:$0xff] %v2822_v49  ;;  %909 = vrot.lane.b32.xlu1 %v2697_v21, %s1885_s25 }
 0x159   :  { %903 = vrot.lane.b32.xlu0 %v2695_v34, %s1885_s25 }
 0x15a   :  { %v2832_v20 = vpop.permute.xlu1 %607 }
 0x15b   :  { %v2830_v33 = vpop.permute.xlu0 %601  ;;  %4297 = vst [vmem:[#allocation115_spill] sm:$0xff] %v2832_v20 }
 0x15c   :  { %4296 = vst [vmem:[#allocation114_spill] sm:$0xff] %v2830_v33  ;;  %931 = vrot.lane.b32.xlu1 %v2663_v46, %s1886_s26 }
 0x15d   :  { %907 = vrot.lane.b32.xlu0 %v2708_v29, %s1885_s25 }
 0x15e   :  { %v2840_v49 = vpop.permute.xlu1 %611 }
 0x15f   :  { %v2838_v55 = vpop.permute.xlu0 %605  ;;  %4299 = vst [vmem:[#allocation117_spill] sm:$0xff] %v2840_v49  ;;  %v1014_v49 = vmul.f32 %v2160_v9, %v2160_v9 }
 0x160   :  { %4298 = vst [vmem:[#allocation116_spill] sm:$0xff] %v2838_v55  ;;  %935 = vrot.lane.b32.xlu1 %v2679_v5, %s1886_s26 }
 0x161   :  { %929 = vrot.lane.b32.xlu0 %v2677_v51, %s1886_s26 }
 0x162   :  { %v2848_v33 = vpop.permute.xlu1 %615 }
 0x163   :  { %v2846_v6 = vpop.permute.xlu0 %609  ;;  %4301 = vst [vmem:[#allocation119_spill] sm:$0xff] %v2848_v33  ;;  %v2868_v33 = vmul.f32 %v2175_v14, %v2175_v14  ;;  %v2888_v14 = vmul.f32 %v2193_v23, %v2193_v23  ;;  %v4309_v23 = vld [vmem:[#allocation8_spill] sm:$0xff] }
 0x164   :  { %4300 = vst [vmem:[#allocation118_spill] sm:$0xff] %v2846_v6  ;;  %939 = vrot.lane.b32.xlu1 %v2697_v21, %s1886_s26  ;;  %v2864_v6 = vmul.f32 %v2170_v13, %v2170_v13  ;;  %v1026_v4 = vmul.f32 %v4309_v23, %v4309_v23  ;;  %v2923_v23 = vmul.f32 %v2237_v35, %v2237_v35  ;;  %v4313_v35 = vld [vmem:[#allocation10_spill] sm:$0xff] }
 0x165   :  { %933 = vrot.lane.b32.xlu0 %v2695_v34, %s1886_s26  ;;  %v1030_v13 = vadd.f32 %v2868_v33, %v1014_v49  ;;  %v1060_v43 = vadd.f32 %v2888_v14, %v1016_v10  ;;  %v1041_v22 = vadd.f32 %v2888_v14, %v1014_v49  ;;  %v4312_v49 = vld [vmem:[#allocation9_spill] sm:$0xff] }
 0x166   :  { %v2856_v55 = vpop.permute.xlu1 %619  ;;  %v1032_v16 = vadd.f32 %v1026_v4, %v1016_v10  ;;  %v1080_v0 = vadd.f32 %v2864_v6, %v1019_v2  ;;  %v1061_v54 = vadd.f32 %v2864_v6, %v2898_v41 }
 0x167   :  { %v2854_v20 = vpop.permute.xlu0 %613  ;;  %4303 = vst [vmem:[#allocation121_spill] sm:$0xff] %v2856_v55  ;;  %v1036_v11 = vmul.f32 0.0010283801, %v1030_v13 }
 0x168   :  { %4302 = vst [vmem:[#allocation120_spill] sm:$0xff] %v2854_v20  ;;  %943 = vrot.lane.b32.xlu1 %v2663_v46, %s1887_s27  ;;  %v1042_v20 = vadd.f32 %v2864_v6, %v1015_v50  ;;  %v1038_v47 = vmul.f32 0.0010283801, %v1032_v16 }
 0x169   :  { %937 = vrot.lane.b32.xlu0 %v2708_v29, %s1886_s26 }
 0x16a   :  { %v2876_v9 = vpop.permute.xlu1 %623  ;;  %v1048_v57 = vmul.f32 0.007598758, %v1042_v20 }
 0x16b   :  { %v2874_v55 = vpop.permute.xlu0 %617  ;;  %4305 = vst [vmem:[#allocation123_spill] sm:$0xff] %v2876_v9  ;;  %v1013_v9 = vmul.f32 %v2198_v24, %v2198_v24  ;;  %v2913_v24 = vmul.f32 %v2228_v32, %v2228_v32  ;;  %v1044_v32 = vadd.f32 %v2903_v56, %v2898_v41 }
 0x16c   :  { %4304 = vst [vmem:[#allocation122_spill] sm:$0xff] %v2874_v55  ;;  %947 = vrot.lane.b32.xlu1 %v2679_v5, %s1887_s27 }
 0x16d   :  { %941 = vrot.lane.b32.xlu0 %v2677_v51, %s1887_s27  ;;  %v1029_v20 = vadd.f32 %v2864_v6, %v1013_v9  ;;  %v1078_v53 = vadd.f32 %v2913_v24, %v2898_v41  ;;  %v1027_v9 = vmul.f32 %v4312_v49, %v4312_v49  ;;  %v1050_v31 = vmul.f32 0.007598758, %v1044_v32 }
 0x16e   :  { %v2894_v15 = vpop.permute.xlu1 %645 }
 0x16f   :  { %v2892_v55 = vpop.permute.xlu0 %621  ;;  %4307 = vst [vmem:[#allocation125_spill] sm:$0xff] %v2894_v15  ;;  %v1066_v15 = vmul.f32 0.036000773, %v1060_v43  ;;  %v2939_v43 = vmul.f32 %v2246_v36, %v2246_v36  ;;  %v1084_v49 = vmul.f32 0.10936069, %v1078_v53  ;;  %v1031_v36 = vadd.f32 %v2903_v56, %v1015_v50 }
 0x170   :  { %4306 = vst [vmem:[#allocation124_spill] sm:$0xff] %v2892_v55  ;;  %951 = vrot.lane.b32.xlu1 %v2697_v21, %s1887_s27  ;;  %v1054_v55 = vadd.f32 %v1048_v57, %v1036_v11  ;;  %v1028_v57 = vmul.f32 %v4313_v35, %v4313_v35  ;;  %v1035_v11 = vmul.f32 0.0010283801, %v1029_v20  ;;  %v1062_v35 = vadd.f32 %v2868_v33, %v2923_v23 }
 0x171   :  { %945 = vrot.lane.b32.xlu0 %v2695_v34, %s1887_s27  ;;  %v1043_v20 = vadd.f32 %v2868_v33, %v1016_v10  ;;  %v1046_v52 = vadd.f32 %v1027_v9, %v1019_v2  ;;  %v1096_v53 = vadd.f32 %v2939_v43, %v2923_v23  ;;  %v1077_v16 = vadd.f32 %v2939_v43, %v1016_v10 }
 0x172   :  { %v2919_v26 = vpop.permute.xlu1 %649  ;;  %v1072_v39 = vadd.f32 %v1066_v15, %v1054_v55  ;;  %v1037_v60 = vmul.f32 0.0010283801, %v1031_v36  ;;  %v1064_v7 = vadd.f32 %v1026_v4, %v2939_v43 }
 0x173   :  { %v2917_v13 = vpop.permute.xlu0 %643  ;;  %4311 = vst [vmem:[#allocation8_spill] sm:$0xff] %v2919_v26  ;;  %v1047_v26 = vmul.f32 0.007598758, %v1041_v22  ;;  %v1034_v22 = vadd.f32 %v1028_v57, %v2923_v23  ;;  %v1056_v57 = vadd.f32 %v1050_v31, %v1038_v47  ;;  %v1049_v61 = vmul.f32 0.007598758, %v1043_v20 }
 0x174   :  { %4310 = vst [vmem:[#allocation7_spill] sm:$0xff] %v2917_v13  ;;  %973 = vrot.lane.b32.xlu1 %v2663_v46, %s1888_s5  ;;  %v1059_v13 = vadd.f32 %v2913_v24, %v1015_v50  ;;  %v1095_v31 = vadd.f32 %v1019_v2, %v2898_v41  ;;  %v1086_v20 = vmul.f32 0.10936069, %v1080_v0 }
 0x175   :  { %949 = vrot.lane.b32.xlu0 %v2708_v29, %s1887_s27  ;;  %v1053_v55 = vadd.f32 %v1047_v26, %v1035_v11  ;;  %v1040_v10 = vmul.f32 0.0010283801, %v1034_v22  ;;  %v1045_v26 = vadd.f32 %v1026_v4, %v2923_v23  ;;  %v1102_v11 = vmul.f32 0.21300554, %v1096_v53 }
 0x176   :  { %v2944_v12 = vpop.permute.xlu1 %653  ;;  %v1065_v15 = vmul.f32 0.036000773, %v1059_v13  ;;  %v1052_v13 = vmul.f32 0.007598758, %v1046_v52  ;;  %v1079_v22 = vadd.f32 %v2888_v14, %v2923_v23  ;;  %v1055_v52 = vadd.f32 %v1049_v61, %v1037_v60 }
 0x177   :  { %v2942_v1 = vpop.permute.xlu0 %647  ;;  %4315 = vst [vmem:[#allocation10_spill] sm:$0xff] %v2944_v12  ;;  %v1090_v12 = vadd.f32 %v1084_v49, %v1072_v39  ;;  %v1033_v39 = vadd.f32 %v1027_v9, %v2898_v41  ;;  %v1070_v4 = vmul.f32 0.036000773, %v1064_v7  ;;  %v1082_v53 = vadd.f32 %v2903_v56, %v2913_v24 }
 0x178   :  { %4314 = vst [vmem:[#allocation9_spill] sm:$0xff] %v2942_v1  ;;  %977 = vrot.lane.b32.xlu1 %v2679_v5, %s1888_s5  ;;  %v1068_v1 = vmul.f32 0.036000773, %v1062_v35  ;;  %v1071_v49 = vadd.f32 %v1065_v15, %v1053_v55  ;;  %v1083_v35 = vmul.f32 0.10936069, %v1077_v16  ;;  %v1058_v0 = vadd.f32 %v1052_v13, %v1040_v10 }
 0x179   :  { %971 = vrot.lane.b32.xlu0 %v2677_v51, %s1888_s5  ;;  %v1039_v41 = vmul.f32 0.0010283801, %v1033_v39  ;;  %v1051_v55 = vmul.f32 0.007598758, %v1045_v26  ;;  %v1108_v15 = vadd.f32 %v1102_v11, %v1090_v12  ;;  %v1114_v16 = vmul.f32 0.26601171, %v1019_v2 }
 0x17a   :  { %v2962_v50 = vpop.permute.xlu1 %657  ;;  %v1074_v9 = vadd.f32 %v1068_v1, %v1056_v57  ;;  %v1089_v60 = vadd.f32 %v1083_v35, %v1071_v49  ;;  %v1085_v57 = vmul.f32 0.10936069, %v1079_v22  ;;  %v1100_v10 = vadd.f32 %v2868_v33, %v2888_v14 }
 0x17b   :  { %v2960_v32 = vpop.permute.xlu0 %651  ;;  %4317 = vst [vmem:[#allocation127_spill] sm:$0xff] %v2962_v50  ;;  %v1067_v50 = vmul.f32 0.036000773, %v1061_v54  ;;  %v1063_v54 = vadd.f32 %v2903_v56, %v1019_v2  ;;  %v1076_v56 = vadd.f32 %v1070_v4, %v1058_v0  ;;  %v1057_v12 = vadd.f32 %v1051_v55, %v1039_v41 }
 0x17c   :  { %4316 = vst [vmem:[#allocation126_spill] sm:$0xff] %v2960_v32  ;;  %981 = vrot.lane.b32.xlu1 %v2697_v21, %s1888_s5  ;;  %v1098_v32 = vadd.f32 %v2888_v14, %v2939_v43  ;;  %v1092_v27 = vadd.f32 %v1086_v20, %v1074_v9  ;;  %v1113_v11 = vmul.f32 0.26601171, %v2923_v23  ;;  %v1116_v49 = vmul.f32 0.26601171, %v2913_v24 }
 0x17d   :  { %975 = vrot.lane.b32.xlu0 %v2695_v34, %s1888_s5  ;;  %v1073_v30 = vadd.f32 %v1067_v50, %v1055_v52  ;;  %v1069_v13 = vmul.f32 0.036000773, %v1063_v54  ;;  %v3007_v50 = vadd.f32 %v1114_v16, %v1108_v15  ;;  %v1106_v22 = vmul.f32 0.21300554, %v1100_v10 }
 0x17e   :  { %v2977_v36 = vpop.permute.xlu1 %661  ;;  %v1104_v61 = vmul.f32 0.21300554, %v1098_v32  ;;  %v1081_v32 = vadd.f32 %v2868_v33, %v2939_v43  ;;  %v1117_v16 = vmul.f32 0.26601171, %v2888_v14 }
 0x17f   :  { %v2975_v47 = vpop.permute.xlu0 %655  ;;  %4319 = vst [vmem:[#allocation129_spill] sm:$0xff] %v2977_v36  ;;  %v1101_v36 = vmul.f32 0.21300554, %v1095_v31  ;;  %v1091_v31 = vadd.f32 %v1085_v57, %v1073_v30  ;;  %v1075_v9 = vadd.f32 %v1069_v13, %v1057_v12 }
 0x180   :  { %4318 = vst [vmem:[#allocation128_spill] sm:$0xff] %v2975_v47  ;;  %985 = vrot.lane.b32.xlu1 %v2663_v46, %s1889_s14  ;;  %v1097_v47 = vadd.f32 %v2913_v24, %v1019_v2  ;;  %v1088_v46 = vmul.f32 0.10936069, %v1082_v53  ;;  %v1110_v35 = vadd.f32 %v1104_v61, %v1092_v27  ;;  %v1087_v52 = vmul.f32 0.10936069, %v1081_v32 }
 0x181   :  { %979 = vrot.lane.b32.xlu0 %v2708_v29, %s1888_s5  ;;  %v1107_v26 = vadd.f32 %v1101_v36, %v1089_v60  ;;  %v1099_v36 = vadd.f32 %v2864_v6, %v2913_v24  ;;  %v1118_v53 = vmul.f32 0.26601171, %v2864_v6 }
 0x182   :  { %v2992_v7 = vpop.permute.xlu1 %665  ;;  %v1103_v20 = vmul.f32 0.21300554, %v1097_v47  ;;  %v1094_v33 = vadd.f32 %v1088_v46, %v1076_v56  ;;  %v3023_v30 = vadd.f32 %v1116_v49, %v1110_v35  ;;  %v1115_v47 = vmul.f32 0.26601171, %v2939_v43 }
 0x183   :  { %v2990_v1 = vpop.permute.xlu0 %659  ;;  %4321 = vst [vmem:[#allocation131_spill] sm:$0xff] %v2992_v7  ;;  %v3021_v27 = vadd.f32 %v1113_v11, %v1107_v26  ;;  %v1093_v0 = vadd.f32 %v1087_v52, %v1075_v9  ;;  %v1105_v41 = vmul.f32 0.21300554, %v1099_v36 }
 0x184   :  { %4320 = vst [vmem:[#allocation130_spill] sm:$0xff] %v2990_v1  ;;  %989 = vrot.lane.b32.xlu1 %v2679_v5, %s1889_s14  ;;  %v1109_v46 = vadd.f32 %v1103_v20, %v1091_v31  ;;  %v1112_v24 = vadd.f32 %v1106_v22, %v1094_v33 }
 0x185   :  { %983 = vrot.lane.b32.xlu0 %v2677_v51, %s1889_s14  ;;  %v1111_v15 = vadd.f32 %v1105_v41, %v1093_v0 }
 0x186   :  { %v3005_v2 = vpop.permute.xlu1 %805  ;;  %v3039_v6 = vadd.f32 %v1115_v47, %v1109_v46  ;;  %v3041_v43 = vadd.f32 %v1118_v53, %v1112_v24 }
 0x187   :  { %v3003_v39 = vpop.permute.xlu0 %663  ;;  %4323 = vst [vmem:[#allocation133_spill] sm:$0xff] %v3005_v2  ;;  %v3052_v57 = vadd.f32 %v1117_v16, %v1111_v15 }
 0x188   :  { %4322 = vst [vmem:[#allocation132_spill] sm:$0xff] %v3003_v39  ;;  %993 = vrot.lane.b32.xlu1 %v2697_v21, %s1889_s14 }
 0x189   :  { %987 = vrot.lane.b32.xlu0 %v2695_v34, %s1889_s14 }
 0x18a   :  { %v3019_v23 = vpop.permute.xlu1 %809 }
 0x18b   :  { %v3017_v4 = vpop.permute.xlu0 %803  ;;  %4325 = vst [vmem:[#allocation135_spill] sm:$0xff] %v3019_v23 }
 0x18c   :  { %4324 = vst [vmem:[#allocation134_spill] sm:$0xff] %v3017_v4  ;;  %1133 = vrot.lane.b32.xlu1 %v3007_v50, %s1880_s20 }
 0x18d   :  { %991 = vrot.lane.b32.xlu0 %v2708_v29, %s1889_s14 }
 0x18e   :  { %v3033_v54 = vpop.permute.xlu1 %813 }
 0x18f   :  { %v3031_v55 = vpop.permute.xlu0 %807  ;;  %4327 = vst [vmem:[#allocation137_spill] sm:$0xff] %v3033_v54 }
 0x190   :  { %4326 = vst [vmem:[#allocation136_spill] sm:$0xff] %v3031_v55  ;;  %1137 = vrot.lane.b32.xlu1 %v3023_v30, %s1880_s20 }
 0x191   :  { %1131 = vrot.lane.b32.xlu0 %v3021_v27, %s1880_s20 }
 0x192   :  { %v3046_v61 = vpop.permute.xlu1 %817 }
 0x193   :  { %v3044_v60 = vpop.permute.xlu0 %811  ;;  %4329 = vst [vmem:[#allocation139_spill] sm:$0xff] %v3046_v61 }
 0x194   :  { %4328 = vst [vmem:[#allocation138_spill] sm:$0xff] %v3044_v60  ;;  %1141 = vrot.lane.b32.xlu1 %v3041_v43, %s1880_s20  ;;  %v1835_v60 = vld [vmem:[%s4163_s1 + $0x2] sm:$0x1] }
 0x195   :  { %1135 = vrot.lane.b32.xlu0 %v3039_v6, %s1880_s20 }
 0x196   :  { %v3056_v56 = vpop.permute.xlu1 %821 }
 0x197   :  { %v3054_v10 = vpop.permute.xlu0 %815  ;;  %4331 = vst [vmem:[#allocation141_spill] sm:$0xff] %v3056_v56  ;;  %v1838_v56 = vld [vmem:[%s4164_s2 + $0xa] sm:$0x1] }
 0x198   :  { %4330 = vst [vmem:[#allocation140_spill] sm:$0xff] %v3054_v10  ;;  %1145 = vrot.lane.b32.xlu1 %v3007_v50, %s1881_s21 }
 0x199   :  { %1139 = vrot.lane.b32.xlu0 %v3052_v57, %s1880_s20 }
 0x19a   :  { %v3064_v12 = vpop.permute.xlu1 %825 }
 0x19b   :  { %v3062_v14 = vpop.permute.xlu0 %819  ;;  %4333 = vst [vmem:[#allocation143_spill] sm:$0xff] %v3064_v12  ;;  %v1836_v12 = vld [vmem:[%s4164_s2 + $0x2] sm:$0x1] }
 0x19c   :  { %4332 = vst [vmem:[#allocation142_spill] sm:$0xff] %v3062_v14  ;;  %1149 = vrot.lane.b32.xlu1 %v3023_v30, %s1881_s21  ;;  %v3214_v54 = vmul.f32 %v1836_v12, %v1835_v60  ;;  %v1847_v14 = vld [vmem:[%s4163_s1 + $0x4] sm:$0x1] }
 0x19d   :  { %1143 = vrot.lane.b32.xlu0 %v3021_v27, %s1881_s21 }
 0x19e   :  { %v3072_v32 = vpop.permute.xlu1 %847 }
 0x19f   :  { %v3070_v13 = vpop.permute.xlu0 %823  ;;  %4335 = vst [vmem:[#allocation145_spill] sm:$0xff] %v3072_v32 }
 0x1a0   :  { %4334 = vst [vmem:[#allocation144_spill] sm:$0xff] %v3070_v13  ;;  %1153 = vrot.lane.b32.xlu1 %v3041_v43, %s1881_s21 }
 0x1a1   :  { %1147 = vrot.lane.b32.xlu0 %v3039_v6, %s1881_s21 }
 0x1a2   :  { %v3080_v11 = vpop.permute.xlu1 %851 }
 0x1a3   :  { %v3078_v26 = vpop.permute.xlu0 %845  ;;  %4337 = vst [vmem:[#allocation147_spill] sm:$0xff] %v3080_v11 }
 0x1a4   :  { %4336 = vst [vmem:[#allocation146_spill] sm:$0xff] %v3078_v26  ;;  %1175 = vrot.lane.b32.xlu1 %v3007_v50, %s1882_s22 }
 0x1a5   :  { %1151 = vrot.lane.b32.xlu0 %v3052_v57, %s1881_s21 }
 0x1a6   :  { %v3088_v35 = vpop.permute.xlu1 %855 }
 0x1a7   :  { %v3086_v49 = vpop.permute.xlu0 %849  ;;  %4339 = vst [vmem:[#allocation149_spill] sm:$0xff] %v3088_v35 }
 0x1a8   :  { %4338 = vst [vmem:[#allocation148_spill] sm:$0xff] %v3086_v49  ;;  %1179 = vrot.lane.b32.xlu1 %v3023_v30, %s1882_s22 }
 0x1a9   :  { %1173 = vrot.lane.b32.xlu0 %v3021_v27, %s1882_s22 }
 0x1aa   :  { %v3096_v20 = vpop.permute.xlu1 %859 }
 0x1ab   :  { %v3094_v31 = vpop.permute.xlu0 %853  ;;  %4341 = vst [vmem:[#allocation151_spill] sm:$0xff] %v3096_v20 }
 0x1ac   :  { %4340 = vst [vmem:[#allocation150_spill] sm:$0xff] %v3094_v31  ;;  %1183 = vrot.lane.b32.xlu1 %v3041_v43, %s1882_s22 }
 0x1ad   :  { %1177 = vrot.lane.b32.xlu0 %v3039_v6, %s1882_s22 }
 0x1ae   :  { %v3104_v33 = vpop.permute.xlu1 %863 }
 0x1af   :  { %v3102_v22 = vpop.permute.xlu0 %857  ;;  %4343 = vst [vmem:[#allocation153_spill] sm:$0xff] %v3104_v33 }
 0x1b0   :  { %4342 = vst [vmem:[#allocation152_spill] sm:$0xff] %v3102_v22  ;;  %1187 = vrot.lane.b32.xlu1 %v3007_v50, %s1883_s23 }
 0x1b1   :  { %1181 = vrot.lane.b32.xlu0 %v3052_v57, %s1882_s22 }
 0x1b2   :  { %v3112_v52 = vpop.permute.xlu1 %867 }
 0x1b3   :  { %v3110_v9 = vpop.permute.xlu0 %861  ;;  %4345 = vst [vmem:[#allocation155_spill] sm:$0xff] %v3112_v52 }
 0x1b4   :  { %4344 = vst [vmem:[#allocation154_spill] sm:$0xff] %v3110_v9  ;;  %1191 = vrot.lane.b32.xlu1 %v3023_v30, %s1883_s23 }
 0x1b5   :  { %1185 = vrot.lane.b32.xlu0 %v3021_v27, %s1883_s23 }
 0x1b6   :  { %v3120_v47 = vpop.permute.xlu1 %889 }
 0x1b7   :  { %v3118_v36 = vpop.permute.xlu0 %865  ;;  %4347 = vst [vmem:[#allocation157_spill] sm:$0xff] %v3120_v47 }
 0x1b8   :  { %4346 = vst [vmem:[#allocation156_spill] sm:$0xff] %v3118_v36  ;;  %1195 = vrot.lane.b32.xlu1 %v3041_v43, %s1883_s23 }
 0x1b9   :  { %1189 = vrot.lane.b32.xlu0 %v3039_v6, %s1883_s23 }
 0x1ba   :  { %v3128_v46 = vpop.permute.xlu1 %893 }
 0x1bb   :  { %v3126_v53 = vpop.permute.xlu0 %887  ;;  %4349 = vst [vmem:[#allocation159_spill] sm:$0xff] %v3128_v46 }
 0x1bc   :  { %4348 = vst [vmem:[#allocation158_spill] sm:$0xff] %v3126_v53  ;;  %1217 = vrot.lane.b32.xlu1 %v3007_v50, %s1884_s24  ;;  %v1861_v53 = vld [vmem:[%s4163_s1 + $0x7] sm:$0x1] }
 0x1bd   :  { %1193 = vrot.lane.b32.xlu0 %v3052_v57, %s1883_s23 }
 0x1be   :  { %v3136_v0 = vpop.permute.xlu1 %897 }
 0x1bf   :  { %v3134_v24 = vpop.permute.xlu0 %891  ;;  %4351 = vst [vmem:[#allocation161_spill] sm:$0xff] %v3136_v0 }
 0x1c0   :  { %4350 = vst [vmem:[#allocation160_spill] sm:$0xff] %v3134_v24  ;;  %1221 = vrot.lane.b32.xlu1 %v3023_v30, %s1884_s24  ;;  %v1846_v24 = vld [vmem:[%s4164_s2] sm:$0x1] }
 0x1c1   :  { %1215 = vrot.lane.b32.xlu0 %v3021_v27, %s1884_s24 }
 0x1c2   :  { %v3144_v15 = vpop.permute.xlu1 %901 }
 0x1c3   :  { %v3142_v41 = vpop.permute.xlu0 %895  ;;  %4353 = vst [vmem:[#allocation163_spill] sm:$0xff] %v3144_v15 }
 0x1c4   :  { %4352 = vst [vmem:[#allocation162_spill] sm:$0xff] %v3142_v41  ;;  %1225 = vrot.lane.b32.xlu1 %v3041_v43, %s1884_s24 }
 0x1c5   :  { %1219 = vrot.lane.b32.xlu0 %v3039_v6, %s1884_s24 }
 0x1c6   :  { %v3152_v36 = vpop.permute.xlu1 %905 }
 0x1c7   :  { %v3150_v16 = vpop.permute.xlu0 %899  ;;  %4355 = vst [vmem:[#allocation165_spill] sm:$0xff] %v3152_v36 }
 0x1c8   :  { %4354 = vst [vmem:[#allocation164_spill] sm:$0xff] %v3150_v16  ;;  %1229 = vrot.lane.b32.xlu1 %v3007_v50, %s1885_s25 }
 0x1c9   :  { %1223 = vrot.lane.b32.xlu0 %v3052_v57, %s1884_s24 }
 0x1ca   :  { %v3160_v41 = vpop.permute.xlu1 %909 }
 0x1cb   :  { %v3158_v0 = vpop.permute.xlu0 %903  ;;  %4357 = vst [vmem:[#allocation167_spill] sm:$0xff] %v3160_v41 }
 0x1cc   :  { %4356 = vst [vmem:[#allocation166_spill] sm:$0xff] %v3158_v0  ;;  %1233 = vrot.lane.b32.xlu1 %v3023_v30, %s1885_s25 }
 0x1cd   :  { %1227 = vrot.lane.b32.xlu0 %v3021_v27, %s1885_s25 }
 0x1ce   :  { %v3168_v46 = vpop.permute.xlu1 %931 }
 0x1cf   :  { %v3166_v31 = vpop.permute.xlu0 %907  ;;  %4359 = vst [vmem:[#allocation169_spill] sm:$0xff] %v3168_v46 }
 0x1d0   :  { %4358 = vst [vmem:[#allocation168_spill] sm:$0xff] %v3166_v31  ;;  %1237 = vrot.lane.b32.xlu1 %v3041_v43, %s1885_s25 }
 0x1d1   :  { %1231 = vrot.lane.b32.xlu0 %v3039_v6, %s1885_s25 }
 0x1d2   :  { %v3176_v52 = vpop.permute.xlu1 %935 }
 0x1d3   :  { %v3174_v36 = vpop.permute.xlu0 %929  ;;  %4361 = vst [vmem:[#allocation171_spill] sm:$0xff] %v3176_v52 }
 0x1d4   :  { %4360 = vst [vmem:[#allocation170_spill] sm:$0xff] %v3174_v36  ;;  %1259 = vrot.lane.b32.xlu1 %v3007_v50, %s1886_s26  ;;  %v1855_v36 = vld [vmem:[%s4163_s1 + $0x5] sm:$0x1] }
 0x1d5   :  { %1235 = vrot.lane.b32.xlu0 %v3052_v57, %s1885_s25 }
 0x1d6   :  { %v3184_v31 = vpop.permute.xlu1 %939 }
 0x1d7   :  { %v3182_v41 = vpop.permute.xlu0 %933  ;;  %4363 = vst [vmem:[#allocation173_spill] sm:$0xff] %v3184_v31  ;;  %v1833_v31 = vld [vmem:[%s4163_s1 + $0x1] sm:$0x1] }
 0x1d8   :  { %4362 = vst [vmem:[#allocation172_spill] sm:$0xff] %v3182_v41  ;;  %1263 = vrot.lane.b32.xlu1 %v3023_v30, %s1886_s26  ;;  %v1842_v41 = vld [vmem:[%s4164_s2 + $0x3] sm:$0x1] }
 0x1d9   :  { %1257 = vrot.lane.b32.xlu0 %v3021_v27, %s1886_s26 }
 0x1da   :  { %v3192_v33 = vpop.permute.xlu1 %943 }
 0x1db   :  { %v3190_v35 = vpop.permute.xlu0 %937  ;;  %4365 = vst [vmem:[#allocation175_spill] sm:$0xff] %v3192_v33  ;;  %v1862_v33 = vld [vmem:[%s4164_s2 + $0x7] sm:$0x1] }
 0x1dc   :  { %4364 = vst [vmem:[#allocation174_spill] sm:$0xff] %v3190_v35  ;;  %1267 = vrot.lane.b32.xlu1 %v3041_v43, %s1886_s26  ;;  %v1834_v35 = vld [vmem:[%s4164_s2 + $0x1] sm:$0x1]  ;;  %v3353_v46 = vmul.f32 %v1862_v33, %v1861_v53 }
 0x1dd   :  { %1261 = vrot.lane.b32.xlu0 %v3039_v6, %s1886_s26  ;;  %v1342_v13 = vmul.f32 %v1834_v35, %v1833_v31  ;;  %v1839_v35 = vld [vmem:[%s4163_s1 + $0xb] sm:$0x1] }
 0x1de   :  { %v3200_v11 = vpop.permute.xlu1 %947  ;;  %v1840_v31 = vld [vmem:[%s4164_s2 + $0xb] sm:$0x1] }
 0x1df   :  { %v3198_v52 = vpop.permute.xlu0 %941  ;;  %4367 = vst [vmem:[#allocation177_spill] sm:$0xff] %v3200_v11  ;;  %v1837_v11 = vld [vmem:[%s4163_s1 + $0xa] sm:$0x1]  ;;  %v3230_v60 = vmul.f32 %v1840_v31, %v1839_v35 }
 0x1e0   :  { %4366 = vst [vmem:[#allocation176_spill] sm:$0xff] %v3198_v52  ;;  %v3222_v23 = vmul.f32 %v1838_v56, %v1837_v11  ;;  %1271 = vrot.lane.b32.xlu1 %v3007_v50, %s1887_s27  ;;  %v1841_v11 = vld [vmem:[%s4163_s1 + $0x3] sm:$0x1] }
 0x1e1   :  { %1265 = vrot.lane.b32.xlu0 %v3052_v57, %s1886_s26  ;;  %v3246_v35 = vmul.f32 %v1842_v41, %v1841_v11  ;;  %v1358_v31 = vadd.f32 %v3230_v60, %v1342_v13  ;;  %v1844_v41 = vld [vmem:[%s4164_s2 + $0x9] sm:$0x1] }
 0x1e2   :  { %v3238_v56 = vpop.permute.xlu1 %951  ;;  %v1370_v0 = vadd.f32 %v3222_v23, %v3214_v54 }
 0x1e3   :  { %v3236_v12 = vpop.permute.xlu0 %945  ;;  %4369 = vst [vmem:[#allocation179_spill] sm:$0xff] %v3238_v56  ;;  %v1843_v56 = vld [vmem:[%s4163_s1 + $0x9] sm:$0x1]  ;;  %v1364_v55 = vmul.f32 0.0010283801, %v1358_v31 }
 0x1e4   :  { %4368 = vst [vmem:[#allocation178_spill] sm:$0xff] %v3236_v12  ;;  %1275 = vrot.lane.b32.xlu1 %v3023_v30, %s1887_s27  ;;  %v3261_v11 = vmul.f32 %v1844_v41, %v1843_v56  ;;  %v1845_v12 = vld [vmem:[%s4163_s1] sm:$0x1]  ;;  %v1848_v56 = vld [vmem:[%s4164_s2 + $0x4] sm:$0x1] }
 0x1e5   :  { %1269 = vrot.lane.b32.xlu0 %v3021_v27, %s1887_s27  ;;  %v1341_v9 = vmul.f32 %v1846_v24, %v1845_v12  ;;  %v3279_v41 = vmul.f32 %v1848_v56, %v1847_v14  ;;  %v1376_v29 = vmul.f32 0.007598758, %v1370_v0  ;;  %v1849_v24 = vld [vmem:[%s4163_s1 + $0xc] sm:$0x1]  ;;  %v1851_v14 = vld [vmem:[%s4163_s1 + $0xd] sm:$0x1] }
 0x1e6   :  { %v3271_v39 = vpop.permute.xlu1 %973  ;;  %v1388_v7 = vadd.f32 %v3261_v11, %v3246_v35  ;;  %v1850_v12 = vld [vmem:[%s4164_s2 + $0xc] sm:$0x1]  ;;  %v1852_v0 = vld [vmem:[%s4164_s2 + $0xd] sm:$0x1]  ;;  %v1853_v56 = vld [vmem:[%s4163_s1 + $0x8] sm:$0x1] }
 0x1e7   :  { %v3269_v49 = vpop.permute.xlu0 %949  ;;  %4371 = vst [vmem:[#allocation181_spill] sm:$0xff] %v3271_v39  ;;  %v3297_v31 = vmul.f32 %v1852_v0, %v1851_v14  ;;  %v1357_v1 = vadd.f32 %v3222_v23, %v1341_v9  ;;  %v1369_v14 = vadd.f32 %v3261_v11, %v1342_v13  ;;  %v1856_v39 = vld [vmem:[%s4164_s2 + $0x5] sm:$0x1] }
 0x1e8   :  { %4370 = vst [vmem:[#allocation180_spill] sm:$0xff] %v3269_v49  ;;  %v3289_v49 = vmul.f32 %v1850_v12, %v1849_v24  ;;  %1279 = vrot.lane.b32.xlu1 %v3041_v43, %s1887_s27  ;;  %v1854_v24 = vld [vmem:[%s4164_s2 + $0x8] sm:$0x1]  ;;  %v3323_v16 = vmul.f32 %v1856_v39, %v1855_v36  ;;  %v1860_v36 = vld [vmem:[%s4164_s2 + $0xf] sm:$0x1] }
 0x1e9   :  { %1273 = vrot.lane.b32.xlu0 %v3039_v6, %s1887_s27  ;;  %v3309_v12 = vmul.f32 %v1854_v24, %v1853_v56  ;;  %v1382_v56 = vadd.f32 %v1376_v29, %v1364_v55  ;;  %v1394_v24 = vmul.f32 0.036000773, %v1388_v7  ;;  %v1360_v13 = vadd.f32 %v3297_v31, %v3246_v35  ;;  %v1857_v29 = vld [vmem:[%s4163_s1 + $0xe] sm:$0x1]  ;;  %v1859_v55 = vld [vmem:[%s4163_s1 + $0xf] sm:$0x1] }
 0x1ea   :  { %v3315_v52 = vpop.permute.xlu1 %977  ;;  %v1858_v7 = vld [vmem:[%s4164_s2 + $0xe] sm:$0x1] }
 0x1eb   :  { %v3313_v0 = vpop.permute.xlu0 %971  ;;  %4373 = vst [vmem:[#allocation183_spill] sm:$0xff] %v3315_v52  ;;  %v1406_v9 = vadd.f32 %v3309_v12, %v3279_v41  ;;  %v1372_v52 = vadd.f32 %v3289_v49, %v3279_v41  ;;  %v1355_v39 = vmul.f32 %v1858_v7, %v1857_v29  ;;  %v1363_v29 = vmul.f32 0.0010283801, %v1357_v1 }
 0x1ec   :  { %4372 = vst [vmem:[#allocation182_spill] sm:$0xff] %v3313_v0  ;;  %1301 = vrot.lane.b32.xlu1 %v3007_v50, %s1888_s5  ;;  %v1356_v0 = vmul.f32 %v1860_v36, %v1859_v55  ;;  %v1375_v7 = vmul.f32 0.007598758, %v1369_v14  ;;  %v1387_v22 = vadd.f32 %v3309_v12, %v3214_v54  ;;  %v1863_v55 = vld [vmem:[%s4163_s1 + $0x6] sm:$0x1]  ;;  %v1400_v33 = vadd.f32 %v1394_v24, %v1382_v56  ;;  %s3736_s1 = sld [smem:[#allocation2]] }
 0x1ed   :  { %1277 = vrot.lane.b32.xlu0 %v3052_v57, %s1887_s27  ;;  %v1864_v36 = vld [vmem:[%s4164_s2 + $0x6] sm:$0x1]  ;;  %v1412_v53 = vmul.f32 0.10936069, %v1406_v9  ;;  %v1390_v1 = vadd.f32 %v3230_v60, %v3323_v16  ;;  %v1366_v14 = vmul.f32 0.0010283801, %v1360_v13  ;;  %v1424_v9 = vadd.f32 %v3353_v46, %v3323_v16 }
 0x1ee   :  { %v3359_v15 = vpop.permute.xlu1 %981  ;;  %v1347_v47 = vmul.f32 %v1864_v36, %v1863_v55  ;;  %v1378_v10 = vmul.f32 0.007598758, %v1372_v52  ;;  %v1362_v56 = vadd.f32 %v1356_v0, %v3323_v16  ;;  %v1381_v13 = vadd.f32 %v1375_v7, %v1363_v29  ;;  %s3912_s2 = sld [smem:[#allocation2 + $0x1]] }
 0x1ef   :  { %v3357_v26 = vpop.permute.xlu0 %975  ;;  %4375 = vst [vmem:[#allocation185_spill] sm:$0xff] %v3359_v15  ;;  %v1371_v15 = vadd.f32 %v3230_v60, %v3246_v35  ;;  %v1393_v52 = vmul.f32 0.036000773, %v1387_v22  ;;  %v1418_v4 = vadd.f32 %v1412_v53, %v1400_v33  ;;  %v1396_v20 = vmul.f32 0.036000773, %v1390_v1 }
 0x1f0   :  { %4374 = vst [vmem:[#allocation184_spill] sm:$0xff] %v3357_v26  ;;  %v1359_v26 = vadd.f32 %v3289_v49, %v3214_v54  ;;  %1305 = vrot.lane.b32.xlu1 %v3023_v30, %s1888_s5  ;;  %v1374_v24 = vadd.f32 %v1355_v39, %v1347_v47  ;;  %v1405_v54 = vadd.f32 %v3353_v46, %v3246_v35  ;;  %v1368_v35 = vmul.f32 0.0010283801, %v1362_v56 }
 0x1f1   :  { %1299 = vrot.lane.b32.xlu0 %v3021_v27, %s1888_s5  ;;  %v1408_v32 = vadd.f32 %v3222_v23, %v1347_v47  ;;  %v1389_v0 = vadd.f32 %v3222_v23, %v3279_v41  ;;  %v1384_v61 = vadd.f32 %v1378_v10, %v1366_v14  ;;  %v1377_v21 = vmul.f32 0.007598758, %v1371_v15 }
 0x1f2   :  { %v3384_v36 = vpop.permute.xlu1 %985  ;;  %v1365_v2 = vmul.f32 0.0010283801, %v1359_v26  ;;  %v1392_v22 = vadd.f32 %v3297_v31, %v3353_v46  ;;  %v1380_v29 = vmul.f32 0.007598758, %v1374_v24  ;;  %v1361_v7 = vadd.f32 %v1355_v39, %v3279_v41 }
 0x1f3   :  { %v3382_v55 = vpop.permute.xlu0 %979  ;;  %4377 = vst [vmem:[#allocation187_spill] sm:$0xff] %v3384_v36  ;;  %v1373_v33 = vadd.f32 %v3297_v31, %v3323_v16  ;;  %v1430_v53 = vmul.f32 0.21300554, %v1424_v9  ;;  %v1399_v10 = vadd.f32 %v1393_v52, %v1381_v13  ;;  %v1411_v26 = vmul.f32 0.10936069, %v1405_v54 }
 0x1f4   :  { %4376 = vst [vmem:[#allocation186_spill] sm:$0xff] %v3382_v55  ;;  %1309 = vrot.lane.b32.xlu1 %v3041_v43, %s1888_s5  ;;  %v1423_v15 = vadd.f32 %v1347_v47, %v3279_v41  ;;  %v1414_v55 = vmul.f32 0.10936069, %v1408_v32  ;;  %v1426_v36 = vadd.f32 %v3261_v11, %v3353_v46  ;;  %v1395_v56 = vmul.f32 0.036000773, %v1389_v0 }
 0x1f5   :  { %1303 = vrot.lane.b32.xlu0 %v3039_v6, %s1888_s5  ;;  %v1407_v39 = vadd.f32 %v3261_v11, %v3323_v16  ;;  %v1402_v24 = vadd.f32 %v1396_v20, %v1384_v61  ;;  %v1383_v34 = vadd.f32 %v1377_v21, %v1365_v2  ;;  %v1398_v31 = vmul.f32 0.036000773, %v1392_v22 }
 0x1f6   :  { %v3401_v14 = vpop.permute.xlu1 %989  ;;  %v1410_v9 = vadd.f32 %v3289_v49, %v3309_v12  ;;  %v1386_v32 = vadd.f32 %v1380_v29, %v1368_v35  ;;  %v1367_v41 = vmul.f32 0.0010283801, %v1361_v7  ;;  %v1379_v13 = vmul.f32 0.007598758, %v1373_v33 }
 0x1f7   :  { %v3399_v1 = vpop.permute.xlu0 %983  ;;  %4379 = vst [vmem:[#allocation189_spill] sm:$0xff] %v3401_v14  ;;  %v1391_v52 = vadd.f32 %v3289_v49, %v1347_v47  ;;  %v1436_v54 = vadd.f32 %v1430_v53, %v1418_v4  ;;  %v1442_v0 = vmul.f32 0.26601171, %v1347_v47  ;;  %v1417_v14 = vadd.f32 %v1411_v26, %v1399_v10 }
 0x1f8   :  { %4378 = vst [vmem:[#allocation188_spill] sm:$0xff] %v3399_v1  ;;  %1313 = vrot.lane.b32.xlu1 %v3007_v50, %s1889_s14  ;;  %v1429_v2 = vmul.f32 0.21300554, %v1423_v15  ;;  %v1432_v20 = vmul.f32 0.21300554, %v1426_v36  ;;  %v1425_v1 = vadd.f32 %v3309_v12, %v1347_v47  ;;  %v1420_v5 = vadd.f32 %v1414_v55, %v1402_v24 }
 0x1f9   :  { %1307 = vrot.lane.b32.xlu0 %v3052_v57, %s1888_s5  ;;  %v1413_v22 = vmul.f32 0.10936069, %v1407_v39  ;;  %v1401_v51 = vadd.f32 %v1395_v56, %v1383_v34  ;;  %v1416_v62 = vmul.f32 0.10936069, %v1410_v9  ;;  %v1428_v35 = vadd.f32 %v3230_v60, %v3261_v11 }
 0x1fa   :  { %v3416_v21 = vpop.permute.xlu1 %993  ;;  %v1404_v4 = vadd.f32 %v1398_v31, %v1386_v32  ;;  %v1385_v49 = vadd.f32 %v1379_v13, %v1367_v41  ;;  %v1397_v29 = vmul.f32 0.036000773, %v1391_v52  ;;  %v1409_v36 = vadd.f32 %v3230_v60, %v3353_v46 }
 0x1fb   :  { %v3414_v61 = vpop.permute.xlu0 %987  ;;  %4381 = vst [vmem:[#allocation191_spill] sm:$0xff] %v3416_v21  ;;  %v3431_v34 = vadd.f32 %v1442_v0, %v1436_v54  ;;  %v1435_v55 = vadd.f32 %v1429_v2, %v1417_v14  ;;  %v1441_v33 = vmul.f32 0.26601171, %v3323_v16  ;;  %v1444_v53 = vmul.f32 0.26601171, %v3309_v12 }
 0x1fc   :  { %4380 = vst [vmem:[#allocation190_spill] sm:$0xff] %v3414_v61  ;;  %1317 = vrot.lane.b32.xlu1 %v3023_v30, %s1889_s14  ;;  %v1438_v10 = vadd.f32 %v1432_v20, %v1420_v5  ;;  %v1419_v26 = vadd.f32 %v1413_v22, %v1401_v51  ;;  %v1431_v15 = vmul.f32 0.21300554, %v1425_v1  ;;  %v1434_v56 = vmul.f32 0.21300554, %v1428_v35 }
 0x1fd   :  { %1311 = vrot.lane.b32.xlu0 %v3021_v27, %s1889_s14  ;;  %v1422_v60 = vadd.f32 %v1416_v62, %v1404_v4  ;;  %v1403_v39 = vadd.f32 %v1397_v29, %v1385_v49  ;;  %v1415_v24 = vmul.f32 0.10936069, %v1409_v36  ;;  %v1427_v14 = vadd.f32 %v3222_v23, %v3309_v12 }
 0x1fe   :  { %v3429_v47 = vpop.permute.xlu1 %1133  ;;  %v3445_v5 = vadd.f32 %v1441_v33, %v1435_v55  ;;  %v3447_v51 = vadd.f32 %v1444_v53, %v1438_v10  ;;  %v1437_v1 = vadd.f32 %v1431_v15, %v1419_v26  ;;  %v1443_v9 = vmul.f32 0.26601171, %v3353_v46 }
 0x1ff   :  { %v3427_v7 = vpop.permute.xlu0 %991  ;;  %v1440_v62 = vadd.f32 %v1434_v56, %v1422_v60  ;;  %v1446_v12 = vmul.f32 0.26601171, %v3222_v23  ;;  %v1421_v32 = vadd.f32 %v1415_v24, %v1403_v39  ;;  %v1433_v41 = vmul.f32 0.21300554, %v1427_v14 }
 0x200   :  { %4382 = vst [vmem:[#allocation192_spill] sm:$0xff] %v3427_v7  ;;  %1321 = vrot.lane.b32.xlu1 %v3041_v43, %s1889_s14  ;;  %4383 = vst [vmem:[#allocation193_spill] sm:$0xff] %v3447_v51  ;;  %v3461_v46 = vadd.f32 %v1443_v9, %v1437_v1  ;;  %v1445_v2 = vmul.f32 0.26601171, %v3261_v11  ;;  %v1130_v61 = vmul.f32 0.26601171, %v3041_v43 }
 0x201   :  { %1315 = vrot.lane.b32.xlu0 %v3039_v6, %s1889_s14  ;;  %v3463_v54 = vadd.f32 %v1446_v12, %v1440_v62  ;;  %v1439_v0 = vadd.f32 %v1433_v41, %v1421_v32 }
 0x202   :  { %v3443_v16 = vpop.permute.xlu1 %1137 }
 0x203   :  { %v3441_v31 = vpop.permute.xlu0 %1131  ;;  %4384 = vst [vmem:[#allocation194_spill] sm:$0xff] %v3463_v54  ;;  %v3472_v22 = vadd.f32 %v1445_v2, %v1439_v0 }
 0x204   :  { %1461 = vrot.lane.b32.xlu1 %v3431_v34, %s1880_s20 }
 0x205   :  { %1319 = vrot.lane.b32.xlu0 %v3052_v57, %s1889_s14  ;;  %4385 = vst [vmem:[#allocation195_spill] sm:$0xff] %v3472_v22 }
 0x206   :  { %v1142_v52 = vpop.permute.xlu1 %1141 }
 0x207   :  { %v3455_v13 = vpop.permute.xlu0 %1135 }
 0x208   :  { %1465 = vrot.lane.b32.xlu1 %v3447_v51, %s1880_s20 }
 0x209   :  { %1459 = vrot.lane.b32.xlu0 %v3445_v5, %s1880_s20 }
 0x20a   :  { %v3466_v23 = vpop.permute.xlu1 %1145 }
 0x20b   :  { %v1140_v20 = vpop.permute.xlu0 %1139 }
 0x20c   :  { %1469 = vrot.lane.b32.xlu1 %v3463_v54, %s1880_s20 }
 0x20d   :  { %1463 = vrot.lane.b32.xlu0 %v3461_v46, %s1880_s20 }
 0x20e   :  { %v3476_v4 = vpop.permute.xlu1 %1149 }
 0x20f   :  { %v3474_v35 = vpop.permute.xlu0 %1143 }
 0x210   :  { %1473 = vrot.lane.b32.xlu1 %v3431_v34, %s1881_s21 }
 0x211   :  { %1467 = vrot.lane.b32.xlu0 %v3472_v22, %s1880_s20 }
 0x212   :  { %v1154_v49 = vpop.permute.xlu1 %1153 }
 0x213   :  { %v3482_v11 = vpop.permute.xlu0 %1147  ;;  %v1160_v2 = vadd.f32 %v1154_v49, %v1142_v52 }
 0x214   :  { %1477 = vrot.lane.b32.xlu1 %v3447_v51, %s1881_s21 }
 0x215   :  { %1471 = vrot.lane.b32.xlu0 %v3445_v5, %s1881_s21  ;;  %v1166_v3 = vmul.f32 0.21300554, %v1160_v2 }
 0x216   :  { %v3488_v36 = vpop.permute.xlu1 %1175 }
 0x217   :  { %v1152_v29 = vpop.permute.xlu0 %1151  ;;  %v1172_v43 = vadd.f32 %v1166_v3, %v1130_v61 }
 0x218   :  { %1481 = vrot.lane.b32.xlu1 %v3463_v54, %s1881_s21  ;;  %v1159_v63 = vadd.f32 %v1152_v29, %v1140_v20 }
 0x219   :  { %1475 = vrot.lane.b32.xlu0 %v3461_v46, %s1881_s21 }
 0x21a   :  { %v3496_v33 = vpop.permute.xlu1 %1179 }
 0x21b   :  { %v3494_v55 = vpop.permute.xlu0 %1173 }
 0x21c   :  { %1503 = vrot.lane.b32.xlu1 %v3431_v34, %s1882_s22 }
 0x21d   :  { %1479 = vrot.lane.b32.xlu0 %v3472_v22, %s1881_s21 }
 0x21e   :  { %v1184_v10 = vpop.permute.xlu1 %1183 }
 0x21f   :  { %v3502_v53 = vpop.permute.xlu0 %1177 }
 0x220   :  { %1515 = vrot.lane.b32.xlu1 %v3431_v34, %s1883_s23 }
 0x221   :  { %1501 = vrot.lane.b32.xlu0 %v3445_v5, %s1882_s22 }
 0x222   :  { %v3508_v15 = vpop.permute.xlu1 %1187 }
 0x223   :  { %v1182_v26 = vpop.permute.xlu0 %1181 }
 0x224   :  { %1517 = vrot.lane.b32.xlu1 %v3461_v46, %s1883_s23 }
 0x225   :  { %1513 = vrot.lane.b32.xlu0 %v3445_v5, %s1883_s23 }
 0x226   :  { %v3516_v60 = vpop.permute.xlu1 %1191 }
 0x227   :  { %v3514_v56 = vpop.permute.xlu0 %1185 }
 0x228   :  { %1545 = vrot.lane.b32.xlu1 %v3431_v34, %s1884_s24 }
 0x229   :  { %1505 = vrot.lane.b32.xlu0 %v3461_v46, %s1882_s22 }
 0x22a   :  { %v1196_v24 = vpop.permute.xlu1 %1195 }
 0x22b   :  { %v3522_v39 = vpop.permute.xlu0 %1189  ;;  %v1202_v21 = vadd.f32 %v1196_v24, %v1184_v10 }
 0x22c   :  { %1557 = vrot.lane.b32.xlu1 %v3431_v34, %s1885_s25 }
 0x22d   :  { %1543 = vrot.lane.b32.xlu0 %v3445_v5, %s1884_s24  ;;  %v1208_v52 = vmul.f32 0.10936069, %v1202_v21 }
 0x22e   :  { %v1218_v1 = vpop.permute.xlu1 %1217 }
 0x22f   :  { %v1194_v14 = vpop.permute.xlu0 %1193 }
 0x230   :  { %1519 = vrot.lane.b32.xlu1 %v3447_v51, %s1883_s23  ;;  %v1201_v49 = vadd.f32 %v1194_v14, %v1182_v26 }
 0x231   :  { %1555 = vrot.lane.b32.xlu0 %v3445_v5, %s1885_s25 }
 0x232   :  { %v1222_v62 = vpop.permute.xlu1 %1221 }
 0x233   :  { %v1216_v9 = vpop.permute.xlu0 %1215 }
 0x234   :  { %1559 = vrot.lane.b32.xlu1 %v3461_v46, %s1885_s25 }
 0x235   :  { %1507 = vrot.lane.b32.xlu0 %v3447_v51, %s1882_s22 }
 0x236   :  { %v1226_v32 = vpop.permute.xlu1 %1225 }
 0x237   :  { %v1220_v12 = vpop.permute.xlu0 %1219 }
 0x238   :  { %1587 = vrot.lane.b32.xlu1 %v3431_v34, %s1886_s26 }
 0x239   :  { %1547 = vrot.lane.b32.xlu0 %v3461_v46, %s1884_s24 }
 0x23a   :  { %v1230_v0 = vpop.permute.xlu1 %1229 }
 0x23b   :  { %v1224_v41 = vpop.permute.xlu0 %1223  ;;  %v1240_v7 = vadd.f32 %v1230_v0, %v1218_v1  ;;  %v1129_v1 = vmul.f32 0.26601171, %v3052_v57  ;;  %v1165_v0 = vmul.f32 0.21300554, %v1159_v63  ;;  %v1156_v63 = vadd.f32 %v3466_v23, %v3429_v47 }
 0x23c   :  { %1599 = vrot.lane.b32.xlu1 %v3431_v34, %s1887_s27  ;;  %v1126_v47 = vmul.f32 0.26601171, %v3007_v50 }
 0x23d   :  { %1585 = vrot.lane.b32.xlu0 %v3445_v5, %s1886_s26  ;;  %v1171_v14 = vadd.f32 %v1165_v0, %v1129_v1  ;;  %v1162_v23 = vmul.f32 0.21300554, %v1156_v63 }
 0x23e   :  { %v1234_v44 = vpop.permute.xlu1 %1233 }
 0x23f   :  { %v1228_v8 = vpop.permute.xlu0 %1227  ;;  %v3545_v58 = vadd.f32 %v1234_v44, %v1222_v62  ;;  %v1214_v44 = vadd.f32 %v1208_v52, %v1172_v43  ;;  %v1158_v52 = vadd.f32 %v3476_v4, %v3443_v16  ;;  %v1168_v50 = vadd.f32 %v1162_v23, %v1126_v47 }
 0x240   :  { %v1239_v38 = vadd.f32 %v1228_v8, %v1216_v9  ;;  %1521 = vrot.lane.b32.xlu1 %v3472_v22, %s1883_s23  ;;  %v1207_v8 = vmul.f32 0.10936069, %v1201_v49  ;;  %v1128_v16 = vmul.f32 0.26601171, %v3023_v30 }
 0x241   :  { %1597 = vrot.lane.b32.xlu0 %v3445_v5, %s1887_s27  ;;  %v1164_v4 = vmul.f32 0.21300554, %v1158_v52 }
 0x242   :  { %v1238_v24 = vpop.permute.xlu1 %1237  ;;  %v1213_v3 = vadd.f32 %v1207_v8, %v1171_v14  ;;  %v1245_v8 = vmul.f32 0.036000773, %v1239_v38 }
 0x243   :  { %v1232_v10 = vpop.permute.xlu0 %1231  ;;  %v1244_v20 = vadd.f32 %v1238_v24, %v1226_v32  ;;  %v1198_v32 = vadd.f32 %v3508_v15, %v3488_v36  ;;  %v1197_v36 = vadd.f32 %v3514_v56, %v3494_v55  ;;  %v1157_v24 = vadd.f32 %v3482_v11, %v3455_v13 }
 0x244   :  { %v3552_v48 = vadd.f32 %v1232_v10, %v1220_v12  ;;  %1561 = vrot.lane.b32.xlu1 %v3447_v51, %s1885_s25  ;;  %v1246_v55 = vmul.f32 0.036000773, %v1240_v7  ;;  %v1170_v30 = vadd.f32 %v1164_v4, %v1128_v16 }
 0x245   :  { %1509 = vrot.lane.b32.xlu0 %v3472_v22, %s1882_s22  ;;  %v1250_v29 = vmul.f32 0.036000773, %v1244_v20  ;;  %v1204_v1 = vmul.f32 0.10936069, %v1198_v32  ;;  %v1203_v56 = vmul.f32 0.10936069, %v1197_v36 }
 0x246   :  { %v1260_v26 = vpop.permute.xlu1 %1259  ;;  %v1127_v20 = vmul.f32 0.26601171, %v3039_v6 }
 0x247   :  { %v1236_v21 = vpop.permute.xlu0 %1235  ;;  %v3558_v57 = vadd.f32 %v1250_v29, %v1214_v44  ;;  %v1210_v43 = vadd.f32 %v1204_v1, %v1168_v50  ;;  %v1163_v44 = vmul.f32 0.21300554, %v1157_v24 }
 0x248   :  { %v1243_v9 = vadd.f32 %v1236_v21, %v1224_v41  ;;  %1601 = vrot.lane.b32.xlu1 %v3461_v46, %s1887_s27  ;;  %v1155_v41 = vadd.f32 %v3474_v35, %v3441_v31  ;;  %v1200_v31 = vadd.f32 %v3516_v60, %v3496_v33  ;;  %v1125_v35 = vmul.f32 0.26601171, %v3021_v27 }
 0x249   :  { %1549 = vrot.lane.b32.xlu0 %v3447_v51, %s1884_s24  ;;  %v1199_v33 = vadd.f32 %v3522_v39, %v3502_v53  ;;  %v1252_v7 = vadd.f32 %v1246_v55, %v1210_v43  ;;  %v1248_v53 = vmul.f32 0.036000773, %v3545_v58  ;;  %v1169_v38 = vadd.f32 %v1163_v44, %v1127_v20 }
 0x24a   :  { %v1249_v61 = vmul.f32 0.036000773, %v1243_v9  ;;  %v1264_v12 = vpop.permute.xlu1 %1263  ;;  %v1161_v10 = vmul.f32 0.21300554, %v1155_v41  ;;  %v1206_v0 = vmul.f32 0.10936069, %v1200_v31 }
 0x24b   :  { %v1258_v62 = vpop.permute.xlu0 %1257  ;;  %v1205_v21 = vmul.f32 0.10936069, %v1199_v33  ;;  %v1247_v58 = vmul.f32 0.036000773, %v3552_v48 }
 0x24c   :  { %v3568_v2 = vadd.f32 %v1249_v61, %v1213_v3  ;;  %1629 = vrot.lane.b32.xlu1 %v3431_v34, %s1888_s5  ;;  %v1167_v11 = vadd.f32 %v1161_v10, %v1125_v35  ;;  %v1212_v9 = vadd.f32 %v1206_v0, %v1170_v30 }
 0x24d   :  { %1589 = vrot.lane.b32.xlu0 %v3461_v46, %s1886_s26  ;;  %v1211_v23 = vadd.f32 %v1205_v21, %v1169_v38  ;;  %v159_v38 = vmul.f32 0.26601171, %v2038_v18  ;;  %v4392_v18 = vld [vmem:[#allocation19_spill] sm:$0xff] }
 0x24e   :  { %v1268_v49 = vpop.permute.xlu1 %1267  ;;  %v1209_v29 = vadd.f32 %v1203_v56, %v1167_v11  ;;  %v1254_v32 = vadd.f32 %v1248_v53, %v1212_v9  ;;  %v4386_v53 = vld [vmem:[#allocation5_spill] sm:$0xff] }
 0x24f   :  { %v1262_v15 = vpop.permute.xlu0 %1261  ;;  %v1253_v35 = vadd.f32 %v1247_v58, %v1211_v23  ;;  %v4390_v23 = vld [vmem:[#allocation13_spill] sm:$0xff] }
 0x250   :  { %1641 = vrot.lane.b32.xlu1 %v3431_v34, %s1889_s14  ;;  %v1251_v61 = vadd.f32 %v1245_v8, %v1209_v29  ;;  %v157_v29 = vmul.f32 0.26601171, %v2048_v28 }
 0x251   :  { %1627 = vrot.lane.b32.xlu0 %v3445_v5, %s1888_s5 }
 0x252   :  { %v1272_v60 = vpop.permute.xlu1 %1271 }
 0x253   :  { %v1266_v27 = vpop.permute.xlu0 %1265  ;;  %v1282_v13 = vadd.f32 %v1272_v60, %v1260_v26 }
 0x254   :  { %1523 = vrot.lane.b32.xlu1 %v3463_v54, %s1883_s23 }
 0x255   :  { %1639 = vrot.lane.b32.xlu0 %v3445_v5, %s1889_s14  ;;  %v1288_v39 = vmul.f32 0.007598758, %v1282_v13 }
 0x256   :  { %v1276_v26 = vpop.permute.xlu1 %1275 }
 0x257   :  { %v1270_v14 = vpop.permute.xlu0 %1269  ;;  %v1294_v63 = vadd.f32 %v1288_v39, %v1252_v7  ;;  %v1284_v3 = vadd.f32 %v1276_v26, %v1264_v12  ;;  %v158_v39 = vmul.f32 0.26601171, %v4386_v53  ;;  %v160_v26 = vmul.f32 0.26601171, %v2059_v40  ;;  %v4387_v40 = vld [vmem:[#allocation12_spill] sm:$0xff] }
 0x258   :  { %v1281_v6 = vadd.f32 %v1270_v14, %v1258_v62  ;;  %1563 = vrot.lane.b32.xlu1 %v3472_v22, %s1885_s25 }
 0x259   :  { %1511 = vrot.lane.b32.xlu0 %v3463_v54, %s1882_s22  ;;  %v1290_v47 = vmul.f32 0.007598758, %v1284_v3  ;;  %v188_v3 = vadd.f32 %v2365_v45, %v2348_v19  ;;  %v4391_v45 = vld [vmem:[#allocation14_spill] sm:$0xff] }
 0x25a   :  { %v1287_v41 = vmul.f32 0.007598758, %v1281_v6  ;;  %v1280_v36 = vpop.permute.xlu1 %1279 }
 0x25b   :  { %v1274_v52 = vpop.permute.xlu0 %1273  ;;  %v1296_v31 = vadd.f32 %v1290_v47, %v1254_v32  ;;  %v1286_v12 = vadd.f32 %v1280_v36, %v1268_v49  ;;  %v4388_v32 = vld [vmem:[#allocation18_spill] sm:$0xff]  ;;  %v190_v36 = vadd.f32 %v4392_v18, %v4391_v45  ;;  %v4412_v45 = vld [vmem:[#allocation36_spill] sm:$0xff] }
 0x25c   :  { %v1293_v1 = vadd.f32 %v1287_v41, %v1251_v61  ;;  %v1283_v62 = vadd.f32 %v1274_v52, %v1262_v15  ;;  %1603 = vrot.lane.b32.xlu1 %v3447_v51, %s1887_s27  ;;  %v162_v61 = vmul.f32 0.26601171, %v2074_v59  ;;  %v187_v58 = vadd.f32 %v4388_v32, %v4387_v40  ;;  %v4389_v41 = vld [vmem:[#allocation6_spill] sm:$0xff] }
 0x25d   :  { %1551 = vrot.lane.b32.xlu0 %v3472_v22, %s1884_s24  ;;  %v1292_v24 = vmul.f32 0.007598758, %v1286_v12  ;;  %v161_v47 = vmul.f32 0.26601171, %v4389_v41  ;;  %v3653_v52 = vmul.f32 0.26601171, %v4390_v23 }
 0x25e   :  { %v1289_v10 = vmul.f32 0.007598758, %v1283_v62  ;;  %v1302_v48 = vpop.permute.xlu1 %1301  ;;  %v3658_v59 = vmul.f32 0.26601171, %v2340_v17  ;;  %v4397_v17 = vld [vmem:[#allocation16_spill] sm:$0xff]  ;;  %v4410_v41 = vld [vmem:[#allocation35_spill] sm:$0xff] }
 0x25f   :  { %v1278_v50 = vpop.permute.xlu0 %1277  ;;  %v1298_v4 = vadd.f32 %v1292_v24, %v3558_v57  ;;  %v196_v53 = vmul.f32 0.21300554, %v190_v36  ;;  %v4411_v23 = vld [vmem:[#allocation41_spill] sm:$0xff]  ;;  %v4413_v18 = vld [vmem:[#allocation42_spill] sm:$0xff] }
 0x260   :  { %v1295_v16 = vadd.f32 %v1289_v10, %v1253_v35  ;;  %v1285_v55 = vadd.f32 %v1278_v50, %v1266_v27  ;;  %1643 = vrot.lane.b32.xlu1 %v3461_v46, %s1889_s14  ;;  %v4393_v35 = vld [vmem:[#allocation11_spill] sm:$0xff]  ;;  %v4394_v10 = vld [vmem:[#allocation20_spill] sm:$0xff] }
 0x261   :  { %1591 = vrot.lane.b32.xlu0 %v3447_v51, %s1886_s26  ;;  %v189_v24 = vadd.f32 %v4394_v10, %v4393_v35  ;;  %v4395_v50 = vld [vmem:[#allocation15_spill] sm:$0xff]  ;;  %v4414_v10 = vld [vmem:[#allocation37_spill] sm:$0xff] }
 0x262   :  { %v1291_v15 = vmul.f32 0.007598758, %v1285_v55  ;;  %v1306_v56 = vpop.permute.xlu1 %1305 }
 0x263   :  { %v1300_v49 = vpop.permute.xlu0 %1299 }
 0x264   :  { %v3614_v33 = vadd.f32 %v1291_v15, %v3568_v2  ;;  %1565 = vrot.lane.b32.xlu1 %v3463_v54, %s1885_s25  ;;  %v3668_v15 = vmul.f32 0.26601171, %v2358_v37 }
 0x265   :  { %1631 = vrot.lane.b32.xlu0 %v3461_v46, %s1888_s5 }
 0x266   :  { %v1310_v27 = vpop.permute.xlu1 %1309 }
 0x267   :  { %v1304_v57 = vpop.permute.xlu0 %1303 }
 0x268   :  { %1605 = vrot.lane.b32.xlu1 %v3472_v22, %s1887_s27 }
 0x269   :  { %1553 = vrot.lane.b32.xlu0 %v3463_v54, %s1884_s24 }
 0x26a   :  { %v1314_v43 = vpop.permute.xlu1 %1313 }
 0x26b   :  { %v1308_v60 = vpop.permute.xlu0 %1307  ;;  %v1324_v0 = vadd.f32 %v1314_v43, %v1302_v48  ;;  %v4396_v48 = vld [vmem:[#allocation21_spill] sm:$0xff] }
 0x26c   :  { %1645 = vrot.lane.b32.xlu1 %v3447_v51, %s1889_s14  ;;  %v192_v55 = vadd.f32 %v4396_v48, %v4395_v50  ;;  %v4415_v50 = vld [vmem:[#allocation43_spill] sm:$0xff] }
 0x26d   :  { %1593 = vrot.lane.b32.xlu0 %v3472_v22, %s1886_s26  ;;  %v1330_v2 = vmul.f32 0.0010283801, %v1324_v0  ;;  %v193_v0 = vmul.f32 0.21300554, %v187_v58  ;;  %v195_v58 = vmul.f32 0.21300554, %v189_v24  ;;  %v274_v48 = vadd.f32 %v4415_v50, %v4414_v10 }
 0x26e   :  { %v1318_v11 = vpop.permute.xlu1 %1317  ;;  %v198_v36 = vmul.f32 0.21300554, %v192_v55 }
 0x26f   :  { %v1312_v13 = vpop.permute.xlu0 %1311  ;;  %v3628_v20 = vadd.f32 %v1330_v2, %v1294_v63  ;;  %v1326_v8 = vadd.f32 %v1318_v11, %v1306_v56  ;;  %v194_v56 = vmul.f32 0.21300554, %v188_v3  ;;  %v4400_v2 = vld [vmem:[#allocation23_spill] sm:$0xff]  ;;  %v4402_v11 = vld [vmem:[#allocation24_spill] sm:$0xff] }
 0x270   :  { %v1323_v44 = vadd.f32 %v1312_v13, %v1300_v49  ;;  %1607 = vrot.lane.b32.xlu1 %v3463_v54, %s1887_s27  ;;  %v4401_v13 = vld [vmem:[#allocation29_spill] sm:$0xff] }
 0x271   :  { %1633 = vrot.lane.b32.xlu0 %v3447_v51, %s1888_s5  ;;  %v1332_v7 = vmul.f32 0.0010283801, %v1326_v8  ;;  %v230_v37 = vadd.f32 %v4401_v13, %v4400_v2  ;;  %v4404_v8 = vld [vmem:[#allocation25_spill] sm:$0xff]  ;;  %v200_v24 = vadd.f32 %v194_v56, %v158_v39  ;;  %v199_v13 = vadd.f32 %v193_v0, %v157_v29  ;;  %v4420_v39 = vld [vmem:[#allocation44_spill] sm:$0xff] }
 0x272   :  { %v1329_v30 = vmul.f32 0.0010283801, %v1323_v44  ;;  %v1322_v14 = vpop.permute.xlu1 %1321  ;;  %v4422_v0 = vld [vmem:[#allocation45_spill] sm:$0xff] }
 0x273   :  { %v1316_v21 = vpop.permute.xlu0 %1315  ;;  %v3639_v63 = vadd.f32 %v1332_v7, %v1296_v31  ;;  %v1328_v28 = vadd.f32 %v1322_v14, %v1310_v27  ;;  %v4408_v14 = vld [vmem:[#allocation27_spill] sm:$0xff] }
 0x274   :  { %v3637_v9 = vadd.f32 %v1329_v30, %v1293_v1  ;;  %v1325_v6 = vadd.f32 %v1316_v21, %v1304_v57  ;;  %1647 = vrot.lane.b32.xlu1 %v3472_v22, %s1889_s14  ;;  %v3661_v1 = vmul.f32 0.26601171, %v2342_v25  ;;  %v4398_v57 = vld [vmem:[#allocation22_spill] sm:$0xff]  ;;  %v4405_v30 = vld [vmem:[#allocation31_spill] sm:$0xff]  ;;  %v4407_v21 = vld [vmem:[#allocation32_spill] sm:$0xff] }
 0x275   :  { %1595 = vrot.lane.b32.xlu0 %v3463_v54, %s1886_s26  ;;  %v1334_v31 = vmul.f32 0.0010283801, %v1328_v28  ;;  %v191_v27 = vadd.f32 %v4398_v57, %v4397_v17  ;;  %v232_v7 = vadd.f32 %v4405_v30, %v4404_v8  ;;  %v236_v57 = vmul.f32 0.10936069, %v230_v37  ;;  %v4417_v30 = vld [vmem:[#allocation28_spill] sm:$0xff] }
 0x276   :  { %v1331_v19 = vmul.f32 0.0010283801, %v1325_v6  ;;  %v1462_v12 = vpop.permute.xlu1 %1461  ;;  %v4409_v6 = vld [vmem:[#allocation33_spill] sm:$0xff] }
 0x277   :  { %v1320_v62 = vpop.permute.xlu0 %1319  ;;  %v3674_v25 = vadd.f32 %v1334_v31, %v1298_v4  ;;  %v4406_v4 = vld [vmem:[#allocation26_spill] sm:$0xff]  ;;  %v234_v3 = vadd.f32 %v4409_v6, %v4408_v14  ;;  %v271_v31 = vadd.f32 %v4413_v18, %v4412_v45  ;;  %v197_v35 = vmul.f32 0.21300554, %v191_v27  ;;  %v4425_v45 = vld [vmem:[#allocation48_spill] sm:$0xff] }
 0x278   :  { %v3670_v49 = vadd.f32 %v1331_v19, %v1295_v16  ;;  %v1327_v43 = vadd.f32 %v1320_v62, %v1308_v60  ;;  %1649 = vrot.lane.b32.xlu1 %v3463_v54, %s1889_s14  ;;  %v4403_v16 = vld [vmem:[#allocation30_spill] sm:$0xff]  ;;  %v231_v60 = vadd.f32 %v4407_v21, %v4406_v4  ;;  %v272_v19 = vadd.f32 %v4411_v23, %v4410_v41 }
 0x279   :  { %4399 = vst [vmem:[#allocation5_spill] sm:$0xff] %v3674_v25  ;;  %1635 = vrot.lane.b32.xlu0 %v3472_v22, %s1888_s5  ;;  %v229_v44 = vadd.f32 %v4403_v16, %v4402_v11  ;;  %v3695_v62 = vmul.f32 0.26601171, %v2360_v42  ;;  %v238_v2 = vmul.f32 0.10936069, %v232_v7  ;;  %v202_v11 = vadd.f32 %v196_v53, %v160_v26  ;;  %v4418_v4 = vld [vmem:[#allocation34_spill] sm:$0xff] }
 0x27a   :  { %v1333_v28 = vmul.f32 0.0010283801, %v1327_v43  ;;  %v1466_v32 = vpop.permute.xlu1 %1465  ;;  %v237_v16 = vmul.f32 0.10936069, %v231_v60  ;;  %v240_v42 = vmul.f32 0.10936069, %v234_v3  ;;  %v201_v27 = vadd.f32 %v195_v58, %v159_v38 }
 0x27b   :  { %v1460_v40 = vpop.permute.xlu0 %1459  ;;  %v235_v43 = vmul.f32 0.10936069, %v229_v44  ;;  %v233_v21 = vadd.f32 %v4418_v4, %v4417_v30  ;;  %v278_v14 = vmul.f32 0.036000773, %v272_v19  ;;  %v204_v6 = vadd.f32 %v198_v36, %v162_v61  ;;  %v4419_v23 = vld [vmem:[#allocation38_spill] sm:$0xff]  ;;  %v4421_v26 = vld [vmem:[#allocation39_spill] sm:$0xff] }
 0x27c   :  { %v3700_v17 = vadd.f32 %v1333_v28, %v3614_v33  ;;  %v277_v33 = vmul.f32 0.036000773, %v271_v31  ;;  %v203_v28 = vadd.f32 %v197_v35, %v161_v47  ;;  %v280_v41 = vmul.f32 0.036000773, %v274_v48  ;;  %v4423_v38 = vld [vmem:[#allocation47_spill] sm:$0xff]  ;;  %v4424_v3 = vld [vmem:[#allocation53_spill] sm:$0xff] }
 0x27d   :  { %1637 = vrot.lane.b32.xlu0 %v3463_v54, %s1888_s5  ;;  %v273_v56 = vadd.f32 %v4420_v39, %v4419_v23  ;;  %v242_v37 = vadd.f32 %v236_v57, %v200_v24  ;;  %v241_v44 = vadd.f32 %v235_v43, %v199_v13  ;;  %v244_v29 = vadd.f32 %v238_v2, %v202_v11  ;;  %v4426_v19 = vld [vmem:[#allocation54_spill] sm:$0xff]  ;;  %v4427_v24 = vld [vmem:[#allocation49_spill] sm:$0xff]  ;;  %v4428_v57 = vld [vmem:[#allocation55_spill] sm:$0xff] }
 0x27e   :  { %4416 = vst [vmem:[#allocation12_spill] sm:$0xff] %v3700_v17  ;;  %v1470_v55 = vpop.permute.xlu1 %1469  ;;  %v276_v7 = vadd.f32 %v4422_v0, %v4421_v26  ;;  %v243_v53 = vadd.f32 %v237_v16, %v201_v27  ;;  %v246_v60 = vadd.f32 %v240_v42, %v204_v6  ;;  %v314_v58 = vadd.f32 %v4424_v3, %v4423_v38  ;;  %v4429_v2 = vld [vmem:[#allocation50_spill] sm:$0xff]  ;;  %v4430_v13 = vld [vmem:[#allocation56_spill] sm:$0xff]  ;;  %v4431_v42 = vld [vmem:[#allocation51_spill] sm:$0xff] }
 0x27f   :  { %v1464_v8 = vpop.permute.xlu0 %1463  ;;  %v313_v18 = vadd.f32 %v4426_v19, %v4425_v45  ;;  %v239_v31 = vmul.f32 0.10936069, %v233_v21  ;;  %v284_v36 = vadd.f32 %v278_v14, %v242_v37  ;;  %v283_v35 = vadd.f32 %v277_v33, %v241_v44  ;;  %v4432_v27 = vld [vmem:[#allocation57_spill] sm:$0xff]  ;;  %v4433_v4 = vld [vmem:[#allocation59_spill] sm:$0xff]  ;;  %v4435_v39 = vld [vmem:[#allocation60_spill] sm:$0xff] }
 0x280   :  { %v286_v50 = vadd.f32 %v280_v41, %v244_v29  ;;  %v279_v48 = vmul.f32 0.036000773, %v273_v56  ;;  %v316_v43 = vadd.f32 %v4428_v57, %v4427_v24  ;;  %v315_v11 = vadd.f32 %v4430_v13, %v4429_v2  ;;  %v4434_v6 = vld [vmem:[#allocation65_spill] sm:$0xff]  ;;  %v4436_v21 = vld [vmem:[#allocation66_spill] sm:$0xff]  ;;  %v4437_v33 = vld [vmem:[#allocation40_spill] sm:$0xff] }
 0x281   :  { %v282_v16 = vmul.f32 0.036000773, %v276_v7  ;;  %v318_v30 = vadd.f32 %v4432_v27, %v4431_v42  ;;  %v356_v23 = vadd.f32 %v4434_v6, %v4433_v4  ;;  %v355_v14 = vadd.f32 %v4436_v21, %v4435_v39  ;;  %v4439_v44 = vld [vmem:[#allocation61_spill] sm:$0xff]  ;;  %v4440_v29 = vld [vmem:[#allocation67_spill] sm:$0xff]  ;;  %v4441_v7 = vld [vmem:[#allocation62_spill] sm:$0xff] }
 0x282   :  { %v1474_v47 = vpop.permute.xlu1 %1473  ;;  %v320_v56 = vmul.f32 0.007598758, %v314_v58  ;;  %v319_v37 = vmul.f32 0.007598758, %v313_v18  ;;  %v358_v26 = vadd.f32 %v4440_v29, %v4439_v44  ;;  %v4442_v3 = vld [vmem:[#allocation68_spill] sm:$0xff]  ;;  %v4443_v19 = vld [vmem:[#allocation63_spill] sm:$0xff]  ;;  %v285_v13 = vadd.f32 %v279_v48, %v243_v53 }
 0x283   :  { %v1468_v61 = vpop.permute.xlu0 %1467  ;;  %v1484_v10 = vadd.f32 %v1474_v47, %v1462_v12  ;;  %v4438_v12 = vld [vmem:[#allocation46_spill] sm:$0xff]  ;;  %v357_v45 = vadd.f32 %v4442_v3, %v4441_v7  ;;  %v4444_v47 = vld [vmem:[#allocation69_spill] sm:$0xff]  ;;  %v322_v42 = vmul.f32 0.007598758, %v316_v43  ;;  %v321_v27 = vmul.f32 0.007598758, %v315_v11 }
 0x284   :  { %v275_v41 = vadd.f32 %v4438_v12, %v4437_v33  ;;  %v360_v24 = vadd.f32 %v4444_v47, %v4443_v19  ;;  %v4446_v4 = vld [vmem:[#allocation52_spill] sm:$0xff]  ;;  %v4447_v58 = vld [vmem:[#allocation58_spill] sm:$0xff]  ;;  %v288_v6 = vadd.f32 %v282_v16, %v246_v60  ;;  %v324_v39 = vmul.f32 0.007598758, %v318_v30  ;;  %v4486_v54 = vld [vmem:[#allocation107_spill] sm:$0xff] }
 0x285   :  { %v317_v18 = vadd.f32 %v4447_v58, %v4446_v4  ;;  %v362_v21 = vmul.f32 0.0010283801, %v356_v23  ;;  %v361_v33 = vmul.f32 0.0010283801, %v355_v14  ;;  %v326_v44 = vadd.f32 %v320_v56, %v284_v36  ;;  %v4449_v19 = vld [vmem:[#allocation64_spill] sm:$0xff]  ;;  %v4450_v47 = vld [vmem:[#allocation70_spill] sm:$0xff] }
 0x286   :  { %v1478_v38 = vpop.permute.xlu1 %1477  ;;  %v281_v12 = vmul.f32 0.036000773, %v275_v41  ;;  %v325_v29 = vadd.f32 %v319_v37, %v283_v35  ;;  %v364_v7 = vmul.f32 0.0010283801, %v358_v26  ;;  %v245_v43 = vadd.f32 %v239_v31, %v203_v28  ;;  %v4451_v41 = vld [vmem:[#allocation71_spill] sm:$0xff]  ;;  %v4453_v56 = vld [vmem:[#allocation73_spill] sm:$0xff] }
 0x287   :  { %v1472_v0 = vpop.permute.xlu0 %1471  ;;  %v3732_v2 = vadd.f32 %v1478_v38, %v1466_v32  ;;  %v363_v32 = vmul.f32 0.0010283801, %v357_v45  ;;  %v328_v11 = vadd.f32 %v322_v42, %v286_v50  ;;  %v323_v38 = vmul.f32 0.007598758, %v317_v18  ;;  %v4454_v28 = vld [vmem:[#allocation84_spill] sm:$0xff]  ;;  %v4459_v18 = vld [vmem:[#allocation17_spill] sm:$0xff] }
 0x288   :  { %v1483_v57 = vadd.f32 %v1472_v0, %v1460_v40  ;;  %v366_v0 = vmul.f32 0.0010283801, %v360_v24  ;;  %v359_v60 = vadd.f32 %v4450_v47, %v4449_v19  ;;  %v327_v16 = vadd.f32 %v321_v27, %v285_v13  ;;  %v4456_v24 = vld [vmem:[#allocation74_spill] sm:$0xff]  ;;  %v4457_v13 = vld [vmem:[#allocation85_spill] sm:$0xff] }
 0x289   :  { %4445 = vst [vmem:[#allocation18_spill] sm:$0xff] %v3732_v2  ;;  %v330_v30 = vadd.f32 %v324_v39, %v288_v6  ;;  %v3742_v23 = vadd.f32 %v362_v21, %v326_v44  ;;  %v3744_v36 = vadd.f32 %v361_v33, %v325_v29  ;;  %v287_v35 = vadd.f32 %v281_v12, %v245_v43  ;;  %v4464_v47 = vld [vmem:[#allocation78_spill] sm:$0xff]  ;;  %v4497_v22 = vld [vmem:[#allocation113_spill] sm:$0xff] }
 0x28a   :  { %v1482_v40 = vpop.permute.xlu1 %1481  ;;  %v3746_v14 = vadd.f32 %v364_v7, %v328_v11  ;;  %v499_v31 = vadd.f32 %v4454_v28, %v4453_v56  ;;  %v3752_v26 = vadd.f32 %v363_v32, %v327_v16  ;;  %v502_v42 = vadd.f32 %v4457_v13, %v4456_v24  ;;  %v4507_v25 = vld [vmem:[#allocation121_spill] sm:$0xff] }
 0x28b   :  { %v1476_v3 = vpop.permute.xlu0 %1475  ;;  %v3738_v48 = vadd.f32 %v1482_v40, %v1470_v55  ;;  %v3754_v45 = vadd.f32 %v366_v0, %v330_v30  ;;  %v329_v4 = vadd.f32 %v323_v38, %v287_v35  ;;  %v365_v58 = vmul.f32 0.0010283801, %v359_v60  ;;  %v4461_v40 = vld [vmem:[#allocation86_spill] sm:$0xff]  ;;  %v4465_v60 = vld [vmem:[#allocation87_spill] sm:$0xff]  ;;  %v4466_v30 = vld [vmem:[#allocation81_spill] sm:$0xff] }
 0x28c   :  { %v1485_v53 = vadd.f32 %v1476_v3, %v1464_v8  ;;  %v4452_v8 = vld [vmem:[#allocation82_spill] sm:$0xff]  ;;  %v473_v6 = vmul.f32 0.26601171, %v4459_v18  ;;  %v3762_v39 = vstv %s3736_s1  ;;  %v3766_v21 = vmul.f32 %v3742_v23, %v3742_v23  ;;  %v4460_v3 = vld [vmem:[#allocation77_spill] sm:$0xff]  ;;  %v4467_v35 = vld [vmem:[#allocation88_spill] sm:$0xff] }
 0x28d   :  { %4448 = vst [vmem:[#allocation6_spill] sm:$0xff] %v3738_v48  ;;  %v500_v55 = vadd.f32 %v4452_v8, %v4451_v41  ;;  %4455 = vst [vmem:[#allocation13_spill] sm:$0xff] %v3754_v45  ;;  %v3770_v33 = vmul.f32 %v3744_v36, %v3744_v36  ;;  %v1454_v12 = vmul.f32 0.26601171, %v3431_v34  ;;  %v1490_v44 = vmul.f32 0.21300554, %v1484_v10 }
 0x28e   :  { %v1504_v37 = vpop.permute.xlu1 %1503  ;;  %v505_v7 = vmul.f32 0.21300554, %v499_v31  ;;  %v501_v32 = vadd.f32 %v4461_v40, %v4460_v3  ;;  %v3781_v11 = vmul.f32 %v3752_v26, %v3752_v26  ;;  %v3785_v38 = vmul.f32 %v3754_v45, %v3754_v45  ;;  %v4468_v8 = vld [vmem:[#allocation72_spill] sm:$0xff]  ;;  %v4470_v40 = vld [vmem:[#allocation89_spill] sm:$0xff] }
 0x28f   :  { %v1480_v50 = vpop.permute.xlu0 %1479  ;;  %v506_v29 = vmul.f32 0.21300554, %v500_v55  ;;  %v508_v34 = vmul.f32 0.21300554, %v502_v42  ;;  %v3787_v19 = vadd.f32 %v365_v58, %v329_v4  ;;  %v504_v16 = vadd.f32 %v4465_v60, %v4464_v47  ;;  %v4469_v42 = vld [vmem:[#allocation75_spill] sm:$0xff]  ;;  %v4473_v60 = vld [vmem:[#allocation96_spill] sm:$0xff] }
 0x290   :  { %v3758_v27 = vadd.f32 %v1480_v50, %v1468_v61  ;;  %v3775_v61 = vmul.f32 %v3746_v14, %v3746_v14  ;;  %4462 = vst [vmem:[#allocation19_spill] sm:$0xff] %v3785_v38  ;;  %v503_v41 = vadd.f32 %v4467_v35, %v4466_v30  ;;  %v3794_v55 = vmul.f32 0.26601171, %v4468_v8  ;;  %v4485_v48 = vld [vmem:[#allocation101_spill] sm:$0xff]  ;;  %v4516_v38 = vld [vmem:[#allocation146_spill] sm:$0xff] }
 0x291   :  { %4463 = vst [vmem:[#allocation11_spill] sm:$0xff] %v3787_v19  ;;  %v1496_v56 = vadd.f32 %v1490_v44, %v1454_v12  ;;  %v1453_v28 = vmul.f32 0.26601171, %v3445_v5  ;;  %v1489_v31 = vmul.f32 0.21300554, %v1483_v57  ;;  %v512_v24 = vadd.f32 %v506_v29, %v3653_v52  ;;  %v4474_v29 = vld [vmem:[#allocation91_spill] sm:$0xff] }
 0x292   :  { %4458 = vst [vmem:[#allocation14_spill] sm:$0xff] %v3758_v27  ;;  %v1516_v43 = vpop.permute.xlu1 %1515  ;;  %v507_v13 = vmul.f32 0.21300554, %v501_v32  ;;  %v3800_v4 = vmul.f32 0.26601171, %v4469_v42  ;;  %v514_v3 = vadd.f32 %v508_v34, %v3661_v1  ;;  %v4476_v34 = vld [vmem:[#allocation92_spill] sm:$0xff] }
 0x293   :  { %v1502_v0 = vpop.permute.xlu0 %1501  ;;  %v1526_v10 = vadd.f32 %v1516_v43, %v1504_v37  ;;  %v511_v37 = vadd.f32 %v505_v7, %v3658_v59  ;;  %v4471_v43 = vld [vmem:[#allocation95_spill] sm:$0xff]  ;;  %v510_v5 = vmul.f32 0.21300554, %v504_v16  ;;  %v509_v57 = vmul.f32 0.21300554, %v503_v41  ;;  %v4475_v59 = vld [vmem:[#allocation97_spill] sm:$0xff] }
 0x294   :  { %v542_v47 = vadd.f32 %v4471_v43, %v4470_v40  ;;  %v544_v7 = vadd.f32 %v4475_v59, %v4474_v29  ;;  %v1495_v32 = vadd.f32 %v1489_v31, %v1453_v28  ;;  %v1455_v30 = vmul.f32 0.26601171, %v3461_v46  ;;  %v4477_v42 = vld [vmem:[#allocation98_spill] sm:$0xff]  ;;  %v4480_v41 = vld [vmem:[#allocation76_spill] sm:$0xff]  ;;  %v4518_v19 = vld [vmem:[#allocation169_spill] sm:$0xff] }
 0x295   :  { %v1532_v50 = vmul.f32 0.10936069, %v1526_v10  ;;  %v4472_v10 = vld [vmem:[#allocation90_spill] sm:$0xff]  ;;  %v1491_v35 = vmul.f32 0.21300554, %v1485_v53  ;;  %v513_v1 = vadd.f32 %v507_v13, %v3668_v15  ;;  %v543_v40 = vadd.f32 %v4477_v42, %v4476_v34  ;;  %v4482_v28 = vld [vmem:[#allocation100_spill] sm:$0xff] }
 0x296   :  { %v1518_v18 = vpop.permute.xlu1 %1517  ;;  %v541_v52 = vadd.f32 %v4473_v60, %v4472_v10  ;;  %v548_v10 = vmul.f32 0.10936069, %v542_v47  ;;  %v4481_v60 = vld [vmem:[#allocation94_spill] sm:$0xff]  ;;  %v4483_v13 = vld [vmem:[#allocation79_spill] sm:$0xff]  ;;  %v4484_v59 = vld [vmem:[#allocation80_spill] sm:$0xff]  ;;  %v515_v42 = vadd.f32 %v509_v57, %v473_v6 }
 0x297   :  { %v1514_v58 = vpop.permute.xlu0 %1513  ;;  %v1538_v12 = vadd.f32 %v1532_v50, %v1496_v56  ;;  %v4478_v56 = vld [vmem:[#allocation93_spill] sm:$0xff]  ;;  %v3816_v50 = vmul.f32 0.26601171, %v4480_v41  ;;  %v545_v31 = vadd.f32 %v4482_v28, %v4481_v60  ;;  %v3822_v29 = vmul.f32 0.26601171, %v4483_v13  ;;  %v4489_v6 = vld [vmem:[#allocation103_spill] sm:$0xff] }
 0x298   :  { %v1525_v44 = vadd.f32 %v1514_v58, %v1502_v0  ;;  %v4479_v0 = vld [vmem:[#allocation99_spill] sm:$0xff]  ;;  %v547_v15 = vmul.f32 0.10936069, %v541_v52  ;;  %v3825_v34 = vmul.f32 0.26601171, %v4484_v59  ;;  %v584_v60 = vadd.f32 %v4486_v54, %v4485_v48  ;;  %v4490_v57 = vld [vmem:[#allocation109_spill] sm:$0xff] }
 0x299   :  { %v546_v16 = vadd.f32 %v4479_v0, %v4478_v56  ;;  %v550_v56 = vmul.f32 0.10936069, %v544_v7  ;;  %v1497_v0 = vadd.f32 %v1491_v35, %v1455_v30  ;;  %v549_v45 = vmul.f32 0.10936069, %v543_v40  ;;  %v4491_v30 = vld [vmem:[#allocation104_spill] sm:$0xff]  ;;  %v4492_v35 = vld [vmem:[#allocation110_spill] sm:$0xff] }
 0x29a   :  { %v1531_v8 = vmul.f32 0.10936069, %v1525_v44  ;;  %v1546_v43 = vpop.permute.xlu1 %1545  ;;  %v516_v44 = vadd.f32 %v510_v5, %v3695_v62  ;;  %v554_v52 = vadd.f32 %v548_v10, %v512_v24  ;;  %v553_v59 = vadd.f32 %v547_v15, %v511_v37  ;;  %v4495_v27 = vld [vmem:[#allocation106_spill] sm:$0xff]  ;;  %v4498_v24 = vld [vmem:[#allocation119_spill] sm:$0xff] }
 0x29b   :  { %v1506_v58 = vpop.permute.xlu0 %1505  ;;  %v552_v47 = vmul.f32 0.10936069, %v546_v16  ;;  %v586_v7 = vadd.f32 %v4490_v57, %v4489_v6  ;;  %v585_v40 = vadd.f32 %v4492_v35, %v4491_v30  ;;  %v4493_v16 = vld [vmem:[#allocation105_spill] sm:$0xff]  ;;  %v556_v48 = vadd.f32 %v550_v56, %v514_v3  ;;  %v4500_v57 = vld [vmem:[#allocation114_spill] sm:$0xff]  ;;  %v4501_v30 = vld [vmem:[#allocation120_spill] sm:$0xff] }
 0x29c   :  { %v1537_v46 = vadd.f32 %v1531_v8, %v1495_v32  ;;  %v1527_v53 = vadd.f32 %v1518_v18, %v1506_v58  ;;  %v4487_v32 = vld [vmem:[#allocation102_spill] sm:$0xff]  ;;  %v4488_v18 = vld [vmem:[#allocation108_spill] sm:$0xff]  ;;  %v551_v58 = vmul.f32 0.10936069, %v545_v31  ;;  %v626_v10 = vadd.f32 %v4498_v24, %v4497_v22  ;;  %v4503_v22 = vld [vmem:[#allocation139_spill] sm:$0xff] }
 0x29d   :  { %v583_v8 = vadd.f32 %v4488_v18, %v4487_v32  ;;  %v4496_v32 = vld [vmem:[#allocation112_spill] sm:$0xff]  ;;  %v590_v37 = vmul.f32 0.036000773, %v584_v60  ;;  %v625_v35 = vadd.f32 %v4501_v30, %v4500_v57  ;;  %v592_v56 = vmul.f32 0.036000773, %v586_v7  ;;  %v4512_v30 = vld [vmem:[#allocation134_spill] sm:$0xff] }
 0x29e   :  { %v1533_v41 = vmul.f32 0.10936069, %v1527_v53  ;;  %v1558_v5 = vpop.permute.xlu1 %1557  ;;  %v4494_v53 = vld [vmem:[#allocation111_spill] sm:$0xff]  ;;  %v587_v18 = vadd.f32 %v4496_v32, %v4495_v27  ;;  %v557_v6 = vadd.f32 %v551_v58, %v515_v42  ;;  %v591_v27 = vmul.f32 0.036000773, %v585_v40  ;;  %v4502_v32 = vld [vmem:[#allocation133_spill] sm:$0xff] }
 0x29f   :  { %v1544_v62 = vpop.permute.xlu0 %1543  ;;  %v1568_v13 = vadd.f32 %v1558_v5, %v1546_v43  ;;  %v588_v54 = vadd.f32 %v4494_v53, %v4493_v16  ;;  %v558_v43 = vadd.f32 %v552_v47, %v516_v44  ;;  %v589_v15 = vmul.f32 0.036000773, %v583_v8  ;;  %v4504_v44 = vld [vmem:[#allocation125_spill] sm:$0xff]  ;;  %v4505_v47 = vld [vmem:[#allocation127_spill] sm:$0xff] }
 0x2a0   :  { %v3831_v28 = vadd.f32 %v1533_v41, %v1497_v0  ;;  %v555_v0 = vadd.f32 %v549_v45, %v513_v1  ;;  %v593_v45 = vmul.f32 0.036000773, %v587_v18  ;;  %v632_v1 = vmul.f32 0.007598758, %v626_v10  ;;  %v4506_v58 = vld [vmem:[#allocation115_spill] sm:$0xff]  ;;  %v4511_v18 = vld [vmem:[#allocation128_spill] sm:$0xff] }
 0x2a1   :  { %v1574_v31 = vmul.f32 0.036000773, %v1568_v13  ;;  %v594_v53 = vmul.f32 0.036000773, %v588_v54  ;;  %v828_v13 = vadd.f32 %v4503_v22, %v4502_v32  ;;  %v668_v60 = vadd.f32 %v4505_v47, %v4504_v44  ;;  %v4513_v32 = vld [vmem:[#allocation140_spill] sm:$0xff] }
 0x2a2   :  { %v3843_v5 = vpop.permute.xlu1 %1519  ;;  %v596_v24 = vadd.f32 %v590_v37, %v554_v52  ;;  %v595_v42 = vadd.f32 %v589_v15, %v553_v59  ;;  %v628_v57 = vadd.f32 %v4507_v25, %v4506_v58  ;;  %v631_v54 = vmul.f32 0.007598758, %v625_v35  ;;  %v4514_v25 = vld [vmem:[#allocation157_spill] sm:$0xff]  ;;  %v4515_v15 = vld [vmem:[#allocation163_spill] sm:$0xff] }
 0x2a3   :  { %v1556_v41 = vpop.permute.xlu0 %1555  ;;  %4499 = vst [vmem:[#allocation20_spill] sm:$0xff] %v3843_v5  ;;  %v3847_v16 = vadd.f32 %v1574_v31, %v1538_v12  ;;  %v4508_v12 = vld [vmem:[#allocation145_spill] sm:$0xff]  ;;  %v4509_v31 = vld [vmem:[#allocation151_spill] sm:$0xff]  ;;  %v827_v22 = vadd.f32 %v4513_v32, %v4512_v30  ;;  %v598_v52 = vadd.f32 %v592_v56, %v556_v48  ;;  %v597_v59 = vadd.f32 %v591_v27, %v555_v0  ;;  %v4520_v27 = vld [vmem:[#allocation8_spill] sm:$0xff] }
 0x2a4   :  { %v1567_v3 = vadd.f32 %v1556_v41, %v1544_v62  ;;  %v870_v62 = vadd.f32 %v4509_v31, %v4508_v12  ;;  %v4510_v41 = vld [vmem:[#allocation7_spill] sm:$0xff]  ;;  %v834_v37 = vmul.f32 0.21300554, %v828_v13  ;;  %v912_v44 = vadd.f32 %v4515_v15, %v4514_v25  ;;  %v4527_v32 = vld [vmem:[#allocation122_spill] sm:$0xff]  ;;  %v4528_v15 = vld [vmem:[#allocation117_spill] sm:$0xff] }
 0x2a5   :  { %v667_v10 = vadd.f32 %v4511_v18, %v4510_v41  ;;  %v600_v47 = vadd.f32 %v594_v53, %v558_v43  ;;  %v3869_v58 = vadd.f32 %v593_v45, %v557_v6  ;;  %v638_v12 = vadd.f32 %v632_v1, %v596_v24  ;;  %v4517_v41 = vld [vmem:[#allocation152_spill] sm:$0xff]  ;;  %v4519_v30 = vld [vmem:[#allocation175_spill] sm:$0xff]  ;;  %v4521_v43 = vld [vmem:[#allocation129_spill] sm:$0xff] }
 0x2a6   :  { %v1573_v8 = vmul.f32 0.036000773, %v1567_v3  ;;  %v3859_v40 = vpop.permute.xlu1 %1559  ;;  %v674_v31 = vmul.f32 0.0010283801, %v668_v60  ;;  %v634_v35 = vmul.f32 0.007598758, %v628_v57  ;;  %v869_v18 = vadd.f32 %v4517_v41, %v4516_v38 }
 0x2a7   :  { %v3857_v7 = vpop.permute.xlu0 %1507  ;;  %v876_v17 = vmul.f32 0.10936069, %v870_v62  ;;  %v637_v0 = vadd.f32 %v631_v54, %v595_v42  ;;  %v673_v56 = vmul.f32 0.0010283801, %v667_v10  ;;  %v670_v6 = vadd.f32 %v4521_v43, %v4520_v27  ;;  %v4522_v1 = vld [vmem:[#allocation158_spill] sm:$0xff]  ;;  %v4523_v60 = vld [vmem:[#allocation164_spill] sm:$0xff] }
 0x2a8   :  { %v3865_v3 = vadd.f32 %v1573_v8, %v1537_v46  ;;  %v954_v46 = vadd.f32 %v4519_v30, %v4518_v19  ;;  %v833_v53 = vmul.f32 0.21300554, %v827_v22  ;;  %v840_v13 = vadd.f32 %v834_v37, %v3794_v55  ;;  %v4524_v38 = vld [vmem:[#allocation181_spill] sm:$0xff]  ;;  %v4525_v57 = vld [vmem:[#allocation187_spill] sm:$0xff]  ;;  %v4526_v19 = vld [vmem:[#allocation116_spill] sm:$0xff] }
 0x2a9   :  { %v918_v45 = vmul.f32 0.036000773, %v912_v44  ;;  %v911_v24 = vadd.f32 %v4523_v60, %v4522_v1  ;;  %v996_v62 = vadd.f32 %v4525_v57, %v4524_v38  ;;  %v627_v25 = vadd.f32 %v4527_v32, %v4526_v19  ;;  %v4529_v41 = vld [vmem:[#allocation123_spill] sm:$0xff]  ;;  %v4530_v54 = vld [vmem:[#allocation118_spill] sm:$0xff]  ;;  %v4531_v10 = vld [vmem:[#allocation124_spill] sm:$0xff] }
 0x2aa   :  { %v3877_v48 = vpop.permute.xlu1 %1587  ;;  %v630_v42 = vadd.f32 %v4529_v41, %v4528_v15  ;;  %v629_v30 = vadd.f32 %v4531_v10, %v4530_v54  ;;  %v680_v27 = vadd.f32 %v674_v31, %v638_v12  ;;  %v882_v22 = vadd.f32 %v876_v17, %v840_v13  ;;  %v4532_v37 = vld [vmem:[#allocation170_spill] sm:$0xff]  ;;  %v4533_v44 = vld [vmem:[#allocation176_spill] sm:$0xff]  ;;  %v4534_v19 = vld [vmem:[#allocation9_spill] sm:$0xff] }
 0x2ab   :  { %v3875_v8 = vpop.permute.xlu0 %1547  ;;  %v875_v43 = vmul.f32 0.10936069, %v869_v18  ;;  %v960_v55 = vmul.f32 0.007598758, %v954_v46  ;;  %v953_v2 = vadd.f32 %v4533_v44, %v4532_v37  ;;  %v679_v38 = vadd.f32 %v673_v56, %v637_v0  ;;  %v4535_v32 = vld [vmem:[#allocation130_spill] sm:$0xff]  ;;  %v4537_v31 = vld [vmem:[#allocation188_spill] sm:$0xff] }
 0x2ac   :  { %v676_v57 = vmul.f32 0.0010283801, %v670_v6  ;;  %v669_v51 = vadd.f32 %v4535_v32, %v4534_v19  ;;  %v839_v15 = vadd.f32 %v833_v53, %v3800_v4  ;;  %v924_v41 = vadd.f32 %v918_v45, %v882_v22  ;;  %v4536_v17 = vld [vmem:[#allocation182_spill] sm:$0xff] }
 0x2ad   :  { %v917_v54 = vmul.f32 0.036000773, %v911_v24  ;;  %v1002_v12 = vmul.f32 0.0010283801, %v996_v62  ;;  %v995_v18 = vadd.f32 %v4537_v31, %v4536_v17  ;;  %v640_v46 = vadd.f32 %v634_v35, %v598_v52  ;;  %v4539_v24 = vld [vmem:[#allocation10_spill] sm:$0xff]  ;;  %v4540_v62 = vld [vmem:[#allocation131_spill] sm:$0xff] }
 0x2ae   :  { %v3896_v60 = vpop.permute.xlu1 %1599  ;;  %v633_v13 = vmul.f32 0.007598758, %v627_v25  ;;  %v1676_v10 = vmul.f32 %v680_v27, %v680_v27  ;;  %v3904_v37 = vmul.f32 %v680_v27, %v3742_v23  ;;  %v636_v44 = vmul.f32 0.007598758, %v630_v42 }
 0x2af   :  { %v3894_v1 = vpop.permute.xlu0 %1585  ;;  %v881_v0 = vadd.f32 %v875_v43, %v839_v15  ;;  %v966_v56 = vadd.f32 %v960_v55, %v924_v41  ;;  %v959_v6 = vmul.f32 0.007598758, %v953_v2  ;;  %v635_v4 = vmul.f32 0.007598758, %v629_v30  ;;  %v4541_v55 = vld [vmem:[#allocation83_spill] sm:$0xff] }
 0x2b0   :  { %v682_v53 = vadd.f32 %v676_v57, %v640_v46  ;;  %v675_v45 = vmul.f32 0.0010283801, %v669_v51  ;;  %v672_v22 = vadd.f32 %v4540_v62, %v4539_v24  ;;  %v3915_v52 = vmul.f32 %v679_v38, %v3744_v36 }
 0x2b1   :  { %v923_v23 = vadd.f32 %v917_v54, %v881_v0  ;;  %v1008_v35 = vadd.f32 %v1002_v12, %v966_v56  ;;  %v1001_v25 = vmul.f32 0.0010283801, %v995_v18  ;;  %v639_v42 = vadd.f32 %v633_v13, %v597_v59 }
 0x2b2   :  { %v3908_v19 = vpop.permute.xlu1 %1521  ;;  %v1731_v2 = vmul.f32 2.0, %v3904_v37  ;;  %v1750_v27 = vadd.f32 %v1676_v10, %v3766_v21  ;;  %v1675_v43 = vmul.f32 %v679_v38, %v679_v38  ;;  %v642_v30 = vadd.f32 %v636_v44, %v600_v47  ;;  %v4543_v38 = vld [vmem:[#allocation136_spill] sm:$0xff]  ;;  %v4544_v47 = vld [vmem:[#allocation142_spill] sm:$0xff] }
 0x2b3   :  { %v3906_v5 = vpop.permute.xlu0 %1597  ;;  %4538 = vst [vmem:[#allocation15_spill] sm:$0xff] %v3908_v19  ;;  %v3920_v51 = vmul.f32 0.26601171, %v4541_v55  ;;  %v965_v57 = vadd.f32 %v959_v6, %v923_v23  ;;  %v1694_v32 = vsub.f32 %v3628_v20, %v1676_v10  ;;  %v641_v41 = vadd.f32 %v635_v4, %v3869_v58  ;;  %v4545_v10 = vld [vmem:[#allocation126_spill] sm:$0xff]  ;;  %v4546_v44 = vld [vmem:[#allocation132_spill] sm:$0xff] }
 0x2b4   :  { %v3928_v54 = vmul.f32 %v682_v53, %v682_v53  ;;  %v681_v59 = vadd.f32 %v675_v45, %v639_v42  ;;  %v678_v12 = vmul.f32 0.0010283801, %v672_v22  ;;  %v1730_v17 = vmul.f32 2.0, %v3915_v52  ;;  %v4547_v6 = vld [vmem:[#allocation148_spill] sm:$0xff]  ;;  %v4548_v4 = vld [vmem:[#allocation154_spill] sm:$0xff] }
 0x2b5   :  { %v829_v31 = vadd.f32 %v4544_v47, %v4543_v38  ;;  %v1688_v18 = vsub.f32 %v1008_v35, %v3766_v21  ;;  %v1007_v46 = vadd.f32 %v1001_v25, %v965_v57  ;;  %v3935_v20 = vadd.f32 %v3762_v39, %v1731_v2  ;;  %v4550_v2 = vld [vmem:[#allocation160_spill] sm:$0xff]  ;;  %v4553_v47 = vld [vmem:[#allocation178_spill] sm:$0xff] }
 0x2b6   :  { %v3925_v36 = vpop.permute.xlu1 %1561  ;;  %v1756_v13 = vadd.f32 %v1750_v27, %v3762_v39  ;;  %v1749_v58 = vadd.f32 %v1675_v43, %v3770_v33  ;;  %v671_v0 = vadd.f32 %v4546_v44, %v4545_v10  ;;  %v3942_v56 = vmul.f32 %v682_v53, %v3746_v14  ;;  %v4552_v38 = vld [vmem:[#allocation172_spill] sm:$0xff] }
 0x2b7   :  { %v3923_v15 = vpop.permute.xlu0 %1509  ;;  %v871_v45 = vadd.f32 %v4548_v4, %v4547_v6  ;;  %v1719_v24 = vadd.f32 %v1694_v32, %v1688_v18  ;;  %v1693_v21 = vsub.f32 %v3637_v9, %v1675_v43  ;;  %v3953_v23 = vadd.f32 %v3928_v54, %v3775_v61  ;;  %v4551_v9 = vld [vmem:[#allocation166_spill] sm:$0xff] }
 0x2b8   :  { %4542 = vst [vmem:[#allocation21_spill] sm:$0xff] %v3923_v15  ;;  %v3955_v35 = vmul.f32 %v681_v59, %v681_v59  ;;  %v3957_v25 = vadd.f32 %v678_v12, %v642_v30  ;;  %v3960_v14 = vstv %s3912_s2  ;;  %v3963_v53 = vadd.f32 %v3762_v39, %v1730_v17  ;;  %v4558_v4 = vld [vmem:[#allocation138_spill] sm:$0xff] }
 0x2b9   :  { %v835_v42 = vmul.f32 0.21300554, %v829_v31  ;;  %v913_v27 = vadd.f32 %v4551_v9, %v4550_v2  ;;  %v1687_v43 = vsub.f32 %v1007_v46, %v3770_v33  ;;  %v1755_v55 = vadd.f32 %v1749_v58, %v3762_v39  ;;  %v4555_v46 = vld [vmem:[#allocation141_spill] sm:$0xff]  ;;  %v4557_v58 = vld [vmem:[#allocation143_spill] sm:$0xff]  ;;  %v4560_v2 = vld [vmem:[#allocation184_spill] sm:$0xff] }
 0x2ba   :  { %v3949_v22 = vpop.permute.xlu1 %1601  ;;  %4549 = vst [vmem:[#allocation16_spill] sm:$0xff] %v3957_v25  ;;  %v3970_v57 = vmul.f32 %v681_v59, %v3752_v26  ;;  %v677_v32 = vmul.f32 0.0010283801, %v671_v0  ;;  %v1610_v30 = vadd.f32 %v3896_v60, %v3877_v48  ;;  %v877_v12 = vmul.f32 0.10936069, %v871_v45  ;;  %v4554_v59 = vld [vmem:[#allocation135_spill] sm:$0xff] }
 0x2bb   :  { %v3947_v62 = vpop.permute.xlu0 %1549  ;;  %v955_v17 = vadd.f32 %v4553_v47, %v4552_v38  ;;  %v1725_v31 = vadd.f32 %v1719_v24, %v3960_v14  ;;  %v1718_v18 = vadd.f32 %v1693_v21, %v1687_v43  ;;  %v1751_v33 = vadd.f32 %v3955_v35, %v3781_v11  ;;  %v4556_v60 = vld [vmem:[#allocation137_spill] sm:$0xff]  ;;  %v4559_v45 = vld [vmem:[#allocation144_spill] sm:$0xff]  ;;  %v4561_v9 = vld [vmem:[#allocation190_spill] sm:$0xff] }
 0x2bc   :  { %v3983_v26 = vmul.f32 %v3957_v25, %v3957_v25  ;;  %v830_v48 = vadd.f32 %v4555_v46, %v4554_v59  ;;  %v832_v0 = vadd.f32 %v4557_v58, %v4556_v60  ;;  %v841_v6 = vadd.f32 %v835_v42, %v3822_v29 }
 0x2bd   :  { %v831_v24 = vadd.f32 %v4559_v45, %v4558_v4  ;;  %v919_v21 = vmul.f32 0.036000773, %v913_v27  ;;  %v997_v43 = vadd.f32 %v4561_v9, %v4560_v2  ;;  %v3994_v38 = vadd.f32 %v677_v32, %v641_v41 }
 0x2be   :  { %v1630_v44 = vpop.permute.xlu1 %1629  ;;  %v1616_v47 = vmul.f32 0.007598758, %v1610_v30  ;;  %v1609_v25 = vadd.f32 %v3906_v5, %v3894_v1  ;;  %v1779_v19 = vlaneseq  ;;  %v883_v59 = vadd.f32 %v877_v12, %v841_v6 }
 0x2bf   :  { %v3977_v10 = vpop.permute.xlu0 %1589  ;;  %v961_v46 = vmul.f32 0.007598758, %v955_v17  ;;  %v1762_v15 = vmul.f32 %v1756_v13, %v1725_v31  ;;  %v1724_v60 = vadd.f32 %v1718_v18, %v3960_v14  ;;  %v4000_v58 = vmul.f32 2.0, %v3970_v57  ;;  %v4563_v31 = vld [vmem:[#allocation147_spill] sm:$0xff]  ;;  %v4564_v18 = vld [vmem:[#allocation153_spill] sm:$0xff] }
 0x2c0   :  { %v4003_v27 = vadd.f32 %v1751_v33, %v3762_v39  ;;  %v836_v41 = vmul.f32 0.21300554, %v830_v48  ;;  %v838_v30 = vmul.f32 0.21300554, %v832_v0  ;;  %v837_v4 = vmul.f32 0.21300554, %v831_v24 }
 0x2c1   :  { %4562 = vst [vmem:[#allocation22_spill] sm:$0xff] %v4000_v58  ;;  %v925_v45 = vadd.f32 %v919_v21, %v883_v59  ;;  %v1003_v5 = vmul.f32 0.0010283801, %v997_v43  ;;  %v1622_v1 = vadd.f32 %v1616_v47, %v3847_v16  ;;  %v1615_v12 = vmul.f32 0.007598758, %v1609_v25  ;;  %v4565_v48 = vld [vmem:[#allocation149_spill] sm:$0xff] }
 0x2c2   :  { %v1642_v42 = vpop.permute.xlu1 %1641  ;;  %v1780_v13 = vand.u32 127, %v1779_v19  ;;  %v872_v6 = vadd.f32 %v4564_v18, %v4563_v31  ;;  %1821 = vrcp.f32 %v1762_v15  ;;  %v1761_v9 = vmul.f32 %v1755_v55, %v1724_v60  ;;  %v4566_v0 = vld [vmem:[#allocation155_spill] sm:$0xff]  ;;  %v4568_v47 = vld [vmem:[#allocation165_spill] sm:$0xff] }
 0x2c3   :  { %v1628_v29 = vpop.permute.xlu0 %1627  ;;  %v1652_v32 = vadd.f32 %v1642_v42, %v1630_v44  ;;  %v967_v2 = vadd.f32 %v961_v46, %v925_v45  ;;  %v842_v44 = vadd.f32 %v836_v41, %v3816_v50  ;;  %v874_v24 = vadd.f32 %v4566_v0, %v4565_v48  ;;  %v4567_v25 = vld [vmem:[#allocation159_spill] sm:$0xff]  ;;  %v4576_v18 = vld [vmem:[#allocation189_spill] sm:$0xff] }
 0x2c4   :  { %v844_v16 = vadd.f32 %v838_v30, %v3825_v34  ;;  %v843_v19 = vadd.f32 %v837_v4, %v3920_v51  ;;  %v914_v59 = vadd.f32 %v4568_v47, %v4567_v25  ;;  %v1621_v15 = vadd.f32 %v1615_v12, %v3865_v3  ;;  %v4569_v41 = vld [vmem:[#allocation171_spill] sm:$0xff]  ;;  %v4571_v30 = vld [vmem:[#allocation150_spill] sm:$0xff]  ;;  %v4572_v4 = vld [vmem:[#allocation156_spill] sm:$0xff] }
 0x2c5   :  { %v1658_v17 = vmul.f32 0.0010283801, %v1652_v32  ;;  %v1009_v46 = vadd.f32 %v1003_v5, %v967_v2  ;;  %v1781_v55 = vand.u32 15, %v1780_v13  ;;  %v878_v50 = vmul.f32 0.10936069, %v872_v6  ;;  %v4570_v32 = vld [vmem:[#allocation177_spill] sm:$0xff] }
 0x2c6   :  { %v4008_v33 = vpop.permute.xlu1 %1523  ;;  %v956_v45 = vadd.f32 %v4570_v32, %v4569_v41  ;;  %1823 = vrcp.f32 %v1761_v9  ;;  %v1695_v34 = vsub.f32 %v3670_v49, %v3955_v35  ;;  %v873_v3 = vadd.f32 %v4572_v4, %v4571_v30  ;;  %v4573_v12 = vld [vmem:[#allocation161_spill] sm:$0xff]  ;;  %v4574_v13 = vld [vmem:[#allocation167_spill] sm:$0xff]  ;;  %v4587_v4 = vld [vmem:[#allocation174_spill] sm:$0xff] }
 0x2c7   :  { %v1640_v58 = vpop.permute.xlu0 %1639  ;;  %v1664_v21 = vadd.f32 %v1658_v17, %v1622_v1  ;;  %v916_v17 = vadd.f32 %v4574_v13, %v4573_v12  ;;  %v4575_v31 = vld [vmem:[#allocation183_spill] sm:$0xff]  ;;  %v1689_v2 = vsub.f32 %v1009_v46, %v3781_v11  ;;  %vm4034_vm0 = vcmp.ge.s32.totalorder %v1781_v55, 5  ;;  %v4591_v35 = vld [vmem:[#allocation186_spill] sm:$0xff] }
 0x2c8   :  { %v1651_v43 = vadd.f32 %v1640_v58, %v1628_v29  ;;  %v880_v58 = vmul.f32 0.10936069, %v874_v24  ;;  %v998_v6 = vadd.f32 %v4576_v18, %v4575_v31  ;;  %vm4038_vm1 = vcmp.lt.s32.totalorder %v1781_v55, 11  ;;  %v4581_v24 = vld [vmem:[#allocation162_spill] sm:$0xff] }
 0x2c9   :  { %v1700_v60 = vsub.f32 %v1664_v21, %v3904_v37  ;;  %v920_v37 = vmul.f32 0.036000773, %v914_v59  ;;  %v884_v0 = vadd.f32 %v878_v50, %v842_v44  ;;  %v4582_v21 = vld [vmem:[#allocation168_spill] sm:$0xff]  ;;  %v962_v25 = vmul.f32 0.007598758, %v956_v45  ;;  %vm4057_vm2 = vmand %vm4034_vm0, %vm4038_vm1  ;;  %v4586_v45 = vld [vmem:[#allocation179_spill] sm:$0xff] }
 0x2ca   :  { %v1657_v42 = vmul.f32 0.0010283801, %v1651_v43  ;;  %v4025_v51 = vpop.permute.xlu1 %1563  ;;  %v915_v43 = vadd.f32 %v4582_v21, %v4581_v24  ;;  %v1720_v47 = vadd.f32 %v1695_v34, %v1689_v2  ;;  %v886_v46 = vadd.f32 %v880_v58, %v844_v16  ;;  %v4585_v16 = vld [vmem:[#allocation173_spill] sm:$0xff]  ;;  %v4590_v2 = vld [vmem:[#allocation191_spill] sm:$0xff] }
 0x2cb   :  { %v4023_v29 = vpop.permute.xlu0 %1511  ;;  %v1706_v5 = vmul.f32 2.0, %v1700_v60  ;;  %v879_v41 = vmul.f32 0.10936069, %v873_v3  ;;  %v922_v44 = vmul.f32 0.036000773, %v916_v17  ;;  %v958_v34 = vadd.f32 %v4586_v45, %v4585_v16  ;;  %v4588_v3 = vld [vmem:[#allocation180_spill] sm:$0xff] }
 0x2cc   :  { %v1663_v1 = vadd.f32 %v1657_v42, %v1621_v15  ;;  %v1569_v15 = vadd.f32 %v3859_v40, %v3875_v8  ;;  %v1822_v42 = vpop.eup %1821  ;;  %v1004_v50 = vmul.f32 0.0010283801, %v998_v6  ;;  %v1611_v40 = vadd.f32 %v3949_v22, %v3977_v10  ;;  %v4589_v6 = vld [vmem:[#allocation185_spill] sm:$0xff] }
 0x2cd   :  { %v1713_v9 = vadd.f32 %v3960_v14, %v1706_v5  ;;  %v921_v58 = vmul.f32 0.036000773, %v915_v43  ;;  %v957_v5 = vadd.f32 %v4588_v3, %v4587_v4  ;;  %v885_v10 = vadd.f32 %v879_v41, %v843_v19 }
 0x2ce   :  { %v1699_v48 = vsub.f32 %v1663_v1, %v3915_v52  ;;  %v4048_v11 = vpop.permute.xlu1 %1603  ;;  %v926_v52 = vadd.f32 %v920_v37, %v884_v0  ;;  %v1726_v1 = vadd.f32 %v1720_v47, %v3960_v14  ;;  %v1575_v13 = vmul.f32 0.036000773, %v1569_v15 }
 0x2cf   :  { %v4046_v59 = vpop.permute.xlu0 %1551  ;;  %v1744_v55 = vmul.f32 %v3935_v20, %v1713_v9  ;;  %v1000_v49 = vadd.f32 %v4590_v2, %v4589_v6  ;;  %v4592_v9 = vld [vmem:[#allocation192_spill] sm:$0xff]  ;;  %v928_v0 = vadd.f32 %v922_v44, %v886_v46  ;;  %v964_v24 = vmul.f32 0.007598758, %v958_v34 }
 0x2d0   :  { %v1705_v60 = vmul.f32 2.0, %v1699_v48  ;;  %v968_v30 = vadd.f32 %v962_v25, %v926_v52  ;;  %v1824_v22 = vpop.eup %1823  ;;  %v999_v48 = vadd.f32 %v4592_v9, %v4591_v35  ;;  %v1617_v21 = vmul.f32 0.007598758, %v1611_v40  ;;  %v4598_v35 = vld [vmem:[#allocation12_spill] sm:$0xff] }
 0x2d1   :  { %v1770_v8 = vmul.f32 %v1822_v42, %v1744_v55  ;;  %v963_v25 = vmul.f32 0.007598758, %v957_v5  ;;  %v1696_v47 = vsub.f32 %v3639_v63, %v3928_v54  ;;  %v1763_v15 = vmul.f32 %v4003_v27, %v1726_v1  ;;  %v4593_v54 = vld [vmem:[#allocation20_spill] sm:$0xff] }
 0x2d2   :  { %v1712_v20 = vadd.f32 %v3960_v14, %v1705_v60  ;;  %v1644_v12 = vpop.permute.xlu1 %1643  ;;  %v1010_v18 = vadd.f32 %v1004_v50, %v968_v30  ;;  %v927_v60 = vadd.f32 %v921_v58, %v885_v10  ;;  %v1581_v42 = vadd.f32 %v1575_v13, %v3831_v28  ;;  %v4594_v30 = vld [vmem:[#allocation193_spill] sm:$0xff] }
 0x2d3   :  { %v1592_v37 = vpop.permute.xlu0 %1591  ;;  %v1786_v17 = vsel %vm4057_vm2, %v1770_v8, 0.0  ;;  %v1006_v44 = vmul.f32 0.0010283801, %v1000_v49  ;;  %v1005_v50 = vmul.f32 0.0010283801, %v999_v48  ;;  %v1528_v27 = vadd.f32 %v4593_v54, %v3857_v7  ;;  %v4604_v54 = vld [vmem:[#allocation14_spill] sm:$0xff] }
 0x2d4   :  { %v1743_v31 = vmul.f32 %v3963_v53, %v1712_v20  ;;  %v1793_v53 = vsel %vm1791_vm3, %v1786_v17, 0.0  ;;  %v1690_v52 = vsub.f32 %v1010_v18, %v3775_v61  ;;  %v1623_v16 = vadd.f32 %v1617_v21, %v1581_v42  ;;  %v4595_v61 = vld [vmem:[#allocation18_spill] sm:$0xff] }
 0x2d5   :  { %v970_v40 = vadd.f32 %v964_v24, %v928_v0  ;;  %v969_v8 = vadd.f32 %v963_v25, %v927_v60  ;;  %1825 = vrcp.f32 %v1763_v15  ;;  %v1456_v4 = vmul.f32 0.26601171, %v4594_v30  ;;  %v4599_v24 = vld [vmem:[#allocation22_spill] sm:$0xff]  ;;  %v4601_v15 = vld [vmem:[#allocation21_spill] sm:$0xff] }
 0x2d6   :  { %v1768_v43 = vmul.f32 %v1824_v22, %v1743_v31  ;;  %v4080_v55 = vpop.permute.xlu1 %1565  ;;  %v1721_v28 = vadd.f32 %v1696_v47, %v1690_v52  ;;  %v1492_v3 = vmul.f32 0.21300554, %v4595_v61  ;;  %v1570_v5 = vadd.f32 %v3925_v36, %v3947_v62  ;;  %v4597_v62 = vld [vmem:[#allocation19_spill] sm:$0xff]  ;;  %v4605_v61 = vld [vmem:[#allocation194_spill] sm:$0xff] }
 0x2d7   :  { %v1632_v19 = vpop.permute.xlu0 %1631  ;;  %v4098_v13 = vmul.f32 2.0, %v3942_v56  ;;  %v1679_v17 = vmul.f32 %v3994_v38, %v3994_v38  ;;  %v1011_v31 = vadd.f32 %v1005_v50, %v969_v8  ;;  %v1012_v22 = vadd.f32 %v1006_v44, %v970_v40  ;;  %v4603_v50 = vld [vmem:[#allocation195_spill] sm:$0xff] }
 0x2d8   :  { %v1785_v46 = vsel %vm4057_vm2, %v1768_v43, 0.0  ;;  %v1653_v41 = vadd.f32 %v1644_v12, %v1632_v19  ;;  %v4596_v12 = vld [vmem:[#allocation11_spill] sm:$0xff]  ;;  %v1534_v10 = vmul.f32 0.10936069, %v1528_v27  ;;  %v1612_v18 = vadd.f32 %v4048_v11, %v1592_v37 }
 0x2d9   :  { %v1792_v63 = vsel %vm1791_vm3, %v1785_v46, 0.0  ;;  %v1673_v7 = vmul.f32 %v4596_v12, %v4596_v12  ;;  %v1758_v36 = vadd.f32 %v3953_v23, %v3762_v39  ;;  %v4108_v2 = vadd.f32 %v3983_v26, %v4597_v62  ;;  %v4600_v23 = vld [vmem:[#allocation5_spill] sm:$0xff] }
 0x2da   :  { %v4089_v45 = vadd.f32 %v1793_v53, %v1792_v63  ;;  %v1659_v34 = vmul.f32 0.0010283801, %v1653_v41  ;;  %v1606_v58 = vpop.permute.xlu1 %1605  ;;  %v1727_v49 = vadd.f32 %v1721_v28, %v3960_v14  ;;  %v1697_v9 = vsub.f32 %v4598_v35, %v1679_v17  ;;  %v4602_v53 = vld [vmem:[#allocation15_spill] sm:$0xff] }
 0x2db   :  { %v1554_v20 = vpop.permute.xlu0 %1553  ;;  %v1739_v21 = vadd.f32 %v3762_v39, %v4599_v24  ;;  %v1498_v43 = vadd.f32 %v1492_v3, %v1456_v4  ;;  %v1576_v11 = vmul.f32 0.036000773, %v1570_v5  ;;  %v1691_v25 = vsub.f32 %v1011_v31, %v1673_v7 }
 0x2dc   :  { %v1665_v1 = vadd.f32 %v1659_v34, %v1623_v16  ;;  %v1698_v47 = vsub.f32 %v4600_v23, %v3983_v26  ;;  %v1529_v19 = vadd.f32 %v4602_v53, %v4601_v15  ;;  %v1692_v60 = vsub.f32 %v1012_v22, %v4597_v62 }
 0x2dd   :  { %v1540_v42 = vadd.f32 %v1534_v10, %v1498_v43  ;;  %v1618_v46 = vmul.f32 0.007598758, %v1612_v18  ;;  %v1764_v52 = vmul.f32 %v1758_v36, %v1727_v49  ;;  %v1722_v44 = vadd.f32 %v1697_v9, %v1691_v25  ;;  %v4606_v18 = vld [vmem:[#allocation6_spill] sm:$0xff] }
 0x2de   :  { %v1701_v6 = vsub.f32 %v1665_v1, %v3970_v57  ;;  %v1646_v0 = vpop.permute.xlu1 %1645  ;;  %v1753_v57 = vadd.f32 %v1679_v17, %v1673_v7  ;;  %v1457_v63 = vmul.f32 0.26601171, %v4603_v50  ;;  %v1493_v27 = vmul.f32 0.21300554, %v4604_v54 }
 0x2df   :  { %v1594_v48 = vpop.permute.xlu0 %1593  ;;  %v1582_v40 = vadd.f32 %v1576_v11, %v1540_v42  ;;  %v1571_v26 = vadd.f32 %v4025_v51, %v4046_v59  ;;  %v1826_v30 = vpop.eup %1825  ;;  %v1723_v4 = vadd.f32 %v1698_v47, %v1692_v60  ;;  %v1458_v3 = vmul.f32 0.26601171, %v4605_v61 }
 0x2e0   :  { %v1707_v37 = vmul.f32 2.0, %v1701_v6  ;;  %v1535_v5 = vmul.f32 0.10936069, %v1529_v19  ;;  %v1530_v1 = vadd.f32 %v4008_v33, %v4023_v29  ;;  %v1613_v31 = vadd.f32 %v1606_v58, %v1594_v48 }
 0x2e1   :  { %v1624_v7 = vadd.f32 %v1618_v46, %v1582_v40  ;;  %1827 = vrcp.f32 %v1764_v52  ;;  %v1728_v10 = vadd.f32 %v1722_v44, %v3960_v14  ;;  %v1494_v6 = vmul.f32 0.21300554, %v4606_v18 }
 0x2e2   :  { %v1714_v41 = vadd.f32 %v3960_v14, %v1707_v37  ;;  %v1608_v34 = vpop.permute.xlu1 %1607  ;;  %v1499_v51 = vadd.f32 %v1493_v27, %v1457_v63  ;;  %v1577_v62 = vmul.f32 0.036000773, %v1571_v26  ;;  %v1572_v35 = vadd.f32 %v4080_v55, %v1554_v20 }
 0x2e3   :  { %v1634_v16 = vpop.permute.xlu0 %1633  ;;  %v1759_v33 = vadd.f32 %v1753_v57, %v3762_v39  ;;  %v1536_v58 = vmul.f32 0.10936069, %v1530_v1  ;;  %v1619_v24 = vmul.f32 0.007598758, %v1613_v31  ;;  %v1729_v11 = vadd.f32 %v1723_v4, %v3960_v14 }
 0x2e4   :  { %v1745_v8 = vmul.f32 %v1739_v21, %v1714_v41  ;;  %v1654_v28 = vadd.f32 %v1646_v0, %v1634_v16  ;;  %v1541_v29 = vadd.f32 %v1535_v5, %v1499_v51  ;;  %v1500_v25 = vadd.f32 %v1494_v6, %v1458_v3  ;;  %v4607_v16 = vld [vmem:[#allocation13_spill] sm:$0xff] }
 0x2e5   :  { %v1765_v37 = vmul.f32 %v1759_v33, %v1728_v10  ;;  %v1578_v55 = vmul.f32 0.036000773, %v1572_v35  ;;  %v1740_v57 = vadd.f32 %v3762_v39, %v4098_v13  ;;  %v1760_v53 = vadd.f32 %v4108_v2, %v3762_v39  ;;  %v4608_v2 = vld [vmem:[#allocation16_spill] sm:$0xff] }
 0x2e6   :  { %v1772_v17 = vmul.f32 %v1826_v30, %v1745_v8  ;;  %v1660_v22 = vmul.f32 0.0010283801, %v1654_v28  ;;  %v1648_v36 = vpop.permute.xlu1 %1647  ;;  %v1583_v47 = vadd.f32 %v1577_v62, %v1541_v29 }
 0x2e7   :  { %v1596_v59 = vpop.permute.xlu0 %1595  ;;  %v1766_v52 = vmul.f32 %v1760_v53, %v1729_v11  ;;  %1829 = vrcp.f32 %v1765_v37 }
 0x2e8   :  { %v1787_v49 = vsel %vm4057_vm2, %v1772_v17, 0.0  ;;  %v1666_v9 = vadd.f32 %v1660_v22, %v1624_v7  ;;  %v1614_v43 = vadd.f32 %v1608_v34, %v1596_v59  ;;  %v1625_v60 = vadd.f32 %v1619_v24, %v1583_v47 }
 0x2e9   :  { %v1795_v48 = vsel %vm1791_vm3, %v1787_v49, 0.0  ;;  %v1686_v34 = vmul.f32 %v4608_v2, %v4607_v16  ;;  %1831 = vrcp.f32 %v1766_v52 }
 0x2ea   :  { %v1796_v0 = vadd.f32 %v1795_v48, %v4089_v45  ;;  %v1702_v21 = vsub.f32 %v1666_v9, %v3942_v56  ;;  %v1685_v45 = vmul.f32 %v3994_v38, %v4596_v12  ;;  %v1542_v56 = vadd.f32 %v1536_v58, %v1500_v25  ;;  %v1650_v19 = vpop.permute.xlu1 %1649 }
 0x2eb   :  { %v1636_v23 = vpop.permute.xlu0 %1635  ;;  %v1620_v46 = vmul.f32 0.007598758, %v1614_v43  ;;  %v1828_v27 = vpop.eup %1827  ;;  %v1735_v61 = vmul.f32 2.0, %v1686_v34 }
 0x2ec   :  { %v1708_v20 = vmul.f32 2.0, %v1702_v21  ;;  %v1655_v15 = vadd.f32 %v1648_v36, %v1636_v23  ;;  %v1584_v50 = vadd.f32 %v1578_v55, %v1542_v56  ;;  %v1734_v40 = vmul.f32 2.0, %v1685_v45 }
 0x2ed   :  { %v1742_v18 = vadd.f32 %v3762_v39, %v1735_v61 }
 0x2ee   :  { %v1715_v42 = vadd.f32 %v3960_v14, %v1708_v20  ;;  %v1661_v41 = vmul.f32 0.0010283801, %v1655_v15  ;;  %v1626_v12 = vadd.f32 %v1620_v46, %v1584_v50  ;;  %v1741_v5 = vadd.f32 %v3762_v39, %v1734_v40 }
 0x2ef   :  { %v1638_v44 = vpop.permute.xlu0 %1637 }
 0x2f0   :  { %v1746_v63 = vmul.f32 %v1740_v57, %v1715_v42  ;;  %v1667_v54 = vadd.f32 %v1661_v41, %v1625_v60  ;;  %v1656_v13 = vadd.f32 %v1650_v19, %v1638_v44 }
 0x2f1   :  { %v1830_v10 = vpop.eup %1829 }
 0x2f2   :  { %v1774_v38 = vmul.f32 %v1828_v27, %v1746_v63  ;;  %v1703_v26 = vsub.f32 %v1667_v54, %v1685_v45  ;;  %v1662_v8 = vmul.f32 0.0010283801, %v1656_v13 }
 0x2f3   :  { %v1832_v62 = vpop.eup %1831 }
 0x2f4   :  { %v1788_v28 = vsel %vm4057_vm2, %v1774_v38, 0.0  ;;  %v1709_v30 = vmul.f32 2.0, %v1703_v26  ;;  %v1668_v4 = vadd.f32 %v1662_v8, %v1626_v12 }
 0x2f5   :  { %v1797_v3 = vsel %vm1791_vm3, %v1788_v28, 0.0 }
 0x2f6   :  { %v1798_v1 = vadd.f32 %v1797_v3, %v1796_v0  ;;  %v1716_v7 = vadd.f32 %v3960_v14, %v1709_v30  ;;  %v1704_v17 = vsub.f32 %v1668_v4, %v1686_v34 }
 0x2f8   :  { %v1747_v31 = vmul.f32 %v1741_v5, %v1716_v7  ;;  %v1710_v22 = vmul.f32 2.0, %v1704_v17 }
 0x2fa   :  { %v1776_v6 = vmul.f32 %v1830_v10, %v1747_v31  ;;  %v1717_v51 = vadd.f32 %v3960_v14, %v1710_v22 }
 0x2fc   :  { %v1789_v59 = vsel %vm4057_vm2, %v1776_v6, 0.0  ;;  %v1748_v36 = vmul.f32 %v1742_v18, %v1717_v51 }
 0x2fd   :  { %v1799_v49 = vsel %vm1791_vm3, %v1789_v59, 0.0 }
 0x2fe   :  { %v1800_v35 = vadd.f32 %v1799_v49, %v1798_v1  ;;  %v1778_v9 = vmul.f32 %v1832_v62, %v1748_v36 }
 0x300   :  { %v1790_v33 = vsel %vm4057_vm2, %v1778_v9, 0.0 }
 0x301   :  { %v1801_v29 = vsel %vm1791_vm3, %v1790_v33, 0.0 }
 0x302   :  { %v1802_v58 = vadd.f32 %v1801_v29, %v1800_v35 }
 0x304   :  { %1803 = vst [vmem:[%s4165_s3] sm:$0x1] %v1802_v58 }
 0x305   :  { %1808 = vsyncpa [#allocation3], 1 }

</bundles_post_ra>
